<compile_context>
chip_gen: v5e
topology: v5e:2x2
jax: 0.10.0
libtpu: 0.0.40
codegen_flags: <defaults>
</compile_context>

<pallas_src>
import functools

import numpy as np
import jax
import jax.numpy as jnp
from jax import lax
from jax.experimental import pallas as pl
from jax.experimental.pallas import tpu as pltpu


_TAPS = [(dy, dx) for dy in (-1, 0, 1) for dx in (-1, 0, 1)]  # row-major 3x3 taps


def _fused_tinycnn_kernel(*refs, W, L, residual):
    """refs = (mask_ref, x_ref, w1, b1, ..., wL, bL, o_ref).

    mask_ref : (9, 1, lanes)  f32 0/1 validity mask per tap (precomputed host-side)
    x_ref    : (1, Cin0, lanes) activation, images folded onto lanes
    w_l      : (9, Cout_l, Cin_l)  per-tap weights
    b_l      : (Cout_l, 1)
    o_ref    : (1, Cout_last, lanes)
    """
    mask_ref = refs[0]
    x_ref = refs[1]
    o_ref = refs[-1]
    wb = refs[2:-1]
    assert len(wb) == 2 * L

    lanes = x_ref.shape[-1]

    x0 = x_ref[0].astype(jnp.float32)          # (Cin0, lanes)
    act = x0
    for l in range(L):
        w_ref = wb[2 * l]                      # (9, Cout, Cin)
        b_ref = wb[2 * l + 1]                  # (Cout, 1)
        y = None
        for t, (dy, dx) in enumerate(_TAPS):
            s = dy * W + dx
            if s == 0:
                src = act                      # center tap: no shift, always valid
            else:
                # shifted[p] = act[(p + s) mod lanes]; out-of-image taps -> 0 via mask.
                shifted = pltpu.roll(act, shift=(-s) % lanes, axis=1)
                src = shifted * mask_ref[t]    # (Cin, lanes) * (1, lanes)
            # 9 small MXU pushes; the MXU is idle here so these are free, and the big
            # (9*Cin, lanes) im2col buffer never exists.  (On v7x the compiler can keep
            # the accumulation in the MXU result buffer.)
            contrib = jnp.dot(w_ref[t], src, preferred_element_type=jnp.float32)
            y = contrib if y is None else y + contrib
        y = y + b_ref[...]                     # bias broadcast along lanes
        if l < L - 1:
            y = jnp.maximum(y, 0.0)            # ReLU on all but the last conv
        act = y
    if residual:
        act = act + x0
    o_ref[0] = act.astype(o_ref.dtype)


def _make_tap_masks(H, W, imgs_per_step):
    """(9, 1, imgs_per_step*H*W) f32 validity masks; computed with numpy so they are
    baked as constants under jit.  Positions derive from lane % HW so rolls never leak
    pixels across adjacent folded images."""
    HW = H * W
    lane = np.arange(imgs_per_step * HW)
    p = lane % HW
    col = p % W
    row = p // W
    masks = []
    for dy, dx in _TAPS:
        valid = ((col + dx >= 0) & (col + dx < W) &
                 (row + dy >= 0) & (row + dy < H))
        masks.append(valid.astype(np.float32))
    return np.stack(masks).reshape(9, 1, imgs_per_step * HW)


def _pick_imgs_per_step(B, HW, max_lanes=2048):
    """Largest divisor of B that keeps >=2 grid steps (dual-TC v7x) and a bounded lane
    width.  On single-TC chips (v5e/v6e) pass imgs_per_step=B to collapse to one step."""
    min_steps = 2 if B >= 2 else 1
    best = 1
    for d in range(1, B + 1):
        if B % d == 0 and d * HW <= max_lanes and (B // d) >= min_steps:
            best = d
    return best


def pack_params(params):
    """Hoisted, one-time repack: OIHW (Cout,Cin,3,3) -> (9, Cout, Cin) per-tap weights
    (tap order = row-major (ky,kx), matching _TAPS) and (Cout,) bias -> (Cout, 1)."""
    packed = []
    for w, b in params:
        Cout, Cin, KH, KW = w.shape
        w_taps = jnp.transpose(w, (2, 3, 0, 1)).reshape(KH * KW, Cout, Cin)
        packed.append((w_taps, b.reshape(Cout, 1)))
    return packed


def tiny_cnn_forward(x_nchw, packed_params, residual=False, imgs_per_step=None):
    """x_nchw: (B, 3, H, W); packed_params: output of pack_params()."""
    B, C_in, H, W = x_nchw.shape
    HW = H * W
    L = len(packed_params)
    C_out_final = packed_params[-1][0].shape[1]
    if residual:
        assert C_out_final == C_in, "residual requires matching in/out channels"

    if imgs_per_step is None:
        imgs_per_step = _pick_imgs_per_step(B, HW)
    assert B % imgs_per_step == 0
    G = B // imgs_per_step
    lanes = imgs_per_step * HW

    # (B,C,H,W) -> (G, C, imgs*HW): channels on sublanes, images folded on lanes.
    xg = (x_nchw.reshape(G, imgs_per_step, C_in, HW)
                .transpose(0, 2, 1, 3)
                .reshape(G, C_in, lanes))

    mask = jnp.asarray(_make_tap_masks(H, W, imgs_per_step))

    args = [mask, xg]
    in_specs = [
        pl.BlockSpec((9, 1, lanes), lambda g: (0, 0, 0)),
        pl.BlockSpec((1, C_in, lanes), lambda g: (g, 0, 0)),
    ]
    for (w_taps, b_mat) in packed_params:
        _, Cout, Cin = w_taps.shape
        args.append(w_taps)
        in_specs.append(pl.BlockSpec((9, Cout, Cin), lambda g: (0, 0, 0)))
        args.append(b_mat)
        in_specs.append(pl.BlockSpec((Cout, 1), lambda g: (0, 0)))

    kern = functools.partial(_fused_tinycnn_kernel, W=W, L=L, residual=residual)

    flops = int(2 * B * HW * sum(wt.shape[1] * wt.shape[2] * 9
                                 for (wt, _) in packed_params))
    bytes_accessed = int(4 * (xg.size + G * C_out_final * lanes + mask.size
                              + sum(wt.size + bm.size for (wt, bm) in packed_params)))

    out = pl.pallas_call(
        kern,
        out_shape=jax.ShapeDtypeStruct((G, C_out_final, lanes), x_nchw.dtype),
        grid=(G,),
        in_specs=in_specs,
        out_specs=pl.BlockSpec((1, C_out_final, lanes), lambda g: (g, 0, 0)),
        compiler_params=pltpu.CompilerParams(
            dimension_semantics=("parallel",),   # independent image groups -> both v7x TCs
        ),
        cost_estimate=pl.CostEstimate(
            flops=flops, transcendentals=0, bytes_accessed=bytes_accessed),
    )(*args)

    return (out.reshape(G, C_out_final, imgs_per_step, HW)
               .transpose(0, 2, 1, 3)
               .reshape(B, C_out_final, H, W))


def init_tiny_cnn_params(key, L, N):
    """Deterministic init mimicking PyTorch Conv2d defaults (OIHW weights)."""
    def conv_params(k, cin, cout):
        kw, kb = jax.random.split(k)
        bound = 1.0 / jnp.sqrt(cin * 9.0)
        w = jax.random.uniform(kw, (cout, cin, 3, 3), jnp.float32, -bound, bound)
        b = jax.random.uniform(kb, (cout,), jnp.float32, -bound, bound)
        return w, b

    keys = jax.random.split(key, L)
    params = [conv_params(keys[0], 3, N)]
    for i in range(L - 2):
        params.append(conv_params(keys[1 + i], N, N))
    params.append(conv_params(keys[L - 1], N, 3))
    return params


def _reference_forward(x_nchw, params, residual=False):
    """Pure-JAX reference (lax conv, NCHW/OIHW) for correctness checking."""
    def conv(x, w, b):
        y = lax.conv_general_dilated(
            x, w, window_strides=(1, 1), padding=((1, 1), (1, 1)),
            dimension_numbers=("NCHW", "OIHW", "NCHW"))
        return y + b.reshape(1, -1, 1, 1)

    L = len(params)
    out = x_nchw
    for l, (w, b) in enumerate(params):
        out = conv(out, w, b)
        if l < L - 1:
            out = jax.nn.relu(out)
    if residual:
        out = out + x_nchw
    return out


if __name__ == "__main__":
    L, N = 4, 8           # L convs total, N hidden channels
    B, H, W = 8, 16, 16   # batch folded 4-per-step -> grid of 2 lane-dense steps
    residual = False      # matches the module's default

    key = jax.random.PRNGKey(0)
    kx, kp = jax.random.split(key)
    x = jax.random.normal(kx, (B, 3, H, W), jnp.float32)
    params = init_tiny_cnn_params(kp, L, N)
    packed = pack_params(params)          # one-time host-side repack (hoisted)

    fwd = jax.jit(functools.partial(tiny_cnn_forward, residual=residual))
    out = jax.block_until_ready(fwd(x, packed))
    ref = jax.block_until_ready(_reference_forward(x, params, residual=residual))

    assert out.shape == (B, 3, H, W)
    assert jnp.max(jnp.abs(out - ref)) < 1e-4, "Pallas fused conv mismatch vs reference"

    print("KERNEL_OK")
</pallas_src>

<mosaic_0001>
module attributes {stable_mosaic.version = 11 : i64} {
  func.func @_fused_tinycnn_kernel(%arg0: i32, %arg1: memref<9x1x1024xf32, #tpu.memory_space<vmem>>, %arg2: memref<1x3x1024xf32, #tpu.memory_space<vmem>>, %arg3: memref<9x8x3xf32, #tpu.memory_space<vmem>>, %arg4: memref<8x1xf32, #tpu.memory_space<vmem>>, %arg5: memref<9x8x8xf32, #tpu.memory_space<vmem>>, %arg6: memref<8x1xf32, #tpu.memory_space<vmem>>, %arg7: memref<9x8x8xf32, #tpu.memory_space<vmem>>, %arg8: memref<8x1xf32, #tpu.memory_space<vmem>>, %arg9: memref<9x3x8xf32, #tpu.memory_space<vmem>>, %arg10: memref<3x1xf32, #tpu.memory_space<vmem>>, %arg11: memref<1x3x1024xf32, #tpu.memory_space<vmem>>) attributes {dimension_semantics = [#tpu.dimension_semantics<parallel>], iteration_bounds = array<i64: 2>, scalar_prefetch = 0 : i64, scratch_operands = 0 : i64, tpu.core_type = #tpu.core_type<tc>, window_params = [{pipeline_mode = #tpu.pipeline_mode<synchronous>, transform_indices = @transform_0, window_bounds = array<i64: 9, 1, 1024>}, {transform_indices = @transform_1, window_bounds = array<i64: 1, 3, 1024>}, {pipeline_mode = #tpu.pipeline_mode<synchronous>, transform_indices = @transform_2, window_bounds = array<i64: 9, 8, 3>}, {pipeline_mode = #tpu.pipeline_mode<synchronous>, transform_indices = @transform_3, window_bounds = array<i64: 8, 1>}, {pipeline_mode = #tpu.pipeline_mode<synchronous>, transform_indices = @transform_4, window_bounds = array<i64: 9, 8, 8>}, {pipeline_mode = #tpu.pipeline_mode<synchronous>, transform_indices = @transform_5, window_bounds = array<i64: 8, 1>}, {pipeline_mode = #tpu.pipeline_mode<synchronous>, transform_indices = @transform_6, window_bounds = array<i64: 9, 8, 8>}, {pipeline_mode = #tpu.pipeline_mode<synchronous>, transform_indices = @transform_7, window_bounds = array<i64: 8, 1>}, {pipeline_mode = #tpu.pipeline_mode<synchronous>, transform_indices = @transform_8, window_bounds = array<i64: 9, 3, 8>}, {pipeline_mode = #tpu.pipeline_mode<synchronous>, transform_indices = @transform_9, window_bounds = array<i64: 3, 1>}, {transform_indices = @transform_10, window_bounds = array<i64: 1, 3, 1024>}]} {
    %c0 = arith.constant 0 : index
    %c0_0 = arith.constant 0 : index
    %c0_1 = arith.constant 0 : index
    %0 = vector.load %arg2[%c0, %c0_0, %c0_1] : memref<1x3x1024xf32, #tpu.memory_space<vmem>>, vector<1x3x1024xf32>
    %1 = vector.shape_cast %0 : vector<1x3x1024xf32> to vector<3x1024xf32>
    %c17_i32 = arith.constant 17 : i32
    %2 = tpu.dynamic_rotate %1 by %c17_i32 dim 1 : vector<3x1024xf32>, i32 -> vector<3x1024xf32>
    %c0_2 = arith.constant 0 : index
    %c0_3 = arith.constant 0 : index
    %c0_4 = arith.constant 0 : index
    %3 = vector.load %arg1[%c0_2, %c0_3, %c0_4] : memref<9x1x1024xf32, #tpu.memory_space<vmem>>, vector<1x1x1024xf32>
    %4 = vector.shape_cast %3 : vector<1x1x1024xf32> to vector<1x1024xf32>
    %5 = vector.broadcast %4 : vector<1x1024xf32> to vector<3x1024xf32>
    %6 = arith.mulf %2, %5 : vector<3x1024xf32>
    %c0_5 = arith.constant 0 : index
    %c0_6 = arith.constant 0 : index
    %c0_7 = arith.constant 0 : index
    %7 = vector.load %arg3[%c0_5, %c0_6, %c0_7] : memref<9x8x3xf32, #tpu.memory_space<vmem>>, vector<1x8x3xf32>
    %8 = vector.shape_cast %7 : vector<1x8x3xf32> to vector<8x3xf32>
    %cst = arith.constant dense<0.000000e+00> : vector<8x1024xf32>
    %9 = tpu.matmul %8, %6, %cst {dimension_numbers = #tpu.dot_dimension_numbers<[1], [0], [0], [1], [0, 0, 1, 1], [], []>} : vector<8x3xf32>, vector<3x1024xf32>, vector<8x1024xf32> -> vector<8x1024xf32>
    %c16_i32 = arith.constant 16 : i32
    %10 = tpu.dynamic_rotate %1 by %c16_i32 dim 1 : vector<3x1024xf32>, i32 -> vector<3x1024xf32>
    %c1 = arith.constant 1 : index
    %c0_8 = arith.constant 0 : index
    %c0_9 = arith.constant 0 : index
    %11 = vector.load %arg1[%c1, %c0_8, %c0_9] : memref<9x1x1024xf32, #tpu.memory_space<vmem>>, vector<1x1x1024xf32>
    %12 = vector.shape_cast %11 : vector<1x1x1024xf32> to vector<1x1024xf32>
    %13 = vector.broadcast %12 : vector<1x1024xf32> to vector<3x1024xf32>
    %14 = arith.mulf %10, %13 : vector<3x1024xf32>
    %c1_10 = arith.constant 1 : index
    %c0_11 = arith.constant 0 : index
    %c0_12 = arith.constant 0 : index
    %15 = vector.load %arg3[%c1_10, %c0_11, %c0_12] : memref<9x8x3xf32, #tpu.memory_space<vmem>>, vector<1x8x3xf32>
    %16 = vector.shape_cast %15 : vector<1x8x3xf32> to vector<8x3xf32>
    %cst_13 = arith.constant dense<0.000000e+00> : vector<8x1024xf32>
    %17 = tpu.matmul %16, %14, %cst_13 {dimension_numbers = #tpu.dot_dimension_numbers<[1], [0], [0], [1], [0, 0, 1, 1], [], []>} : vector<8x3xf32>, vector<3x1024xf32>, vector<8x1024xf32> -> vector<8x1024xf32>
    %18 = arith.addf %9, %17 : vector<8x1024xf32>
    %c15_i32 = arith.constant 15 : i32
    %19 = tpu.dynamic_rotate %1 by %c15_i32 dim 1 : vector<3x1024xf32>, i32 -> vector<3x1024xf32>
    %c2 = arith.constant 2 : index
    %c0_14 = arith.constant 0 : index
    %c0_15 = arith.constant 0 : index
    %20 = vector.load %arg1[%c2, %c0_14, %c0_15] : memref<9x1x1024xf32, #tpu.memory_space<vmem>>, vector<1x1x1024xf32>
    %21 = vector.shape_cast %20 : vector<1x1x1024xf32> to vector<1x1024xf32>
    %22 = vector.broadcast %21 : vector<1x1024xf32> to vector<3x1024xf32>
    %23 = arith.mulf %19, %22 : vector<3x1024xf32>
    %c2_16 = arith.constant 2 : index
    %c0_17 = arith.constant 0 : index
    %c0_18 = arith.constant 0 : index
    %24 = vector.load %arg3[%c2_16, %c0_17, %c0_18] : memref<9x8x3xf32, #tpu.memory_space<vmem>>, vector<1x8x3xf32>
    %25 = vector.shape_cast %24 : vector<1x8x3xf32> to vector<8x3xf32>
    %cst_19 = arith.constant dense<0.000000e+00> : vector<8x1024xf32>
    %26 = tpu.matmul %25, %23, %cst_19 {dimension_numbers = #tpu.dot_dimension_numbers<[1], [0], [0], [1], [0, 0, 1, 1], [], []>} : vector<8x3xf32>, vector<3x1024xf32>, vector<8x1024xf32> -> vector<8x1024xf32>
    %27 = arith.addf %18, %26 : vector<8x1024xf32>
    %c1_i32 = arith.constant 1 : i32
    %28 = tpu.dynamic_rotate %1 by %c1_i32 dim 1 : vector<3x1024xf32>, i32 -> vector<3x1024xf32>
    %c3 = arith.constant 3 : index
    %c0_20 = arith.constant 0 : index
    %c0_21 = arith.constant 0 : index
    %29 = vector.load %arg1[%c3, %c0_20, %c0_21] : memref<9x1x1024xf32, #tpu.memory_space<vmem>>, vector<1x1x1024xf32>
    %30 = vector.shape_cast %29 : vector<1x1x1024xf32> to vector<1x1024xf32>
    %31 = vector.broadcast %30 : vector<1x1024xf32> to vector<3x1024xf32>
    %32 = arith.mulf %28, %31 : vector<3x1024xf32>
    %c3_22 = arith.constant 3 : index
    %c0_23 = arith.constant 0 : index
    %c0_24 = arith.constant 0 : index
    %33 = vector.load %arg3[%c3_22, %c0_23, %c0_24] : memref<9x8x3xf32, #tpu.memory_space<vmem>>, vector<1x8x3xf32>
    %34 = vector.shape_cast %33 : vector<1x8x3xf32> to vector<8x3xf32>
    %cst_25 = arith.constant dense<0.000000e+00> : vector<8x1024xf32>
    %35 = tpu.matmul %34, %32, %cst_25 {dimension_numbers = #tpu.dot_dimension_numbers<[1], [0], [0], [1], [0, 0, 1, 1], [], []>} : vector<8x3xf32>, vector<3x1024xf32>, vector<8x1024xf32> -> vector<8x1024xf32>
    %36 = arith.addf %27, %35 : vector<8x1024xf32>
    %c4 = arith.constant 4 : index
    %c0_26 = arith.constant 0 : index
    %c0_27 = arith.constant 0 : index
    %37 = vector.load %arg3[%c4, %c0_26, %c0_27] : memref<9x8x3xf32, #tpu.memory_space<vmem>>, vector<1x8x3xf32>
    %38 = vector.shape_cast %37 : vector<1x8x3xf32> to vector<8x3xf32>
    %cst_28 = arith.constant dense<0.000000e+00> : vector<8x1024xf32>
    %39 = tpu.matmul %38, %1, %cst_28 {dimension_numbers = #tpu.dot_dimension_numbers<[1], [0], [0], [1], [0, 0, 1, 1], [], []>} : vector<8x3xf32>, vector<3x1024xf32>, vector<8x1024xf32> -> vector<8x1024xf32>
    %40 = arith.addf %36, %39 : vector<8x1024xf32>
    %c1023_i32 = arith.constant 1023 : i32
    %41 = tpu.dynamic_rotate %1 by %c1023_i32 dim 1 : vector<3x1024xf32>, i32 -> vector<3x1024xf32>
    %c5 = arith.constant 5 : index
    %c0_29 = arith.constant 0 : index
    %c0_30 = arith.constant 0 : index
    %42 = vector.load %arg1[%c5, %c0_29, %c0_30] : memref<9x1x1024xf32, #tpu.memory_space<vmem>>, vector<1x1x1024xf32>
    %43 = vector.shape_cast %42 : vector<1x1x1024xf32> to vector<1x1024xf32>
    %44 = vector.broadcast %43 : vector<1x1024xf32> to vector<3x1024xf32>
    %45 = arith.mulf %41, %44 : vector<3x1024xf32>
    %c5_31 = arith.constant 5 : index
    %c0_32 = arith.constant 0 : index
    %c0_33 = arith.constant 0 : index
    %46 = vector.load %arg3[%c5_31, %c0_32, %c0_33] : memref<9x8x3xf32, #tpu.memory_space<vmem>>, vector<1x8x3xf32>
    %47 = vector.shape_cast %46 : vector<1x8x3xf32> to vector<8x3xf32>
    %cst_34 = arith.constant dense<0.000000e+00> : vector<8x1024xf32>
    %48 = tpu.matmul %47, %45, %cst_34 {dimension_numbers = #tpu.dot_dimension_numbers<[1], [0], [0], [1], [0, 0, 1, 1], [], []>} : vector<8x3xf32>, vector<3x1024xf32>, vector<8x1024xf32> -> vector<8x1024xf32>
    %49 = arith.addf %40, %48 : vector<8x1024xf32>
    %c1009_i32 = arith.constant 1009 : i32
    %50 = tpu.dynamic_rotate %1 by %c1009_i32 dim 1 : vector<3x1024xf32>, i32 -> vector<3x1024xf32>
    %c6 = arith.constant 6 : index
    %c0_35 = arith.constant 0 : index
    %c0_36 = arith.constant 0 : index
    %51 = vector.load %arg1[%c6, %c0_35, %c0_36] : memref<9x1x1024xf32, #tpu.memory_space<vmem>>, vector<1x1x1024xf32>
    %52 = vector.shape_cast %51 : vector<1x1x1024xf32> to vector<1x1024xf32>
    %53 = vector.broadcast %52 : vector<1x1024xf32> to vector<3x1024xf32>
    %54 = arith.mulf %50, %53 : vector<3x1024xf32>
    %c6_37 = arith.constant 6 : index
    %c0_38 = arith.constant 0 : index
    %c0_39 = arith.constant 0 : index
    %55 = vector.load %arg3[%c6_37, %c0_38, %c0_39] : memref<9x8x3xf32, #tpu.memory_space<vmem>>, vector<1x8x3xf32>
    %56 = vector.shape_cast %55 : vector<1x8x3xf32> to vector<8x3xf32>
    %cst_40 = arith.constant dense<0.000000e+00> : vector<8x1024xf32>
    %57 = tpu.matmul %56, %54, %cst_40 {dimension_numbers = #tpu.dot_dimension_numbers<[1], [0], [0], [1], [0, 0, 1, 1], [], []>} : vector<8x3xf32>, vector<3x1024xf32>, vector<8x1024xf32> -> vector<8x1024xf32>
    %58 = arith.addf %49, %57 : vector<8x1024xf32>
    %c1008_i32 = arith.constant 1008 : i32
    %59 = tpu.dynamic_rotate %1 by %c1008_i32 dim 1 : vector<3x1024xf32>, i32 -> vector<3x1024xf32>
    %c7 = arith.constant 7 : index
    %c0_41 = arith.constant 0 : index
    %c0_42 = arith.constant 0 : index
    %60 = vector.load %arg1[%c7, %c0_41, %c0_42] : memref<9x1x1024xf32, #tpu.memory_space<vmem>>, vector<1x1x1024xf32>
    %61 = vector.shape_cast %60 : vector<1x1x1024xf32> to vector<1x1024xf32>
    %62 = vector.broadcast %61 : vector<1x1024xf32> to vector<3x1024xf32>
    %63 = arith.mulf %59, %62 : vector<3x1024xf32>
    %c7_43 = arith.constant 7 : index
    %c0_44 = arith.constant 0 : index
    %c0_45 = arith.constant 0 : index
    %64 = vector.load %arg3[%c7_43, %c0_44, %c0_45] : memref<9x8x3xf32, #tpu.memory_space<vmem>>, vector<1x8x3xf32>
    %65 = vector.shape_cast %64 : vector<1x8x3xf32> to vector<8x3xf32>
    %cst_46 = arith.constant dense<0.000000e+00> : vector<8x1024xf32>
    %66 = tpu.matmul %65, %63, %cst_46 {dimension_numbers = #tpu.dot_dimension_numbers<[1], [0], [0], [1], [0, 0, 1, 1], [], []>} : vector<8x3xf32>, vector<3x1024xf32>, vector<8x1024xf32> -> vector<8x1024xf32>
    %67 = arith.addf %58, %66 : vector<8x1024xf32>
    %c1007_i32 = arith.constant 1007 : i32
    %68 = tpu.dynamic_rotate %1 by %c1007_i32 dim 1 : vector<3x1024xf32>, i32 -> vector<3x1024xf32>
    %c8 = arith.constant 8 : index
    %c0_47 = arith.constant 0 : index
    %c0_48 = arith.constant 0 : index
    %69 = vector.load %arg1[%c8, %c0_47, %c0_48] : memref<9x1x1024xf32, #tpu.memory_space<vmem>>, vector<1x1x1024xf32>
    %70 = vector.shape_cast %69 : vector<1x1x1024xf32> to vector<1x1024xf32>
    %71 = vector.broadcast %70 : vector<1x1024xf32> to vector<3x1024xf32>
    %72 = arith.mulf %68, %71 : vector<3x1024xf32>
    %c8_49 = arith.constant 8 : index
    %c0_50 = arith.constant 0 : index
    %c0_51 = arith.constant 0 : index
    %73 = vector.load %arg3[%c8_49, %c0_50, %c0_51] : memref<9x8x3xf32, #tpu.memory_space<vmem>>, vector<1x8x3xf32>
    %74 = vector.shape_cast %73 : vector<1x8x3xf32> to vector<8x3xf32>
    %cst_52 = arith.constant dense<0.000000e+00> : vector<8x1024xf32>
    %75 = tpu.matmul %74, %72, %cst_52 {dimension_numbers = #tpu.dot_dimension_numbers<[1], [0], [0], [1], [0, 0, 1, 1], [], []>} : vector<8x3xf32>, vector<3x1024xf32>, vector<8x1024xf32> -> vector<8x1024xf32>
    %76 = arith.addf %67, %75 : vector<8x1024xf32>
    %c0_53 = arith.constant 0 : index
    %c0_54 = arith.constant 0 : index
    %77 = vector.load %arg4[%c0_53, %c0_54] : memref<8x1xf32, #tpu.memory_space<vmem>>, vector<8x1xf32>
    %78 = vector.broadcast %77 : vector<8x1xf32> to vector<8x1024xf32>
    %79 = arith.addf %76, %78 : vector<8x1024xf32>
    %cst_55 = arith.constant 0.000000e+00 : f32
    %80 = vector.broadcast %cst_55 : f32 to vector<8x1024xf32>
    %81 = arith.maximumf %79, %80 : vector<8x1024xf32>
    %c17_i32_56 = arith.constant 17 : i32
    %82 = tpu.dynamic_rotate %81 by %c17_i32_56 dim 1 : vector<8x1024xf32>, i32 -> vector<8x1024xf32>
    %c0_57 = arith.constant 0 : index
    %c0_58 = arith.constant 0 : index
    %c0_59 = arith.constant 0 : index
    %83 = vector.load %arg1[%c0_57, %c0_58, %c0_59] : memref<9x1x1024xf32, #tpu.memory_space<vmem>>, vector<1x1x1024xf32>
    %84 = vector.shape_cast %83 : vector<1x1x1024xf32> to vector<1x1024xf32>
    %85 = vector.broadcast %84 : vector<1x1024xf32> to vector<8x1024xf32>
    %86 = arith.mulf %82, %85 : vector<8x1024xf32>
    %c0_60 = arith.constant 0 : index
    %c0_61 = arith.constant 0 : index
    %c0_62 = arith.constant 0 : index
    %87 = vector.load %arg5[%c0_60, %c0_61, %c0_62] : memref<9x8x8xf32, #tpu.memory_space<vmem>>, vector<1x8x8xf32>
    %88 = vector.shape_cast %87 : vector<1x8x8xf32> to vector<8x8xf32>
    %cst_63 = arith.constant dense<0.000000e+00> : vector<8x1024xf32>
    %89 = tpu.matmul %88, %86, %cst_63 {dimension_numbers = #tpu.dot_dimension_numbers<[1], [0], [0], [1], [0, 0, 1, 1], [], []>} : vector<8x8xf32>, vector<8x1024xf32>, vector<8x1024xf32> -> vector<8x1024xf32>
    %c16_i32_64 = arith.constant 16 : i32
    %90 = tpu.dynamic_rotate %81 by %c16_i32_64 dim 1 : vector<8x1024xf32>, i32 -> vector<8x1024xf32>
    %c1_65 = arith.constant 1 : index
    %c0_66 = arith.constant 0 : index
    %c0_67 = arith.constant 0 : index
    %91 = vector.load %arg1[%c1_65, %c0_66, %c0_67] : memref<9x1x1024xf32, #tpu.memory_space<vmem>>, vector<1x1x1024xf32>
    %92 = vector.shape_cast %91 : vector<1x1x1024xf32> to vector<1x1024xf32>
    %93 = vector.broadcast %92 : vector<1x1024xf32> to vector<8x1024xf32>
    %94 = arith.mulf %90, %93 : vector<8x1024xf32>
    %c1_68 = arith.constant 1 : index
    %c0_69 = arith.constant 0 : index
    %c0_70 = arith.constant 0 : index
    %95 = vector.load %arg5[%c1_68, %c0_69, %c0_70] : memref<9x8x8xf32, #tpu.memory_space<vmem>>, vector<1x8x8xf32>
    %96 = vector.shape_cast %95 : vector<1x8x8xf32> to vector<8x8xf32>
    %cst_71 = arith.constant dense<0.000000e+00> : vector<8x1024xf32>
    %97 = tpu.matmul %96, %94, %cst_71 {dimension_numbers = #tpu.dot_dimension_numbers<[1], [0], [0], [1], [0, 0, 1, 1], [], []>} : vector<8x8xf32>, vector<8x1024xf32>, vector<8x1024xf32> -> vector<8x1024xf32>
    %98 = arith.addf %89, %97 : vector<8x1024xf32>
    %c15_i32_72 = arith.constant 15 : i32
    %99 = tpu.dynamic_rotate %81 by %c15_i32_72 dim 1 : vector<8x1024xf32>, i32 -> vector<8x1024xf32>
    %c2_73 = arith.constant 2 : index
    %c0_74 = arith.constant 0 : index
    %c0_75 = arith.constant 0 : index
    %100 = vector.load %arg1[%c2_73, %c0_74, %c0_75] : memref<9x1x1024xf32, #tpu.memory_space<vmem>>, vector<1x1x1024xf32>
    %101 = vector.shape_cast %100 : vector<1x1x1024xf32> to vector<1x1024xf32>
    %102 = vector.broadcast %101 : vector<1x1024xf32> to vector<8x1024xf32>
    %103 = arith.mulf %99, %102 : vector<8x1024xf32>
    %c2_76 = arith.constant 2 : index
    %c0_77 = arith.constant 0 : index
    %c0_78 = arith.constant 0 : index
    %104 = vector.load %arg5[%c2_76, %c0_77, %c0_78] : memref<9x8x8xf32, #tpu.memory_space<vmem>>, vector<1x8x8xf32>
    %105 = vector.shape_cast %104 : vector<1x8x8xf32> to vector<8x8xf32>
    %cst_79 = arith.constant dense<0.000000e+00> : vector<8x1024xf32>
    %106 = tpu.matmul %105, %103, %cst_79 {dimension_numbers = #tpu.dot_dimension_numbers<[1], [0], [0], [1], [0, 0, 1, 1], [], []>} : vector<8x8xf32>, vector<8x1024xf32>, vector<8x1024xf32> -> vector<8x1024xf32>
    %107 = arith.addf %98, %106 : vector<8x1024xf32>
    %c1_i32_80 = arith.constant 1 : i32
    %108 = tpu.dynamic_rotate %81 by %c1_i32_80 dim 1 : vector<8x1024xf32>, i32 -> vector<8x1024xf32>
    %c3_81 = arith.constant 3 : index
    %c0_82 = arith.constant 0 : index
    %c0_83 = arith.constant 0 : index
    %109 = vector.load %arg1[%c3_81, %c0_82, %c0_83] : memref<9x1x1024xf32, #tpu.memory_space<vmem>>, vector<1x1x1024xf32>
    %110 = vector.shape_cast %109 : vector<1x1x1024xf32> to vector<1x1024xf32>
    %111 = vector.broadcast %110 : vector<1x1024xf32> to vector<8x1024xf32>
    %112 = arith.mulf %108, %111 : vector<8x1024xf32>
    %c3_84 = arith.constant 3 : index
    %c0_85 = arith.constant 0 : index
    %c0_86 = arith.constant 0 : index
    %113 = vector.load %arg5[%c3_84, %c0_85, %c0_86] : memref<9x8x8xf32, #tpu.memory_space<vmem>>, vector<1x8x8xf32>
    %114 = vector.shape_cast %113 : vector<1x8x8xf32> to vector<8x8xf32>
    %cst_87 = arith.constant dense<0.000000e+00> : vector<8x1024xf32>
    %115 = tpu.matmul %114, %112, %cst_87 {dimension_numbers = #tpu.dot_dimension_numbers<[1], [0], [0], [1], [0, 0, 1, 1], [], []>} : vector<8x8xf32>, vector<8x1024xf32>, vector<8x1024xf32> -> vector<8x1024xf32>
    %116 = arith.addf %107, %115 : vector<8x1024xf32>
    %c4_88 = arith.constant 4 : index
    %c0_89 = arith.constant 0 : index
    %c0_90 = arith.constant 0 : index
    %117 = vector.load %arg5[%c4_88, %c0_89, %c0_90] : memref<9x8x8xf32, #tpu.memory_space<vmem>>, vector<1x8x8xf32>
    %118 = vector.shape_cast %117 : vector<1x8x8xf32> to vector<8x8xf32>
    %cst_91 = arith.constant dense<0.000000e+00> : vector<8x1024xf32>
    %119 = tpu.matmul %118, %81, %cst_91 {dimension_numbers = #tpu.dot_dimension_numbers<[1], [0], [0], [1], [0, 0, 1, 1], [], []>} : vector<8x8xf32>, vector<8x1024xf32>, vector<8x1024xf32> -> vector<8x1024xf32>
    %120 = arith.addf %116, %119 : vector<8x1024xf32>
    %c1023_i32_92 = arith.constant 1023 : i32
    %121 = tpu.dynamic_rotate %81 by %c1023_i32_92 dim 1 : vector<8x1024xf32>, i32 -> vector<8x1024xf32>
    %c5_93 = arith.constant 5 : index
    %c0_94 = arith.constant 0 : index
    %c0_95 = arith.constant 0 : index
    %122 = vector.load %arg1[%c5_93, %c0_94, %c0_95] : memref<9x1x1024xf32, #tpu.memory_space<vmem>>, vector<1x1x1024xf32>
    %123 = vector.shape_cast %122 : vector<1x1x1024xf32> to vector<1x1024xf32>
    %124 = vector.broadcast %123 : vector<1x1024xf32> to vector<8x1024xf32>
    %125 = arith.mulf %121, %124 : vector<8x1024xf32>
    %c5_96 = arith.constant 5 : index
    %c0_97 = arith.constant 0 : index
    %c0_98 = arith.constant 0 : index
    %126 = vector.load %arg5[%c5_96, %c0_97, %c0_98] : memref<9x8x8xf32, #tpu.memory_space<vmem>>, vector<1x8x8xf32>
    %127 = vector.shape_cast %126 : vector<1x8x8xf32> to vector<8x8xf32>
    %cst_99 = arith.constant dense<0.000000e+00> : vector<8x1024xf32>
    %128 = tpu.matmul %127, %125, %cst_99 {dimension_numbers = #tpu.dot_dimension_numbers<[1], [0], [0], [1], [0, 0, 1, 1], [], []>} : vector<8x8xf32>, vector<8x1024xf32>, vector<8x1024xf32> -> vector<8x1024xf32>
    %129 = arith.addf %120, %128 : vector<8x1024xf32>
    %c1009_i32_100 = arith.constant 1009 : i32
    %130 = tpu.dynamic_rotate %81 by %c1009_i32_100 dim 1 : vector<8x1024xf32>, i32 -> vector<8x1024xf32>
    %c6_101 = arith.constant 6 : index
    %c0_102 = arith.constant 0 : index
    %c0_103 = arith.constant 0 : index
    %131 = vector.load %arg1[%c6_101, %c0_102, %c0_103] : memref<9x1x1024xf32, #tpu.memory_space<vmem>>, vector<1x1x1024xf32>
    %132 = vector.shape_cast %131 : vector<1x1x1024xf32> to vector<1x1024xf32>
    %133 = vector.broadcast %132 : vector<1x1024xf32> to vector<8x1024xf32>
    %134 = arith.mulf %130, %133 : vector<8x1024xf32>
    %c6_104 = arith.constant 6 : index
    %c0_105 = arith.constant 0 : index
    %c0_106 = arith.constant 0 : index
    %135 = vector.load %arg5[%c6_104, %c0_105, %c0_106] : memref<9x8x8xf32, #tpu.memory_space<vmem>>, vector<1x8x8xf32>
    %136 = vector.shape_cast %135 : vector<1x8x8xf32> to vector<8x8xf32>
    %cst_107 = arith.constant dense<0.000000e+00> : vector<8x1024xf32>
    %137 = tpu.matmul %136, %134, %cst_107 {dimension_numbers = #tpu.dot_dimension_numbers<[1], [0], [0], [1], [0, 0, 1, 1], [], []>} : vector<8x8xf32>, vector<8x1024xf32>, vector<8x1024xf32> -> vector<8x1024xf32>
    %138 = arith.addf %129, %137 : vector<8x1024xf32>
    %c1008_i32_108 = arith.constant 1008 : i32
    %139 = tpu.dynamic_rotate %81 by %c1008_i32_108 dim 1 : vector<8x1024xf32>, i32 -> vector<8x1024xf32>
    %c7_109 = arith.constant 7 : index
    %c0_110 = arith.constant 0 : index
    %c0_111 = arith.constant 0 : index
    %140 = vector.load %arg1[%c7_109, %c0_110, %c0_111] : memref<9x1x1024xf32, #tpu.memory_space<vmem>>, vector<1x1x1024xf32>
    %141 = vector.shape_cast %140 : vector<1x1x1024xf32> to vector<1x1024xf32>
    %142 = vector.broadcast %141 : vector<1x1024xf32> to vector<8x1024xf32>
    %143 = arith.mulf %139, %142 : vector<8x1024xf32>
    %c7_112 = arith.constant 7 : index
    %c0_113 = arith.constant 0 : index
    %c0_114 = arith.constant 0 : index
    %144 = vector.load %arg5[%c7_112, %c0_113, %c0_114] : memref<9x8x8xf32, #tpu.memory_space<vmem>>, vector<1x8x8xf32>
    %145 = vector.shape_cast %144 : vector<1x8x8xf32> to vector<8x8xf32>
    %cst_115 = arith.constant dense<0.000000e+00> : vector<8x1024xf32>
    %146 = tpu.matmul %145, %143, %cst_115 {dimension_numbers = #tpu.dot_dimension_numbers<[1], [0], [0], [1], [0, 0, 1, 1], [], []>} : vector<8x8xf32>, vector<8x1024xf32>, vector<8x1024xf32> -> vector<8x1024xf32>
    %147 = arith.addf %138, %146 : vector<8x1024xf32>
    %c1007_i32_116 = arith.constant 1007 : i32
    %148 = tpu.dynamic_rotate %81 by %c1007_i32_116 dim 1 : vector<8x1024xf32>, i32 -> vector<8x1024xf32>
    %c8_117 = arith.constant 8 : index
    %c0_118 = arith.constant 0 : index
    %c0_119 = arith.constant 0 : index
    %149 = vector.load %arg1[%c8_117, %c0_118, %c0_119] : memref<9x1x1024xf32, #tpu.memory_space<vmem>>, vector<1x1x1024xf32>
    %150 = vector.shape_cast %149 : vector<1x1x1024xf32> to vector<1x1024xf32>
    %151 = vector.broadcast %150 : vector<1x1024xf32> to vector<8x1024xf32>
    %152 = arith.mulf %148, %151 : vector<8x1024xf32>
    %c8_120 = arith.constant 8 : index
    %c0_121 = arith.constant 0 : index
    %c0_122 = arith.constant 0 : index
    %153 = vector.load %arg5[%c8_120, %c0_121, %c0_122] : memref<9x8x8xf32, #tpu.memory_space<vmem>>, vector<1x8x8xf32>
    %154 = vector.shape_cast %153 : vector<1x8x8xf32> to vector<8x8xf32>
    %cst_123 = arith.constant dense<0.000000e+00> : vector<8x1024xf32>
    %155 = tpu.matmul %154, %152, %cst_123 {dimension_numbers = #tpu.dot_dimension_numbers<[1], [0], [0], [1], [0, 0, 1, 1], [], []>} : vector<8x8xf32>, vector<8x1024xf32>, vector<8x1024xf32> -> vector<8x1024xf32>
    %156 = arith.addf %147, %155 : vector<8x1024xf32>
    %c0_124 = arith.constant 0 : index
    %c0_125 = arith.constant 0 : index
    %157 = vector.load %arg6[%c0_124, %c0_125] : memref<8x1xf32, #tpu.memory_space<vmem>>, vector<8x1xf32>
    %158 = vector.broadcast %157 : vector<8x1xf32> to vector<8x1024xf32>
    %159 = arith.addf %156, %158 : vector<8x1024xf32>
    %cst_126 = arith.constant 0.000000e+00 : f32
    %160 = vector.broadcast %cst_126 : f32 to vector<8x1024xf32>
    %161 = arith.maximumf %159, %160 : vector<8x1024xf32>
    %c17_i32_127 = arith.constant 17 : i32
    %162 = tpu.dynamic_rotate %161 by %c17_i32_127 dim 1 : vector<8x1024xf32>, i32 -> vector<8x1024xf32>
    %c0_128 = arith.constant 0 : index
    %c0_129 = arith.constant 0 : index
    %c0_130 = arith.constant 0 : index
    %163 = vector.load %arg1[%c0_128, %c0_129, %c0_130] : memref<9x1x1024xf32, #tpu.memory_space<vmem>>, vector<1x1x1024xf32>
    %164 = vector.shape_cast %163 : vector<1x1x1024xf32> to vector<1x1024xf32>
    %165 = vector.broadcast %164 : vector<1x1024xf32> to vector<8x1024xf32>
    %166 = arith.mulf %162, %165 : vector<8x1024xf32>
    %c0_131 = arith.constant 0 : index
    %c0_132 = arith.constant 0 : index
    %c0_133 = arith.constant 0 : index
    %167 = vector.load %arg7[%c0_131, %c0_132, %c0_133] : memref<9x8x8xf32, #tpu.memory_space<vmem>>, vector<1x8x8xf32>
    %168 = vector.shape_cast %167 : vector<1x8x8xf32> to vector<8x8xf32>
    %cst_134 = arith.constant dense<0.000000e+00> : vector<8x1024xf32>
    %169 = tpu.matmul %168, %166, %cst_134 {dimension_numbers = #tpu.dot_dimension_numbers<[1], [0], [0], [1], [0, 0, 1, 1], [], []>} : vector<8x8xf32>, vector<8x1024xf32>, vector<8x1024xf32> -> vector<8x1024xf32>
    %c16_i32_135 = arith.constant 16 : i32
    %170 = tpu.dynamic_rotate %161 by %c16_i32_135 dim 1 : vector<8x1024xf32>, i32 -> vector<8x1024xf32>
    %c1_136 = arith.constant 1 : index
    %c0_137 = arith.constant 0 : index
    %c0_138 = arith.constant 0 : index
    %171 = vector.load %arg1[%c1_136, %c0_137, %c0_138] : memref<9x1x1024xf32, #tpu.memory_space<vmem>>, vector<1x1x1024xf32>
    %172 = vector.shape_cast %171 : vector<1x1x1024xf32> to vector<1x1024xf32>
    %173 = vector.broadcast %172 : vector<1x1024xf32> to vector<8x1024xf32>
    %174 = arith.mulf %170, %173 : vector<8x1024xf32>
    %c1_139 = arith.constant 1 : index
    %c0_140 = arith.constant 0 : index
    %c0_141 = arith.constant 0 : index
    %175 = vector.load %arg7[%c1_139, %c0_140, %c0_141] : memref<9x8x8xf32, #tpu.memory_space<vmem>>, vector<1x8x8xf32>
    %176 = vector.shape_cast %175 : vector<1x8x8xf32> to vector<8x8xf32>
    %cst_142 = arith.constant dense<0.000000e+00> : vector<8x1024xf32>
    %177 = tpu.matmul %176, %174, %cst_142 {dimension_numbers = #tpu.dot_dimension_numbers<[1], [0], [0], [1], [0, 0, 1, 1], [], []>} : vector<8x8xf32>, vector<8x1024xf32>, vector<8x1024xf32> -> vector<8x1024xf32>
    %178 = arith.addf %169, %177 : vector<8x1024xf32>
    %c15_i32_143 = arith.constant 15 : i32
    %179 = tpu.dynamic_rotate %161 by %c15_i32_143 dim 1 : vector<8x1024xf32>, i32 -> vector<8x1024xf32>
    %c2_144 = arith.constant 2 : index
    %c0_145 = arith.constant 0 : index
    %c0_146 = arith.constant 0 : index
    %180 = vector.load %arg1[%c2_144, %c0_145, %c0_146] : memref<9x1x1024xf32, #tpu.memory_space<vmem>>, vector<1x1x1024xf32>
    %181 = vector.shape_cast %180 : vector<1x1x1024xf32> to vector<1x1024xf32>
    %182 = vector.broadcast %181 : vector<1x1024xf32> to vector<8x1024xf32>
    %183 = arith.mulf %179, %182 : vector<8x1024xf32>
    %c2_147 = arith.constant 2 : index
    %c0_148 = arith.constant 0 : index
    %c0_149 = arith.constant 0 : index
    %184 = vector.load %arg7[%c2_147, %c0_148, %c0_149] : memref<9x8x8xf32, #tpu.memory_space<vmem>>, vector<1x8x8xf32>
    %185 = vector.shape_cast %184 : vector<1x8x8xf32> to vector<8x8xf32>
    %cst_150 = arith.constant dense<0.000000e+00> : vector<8x1024xf32>
    %186 = tpu.matmul %185, %183, %cst_150 {dimension_numbers = #tpu.dot_dimension_numbers<[1], [0], [0], [1], [0, 0, 1, 1], [], []>} : vector<8x8xf32>, vector<8x1024xf32>, vector<8x1024xf32> -> vector<8x1024xf32>
    %187 = arith.addf %178, %186 : vector<8x1024xf32>
    %c1_i32_151 = arith.constant 1 : i32
    %188 = tpu.dynamic_rotate %161 by %c1_i32_151 dim 1 : vector<8x1024xf32>, i32 -> vector<8x1024xf32>
    %c3_152 = arith.constant 3 : index
    %c0_153 = arith.constant 0 : index
    %c0_154 = arith.constant 0 : index
    %189 = vector.load %arg1[%c3_152, %c0_153, %c0_154] : memref<9x1x1024xf32, #tpu.memory_space<vmem>>, vector<1x1x1024xf32>
    %190 = vector.shape_cast %189 : vector<1x1x1024xf32> to vector<1x1024xf32>
    %191 = vector.broadcast %190 : vector<1x1024xf32> to vector<8x1024xf32>
    %192 = arith.mulf %188, %191 : vector<8x1024xf32>
    %c3_155 = arith.constant 3 : index
    %c0_156 = arith.constant 0 : index
    %c0_157 = arith.constant 0 : index
    %193 = vector.load %arg7[%c3_155, %c0_156, %c0_157] : memref<9x8x8xf32, #tpu.memory_space<vmem>>, vector<1x8x8xf32>
    %194 = vector.shape_cast %193 : vector<1x8x8xf32> to vector<8x8xf32>
    %cst_158 = arith.constant dense<0.000000e+00> : vector<8x1024xf32>
    %195 = tpu.matmul %194, %192, %cst_158 {dimension_numbers = #tpu.dot_dimension_numbers<[1], [0], [0], [1], [0, 0, 1, 1], [], []>} : vector<8x8xf32>, vector<8x1024xf32>, vector<8x1024xf32> -> vector<8x1024xf32>
    %196 = arith.addf %187, %195 : vector<8x1024xf32>
    %c4_159 = arith.constant 4 : index
    %c0_160 = arith.constant 0 : index
    %c0_161 = arith.constant 0 : index
    %197 = vector.load %arg7[%c4_159, %c0_160, %c0_161] : memref<9x8x8xf32, #tpu.memory_space<vmem>>, vector<1x8x8xf32>
    %198 = vector.shape_cast %197 : vector<1x8x8xf32> to vector<8x8xf32>
    %cst_162 = arith.constant dense<0.000000e+00> : vector<8x1024xf32>
    %199 = tpu.matmul %198, %161, %cst_162 {dimension_numbers = #tpu.dot_dimension_numbers<[1], [0], [0], [1], [0, 0, 1, 1], [], []>} : vector<8x8xf32>, vector<8x1024xf32>, vector<8x1024xf32> -> vector<8x1024xf32>
    %200 = arith.addf %196, %199 : vector<8x1024xf32>
    %c1023_i32_163 = arith.constant 1023 : i32
    %201 = tpu.dynamic_rotate %161 by %c1023_i32_163 dim 1 : vector<8x1024xf32>, i32 -> vector<8x1024xf32>
    %c5_164 = arith.constant 5 : index
    %c0_165 = arith.constant 0 : index
    %c0_166 = arith.constant 0 : index
    %202 = vector.load %arg1[%c5_164, %c0_165, %c0_166] : memref<9x1x1024xf32, #tpu.memory_space<vmem>>, vector<1x1x1024xf32>
    %203 = vector.shape_cast %202 : vector<1x1x1024xf32> to vector<1x1024xf32>
    %204 = vector.broadcast %203 : vector<1x1024xf32> to vector<8x1024xf32>
    %205 = arith.mulf %201, %204 : vector<8x1024xf32>
    %c5_167 = arith.constant 5 : index
    %c0_168 = arith.constant 0 : index
    %c0_169 = arith.constant 0 : index
    %206 = vector.load %arg7[%c5_167, %c0_168, %c0_169] : memref<9x8x8xf32, #tpu.memory_space<vmem>>, vector<1x8x8xf32>
    %207 = vector.shape_cast %206 : vector<1x8x8xf32> to vector<8x8xf32>
    %cst_170 = arith.constant dense<0.000000e+00> : vector<8x1024xf32>
    %208 = tpu.matmul %207, %205, %cst_170 {dimension_numbers = #tpu.dot_dimension_numbers<[1], [0], [0], [1], [0, 0, 1, 1], [], []>} : vector<8x8xf32>, vector<8x1024xf32>, vector<8x1024xf32> -> vector<8x1024xf32>
    %209 = arith.addf %200, %208 : vector<8x1024xf32>
    %c1009_i32_171 = arith.constant 1009 : i32
    %210 = tpu.dynamic_rotate %161 by %c1009_i32_171 dim 1 : vector<8x1024xf32>, i32 -> vector<8x1024xf32>
    %c6_172 = arith.constant 6 : index
    %c0_173 = arith.constant 0 : index
    %c0_174 = arith.constant 0 : index
    %211 = vector.load %arg1[%c6_172, %c0_173, %c0_174] : memref<9x1x1024xf32, #tpu.memory_space<vmem>>, vector<1x1x1024xf32>
    %212 = vector.shape_cast %211 : vector<1x1x1024xf32> to vector<1x1024xf32>
    %213 = vector.broadcast %212 : vector<1x1024xf32> to vector<8x1024xf32>
    %214 = arith.mulf %210, %213 : vector<8x1024xf32>
    %c6_175 = arith.constant 6 : index
    %c0_176 = arith.constant 0 : index
    %c0_177 = arith.constant 0 : index
    %215 = vector.load %arg7[%c6_175, %c0_176, %c0_177] : memref<9x8x8xf32, #tpu.memory_space<vmem>>, vector<1x8x8xf32>
    %216 = vector.shape_cast %215 : vector<1x8x8xf32> to vector<8x8xf32>
    %cst_178 = arith.constant dense<0.000000e+00> : vector<8x1024xf32>
    %217 = tpu.matmul %216, %214, %cst_178 {dimension_numbers = #tpu.dot_dimension_numbers<[1], [0], [0], [1], [0, 0, 1, 1], [], []>} : vector<8x8xf32>, vector<8x1024xf32>, vector<8x1024xf32> -> vector<8x1024xf32>
    %218 = arith.addf %209, %217 : vector<8x1024xf32>
    %c1008_i32_179 = arith.constant 1008 : i32
    %219 = tpu.dynamic_rotate %161 by %c1008_i32_179 dim 1 : vector<8x1024xf32>, i32 -> vector<8x1024xf32>
    %c7_180 = arith.constant 7 : index
    %c0_181 = arith.constant 0 : index
    %c0_182 = arith.constant 0 : index
    %220 = vector.load %arg1[%c7_180, %c0_181, %c0_182] : memref<9x1x1024xf32, #tpu.memory_space<vmem>>, vector<1x1x1024xf32>
    %221 = vector.shape_cast %220 : vector<1x1x1024xf32> to vector<1x1024xf32>
    %222 = vector.broadcast %221 : vector<1x1024xf32> to vector<8x1024xf32>
    %223 = arith.mulf %219, %222 : vector<8x1024xf32>
    %c7_183 = arith.constant 7 : index
    %c0_184 = arith.constant 0 : index
    %c0_185 = arith.constant 0 : index
    %224 = vector.load %arg7[%c7_183, %c0_184, %c0_185] : memref<9x8x8xf32, #tpu.memory_space<vmem>>, vector<1x8x8xf32>
    %225 = vector.shape_cast %224 : vector<1x8x8xf32> to vector<8x8xf32>
    %cst_186 = arith.constant dense<0.000000e+00> : vector<8x1024xf32>
    %226 = tpu.matmul %225, %223, %cst_186 {dimension_numbers = #tpu.dot_dimension_numbers<[1], [0], [0], [1], [0, 0, 1, 1], [], []>} : vector<8x8xf32>, vector<8x1024xf32>, vector<8x1024xf32> -> vector<8x1024xf32>
    %227 = arith.addf %218, %226 : vector<8x1024xf32>
    %c1007_i32_187 = arith.constant 1007 : i32
    %228 = tpu.dynamic_rotate %161 by %c1007_i32_187 dim 1 : vector<8x1024xf32>, i32 -> vector<8x1024xf32>
    %c8_188 = arith.constant 8 : index
    %c0_189 = arith.constant 0 : index
    %c0_190 = arith.constant 0 : index
    %229 = vector.load %arg1[%c8_188, %c0_189, %c0_190] : memref<9x1x1024xf32, #tpu.memory_space<vmem>>, vector<1x1x1024xf32>
    %230 = vector.shape_cast %229 : vector<1x1x1024xf32> to vector<1x1024xf32>
    %231 = vector.broadcast %230 : vector<1x1024xf32> to vector<8x1024xf32>
    %232 = arith.mulf %228, %231 : vector<8x1024xf32>
    %c8_191 = arith.constant 8 : index
    %c0_192 = arith.constant 0 : index
    %c0_193 = arith.constant 0 : index
    %233 = vector.load %arg7[%c8_191, %c0_192, %c0_193] : memref<9x8x8xf32, #tpu.memory_space<vmem>>, vector<1x8x8xf32>
    %234 = vector.shape_cast %233 : vector<1x8x8xf32> to vector<8x8xf32>
    %cst_194 = arith.constant dense<0.000000e+00> : vector<8x1024xf32>
    %235 = tpu.matmul %234, %232, %cst_194 {dimension_numbers = #tpu.dot_dimension_numbers<[1], [0], [0], [1], [0, 0, 1, 1], [], []>} : vector<8x8xf32>, vector<8x1024xf32>, vector<8x1024xf32> -> vector<8x1024xf32>
    %236 = arith.addf %227, %235 : vector<8x1024xf32>
    %c0_195 = arith.constant 0 : index
    %c0_196 = arith.constant 0 : index
    %237 = vector.load %arg8[%c0_195, %c0_196] : memref<8x1xf32, #tpu.memory_space<vmem>>, vector<8x1xf32>
    %238 = vector.broadcast %237 : vector<8x1xf32> to vector<8x1024xf32>
    %239 = arith.addf %236, %238 : vector<8x1024xf32>
    %cst_197 = arith.constant 0.000000e+00 : f32
    %240 = vector.broadcast %cst_197 : f32 to vector<8x1024xf32>
    %241 = arith.maximumf %239, %240 : vector<8x1024xf32>
    %c17_i32_198 = arith.constant 17 : i32
    %242 = tpu.dynamic_rotate %241 by %c17_i32_198 dim 1 : vector<8x1024xf32>, i32 -> vector<8x1024xf32>
    %c0_199 = arith.constant 0 : index
    %c0_200 = arith.constant 0 : index
    %c0_201 = arith.constant 0 : index
    %243 = vector.load %arg1[%c0_199, %c0_200, %c0_201] : memref<9x1x1024xf32, #tpu.memory_space<vmem>>, vector<1x1x1024xf32>
    %244 = vector.shape_cast %243 : vector<1x1x1024xf32> to vector<1x1024xf32>
    %245 = vector.broadcast %244 : vector<1x1024xf32> to vector<8x1024xf32>
    %246 = arith.mulf %242, %245 : vector<8x1024xf32>
    %c0_202 = arith.constant 0 : index
    %c0_203 = arith.constant 0 : index
    %c0_204 = arith.constant 0 : index
    %247 = vector.load %arg9[%c0_202, %c0_203, %c0_204] : memref<9x3x8xf32, #tpu.memory_space<vmem>>, vector<1x3x8xf32>
    %248 = vector.shape_cast %247 : vector<1x3x8xf32> to vector<3x8xf32>
    %cst_205 = arith.constant dense<0.000000e+00> : vector<3x1024xf32>
    %249 = tpu.matmul %248, %246, %cst_205 {dimension_numbers = #tpu.dot_dimension_numbers<[1], [0], [0], [1], [0, 0, 1, 1], [], []>} : vector<3x8xf32>, vector<8x1024xf32>, vector<3x1024xf32> -> vector<3x1024xf32>
    %c16_i32_206 = arith.constant 16 : i32
    %250 = tpu.dynamic_rotate %241 by %c16_i32_206 dim 1 : vector<8x1024xf32>, i32 -> vector<8x1024xf32>
    %c1_207 = arith.constant 1 : index
    %c0_208 = arith.constant 0 : index
    %c0_209 = arith.constant 0 : index
    %251 = vector.load %arg1[%c1_207, %c0_208, %c0_209] : memref<9x1x1024xf32, #tpu.memory_space<vmem>>, vector<1x1x1024xf32>
    %252 = vector.shape_cast %251 : vector<1x1x1024xf32> to vector<1x1024xf32>
    %253 = vector.broadcast %252 : vector<1x1024xf32> to vector<8x1024xf32>
    %254 = arith.mulf %250, %253 : vector<8x1024xf32>
    %c1_210 = arith.constant 1 : index
    %c0_211 = arith.constant 0 : index
    %c0_212 = arith.constant 0 : index
    %255 = vector.load %arg9[%c1_210, %c0_211, %c0_212] : memref<9x3x8xf32, #tpu.memory_space<vmem>>, vector<1x3x8xf32>
    %256 = vector.shape_cast %255 : vector<1x3x8xf32> to vector<3x8xf32>
    %cst_213 = arith.constant dense<0.000000e+00> : vector<3x1024xf32>
    %257 = tpu.matmul %256, %254, %cst_213 {dimension_numbers = #tpu.dot_dimension_numbers<[1], [0], [0], [1], [0, 0, 1, 1], [], []>} : vector<3x8xf32>, vector<8x1024xf32>, vector<3x1024xf32> -> vector<3x1024xf32>
    %258 = arith.addf %249, %257 : vector<3x1024xf32>
    %c15_i32_214 = arith.constant 15 : i32
    %259 = tpu.dynamic_rotate %241 by %c15_i32_214 dim 1 : vector<8x1024xf32>, i32 -> vector<8x1024xf32>
    %c2_215 = arith.constant 2 : index
    %c0_216 = arith.constant 0 : index
    %c0_217 = arith.constant 0 : index
    %260 = vector.load %arg1[%c2_215, %c0_216, %c0_217] : memref<9x1x1024xf32, #tpu.memory_space<vmem>>, vector<1x1x1024xf32>
    %261 = vector.shape_cast %260 : vector<1x1x1024xf32> to vector<1x1024xf32>
    %262 = vector.broadcast %261 : vector<1x1024xf32> to vector<8x1024xf32>
    %263 = arith.mulf %259, %262 : vector<8x1024xf32>
    %c2_218 = arith.constant 2 : index
    %c0_219 = arith.constant 0 : index
    %c0_220 = arith.constant 0 : index
    %264 = vector.load %arg9[%c2_218, %c0_219, %c0_220] : memref<9x3x8xf32, #tpu.memory_space<vmem>>, vector<1x3x8xf32>
    %265 = vector.shape_cast %264 : vector<1x3x8xf32> to vector<3x8xf32>
    %cst_221 = arith.constant dense<0.000000e+00> : vector<3x1024xf32>
    %266 = tpu.matmul %265, %263, %cst_221 {dimension_numbers = #tpu.dot_dimension_numbers<[1], [0], [0], [1], [0, 0, 1, 1], [], []>} : vector<3x8xf32>, vector<8x1024xf32>, vector<3x1024xf32> -> vector<3x1024xf32>
    %267 = arith.addf %258, %266 : vector<3x1024xf32>
    %c1_i32_222 = arith.constant 1 : i32
    %268 = tpu.dynamic_rotate %241 by %c1_i32_222 dim 1 : vector<8x1024xf32>, i32 -> vector<8x1024xf32>
    %c3_223 = arith.constant 3 : index
    %c0_224 = arith.constant 0 : index
    %c0_225 = arith.constant 0 : index
    %269 = vector.load %arg1[%c3_223, %c0_224, %c0_225] : memref<9x1x1024xf32, #tpu.memory_space<vmem>>, vector<1x1x1024xf32>
    %270 = vector.shape_cast %269 : vector<1x1x1024xf32> to vector<1x1024xf32>
    %271 = vector.broadcast %270 : vector<1x1024xf32> to vector<8x1024xf32>
    %272 = arith.mulf %268, %271 : vector<8x1024xf32>
    %c3_226 = arith.constant 3 : index
    %c0_227 = arith.constant 0 : index
    %c0_228 = arith.constant 0 : index
    %273 = vector.load %arg9[%c3_226, %c0_227, %c0_228] : memref<9x3x8xf32, #tpu.memory_space<vmem>>, vector<1x3x8xf32>
    %274 = vector.shape_cast %273 : vector<1x3x8xf32> to vector<3x8xf32>
    %cst_229 = arith.constant dense<0.000000e+00> : vector<3x1024xf32>
    %275 = tpu.matmul %274, %272, %cst_229 {dimension_numbers = #tpu.dot_dimension_numbers<[1], [0], [0], [1], [0, 0, 1, 1], [], []>} : vector<3x8xf32>, vector<8x1024xf32>, vector<3x1024xf32> -> vector<3x1024xf32>
    %276 = arith.addf %267, %275 : vector<3x1024xf32>
    %c4_230 = arith.constant 4 : index
    %c0_231 = arith.constant 0 : index
    %c0_232 = arith.constant 0 : index
    %277 = vector.load %arg9[%c4_230, %c0_231, %c0_232] : memref<9x3x8xf32, #tpu.memory_space<vmem>>, vector<1x3x8xf32>
    %278 = vector.shape_cast %277 : vector<1x3x8xf32> to vector<3x8xf32>
    %cst_233 = arith.constant dense<0.000000e+00> : vector<3x1024xf32>
    %279 = tpu.matmul %278, %241, %cst_233 {dimension_numbers = #tpu.dot_dimension_numbers<[1], [0], [0], [1], [0, 0, 1, 1], [], []>} : vector<3x8xf32>, vector<8x1024xf32>, vector<3x1024xf32> -> vector<3x1024xf32>
    %280 = arith.addf %276, %279 : vector<3x1024xf32>
    %c1023_i32_234 = arith.constant 1023 : i32
    %281 = tpu.dynamic_rotate %241 by %c1023_i32_234 dim 1 : vector<8x1024xf32>, i32 -> vector<8x1024xf32>
    %c5_235 = arith.constant 5 : index
    %c0_236 = arith.constant 0 : index
    %c0_237 = arith.constant 0 : index
    %282 = vector.load %arg1[%c5_235, %c0_236, %c0_237] : memref<9x1x1024xf32, #tpu.memory_space<vmem>>, vector<1x1x1024xf32>
    %283 = vector.shape_cast %282 : vector<1x1x1024xf32> to vector<1x1024xf32>
    %284 = vector.broadcast %283 : vector<1x1024xf32> to vector<8x1024xf32>
    %285 = arith.mulf %281, %284 : vector<8x1024xf32>
    %c5_238 = arith.constant 5 : index
    %c0_239 = arith.constant 0 : index
    %c0_240 = arith.constant 0 : index
    %286 = vector.load %arg9[%c5_238, %c0_239, %c0_240] : memref<9x3x8xf32, #tpu.memory_space<vmem>>, vector<1x3x8xf32>
    %287 = vector.shape_cast %286 : vector<1x3x8xf32> to vector<3x8xf32>
    %cst_241 = arith.constant dense<0.000000e+00> : vector<3x1024xf32>
    %288 = tpu.matmul %287, %285, %cst_241 {dimension_numbers = #tpu.dot_dimension_numbers<[1], [0], [0], [1], [0, 0, 1, 1], [], []>} : vector<3x8xf32>, vector<8x1024xf32>, vector<3x1024xf32> -> vector<3x1024xf32>
    %289 = arith.addf %280, %288 : vector<3x1024xf32>
    %c1009_i32_242 = arith.constant 1009 : i32
    %290 = tpu.dynamic_rotate %241 by %c1009_i32_242 dim 1 : vector<8x1024xf32>, i32 -> vector<8x1024xf32>
    %c6_243 = arith.constant 6 : index
    %c0_244 = arith.constant 0 : index
    %c0_245 = arith.constant 0 : index
    %291 = vector.load %arg1[%c6_243, %c0_244, %c0_245] : memref<9x1x1024xf32, #tpu.memory_space<vmem>>, vector<1x1x1024xf32>
    %292 = vector.shape_cast %291 : vector<1x1x1024xf32> to vector<1x1024xf32>
    %293 = vector.broadcast %292 : vector<1x1024xf32> to vector<8x1024xf32>
    %294 = arith.mulf %290, %293 : vector<8x1024xf32>
    %c6_246 = arith.constant 6 : index
    %c0_247 = arith.constant 0 : index
    %c0_248 = arith.constant 0 : index
    %295 = vector.load %arg9[%c6_246, %c0_247, %c0_248] : memref<9x3x8xf32, #tpu.memory_space<vmem>>, vector<1x3x8xf32>
    %296 = vector.shape_cast %295 : vector<1x3x8xf32> to vector<3x8xf32>
    %cst_249 = arith.constant dense<0.000000e+00> : vector<3x1024xf32>
    %297 = tpu.matmul %296, %294, %cst_249 {dimension_numbers = #tpu.dot_dimension_numbers<[1], [0], [0], [1], [0, 0, 1, 1], [], []>} : vector<3x8xf32>, vector<8x1024xf32>, vector<3x1024xf32> -> vector<3x1024xf32>
    %298 = arith.addf %289, %297 : vector<3x1024xf32>
    %c1008_i32_250 = arith.constant 1008 : i32
    %299 = tpu.dynamic_rotate %241 by %c1008_i32_250 dim 1 : vector<8x1024xf32>, i32 -> vector<8x1024xf32>
    %c7_251 = arith.constant 7 : index
    %c0_252 = arith.constant 0 : index
    %c0_253 = arith.constant 0 : index
    %300 = vector.load %arg1[%c7_251, %c0_252, %c0_253] : memref<9x1x1024xf32, #tpu.memory_space<vmem>>, vector<1x1x1024xf32>
    %301 = vector.shape_cast %300 : vector<1x1x1024xf32> to vector<1x1024xf32>
    %302 = vector.broadcast %301 : vector<1x1024xf32> to vector<8x1024xf32>
    %303 = arith.mulf %299, %302 : vector<8x1024xf32>
    %c7_254 = arith.constant 7 : index
    %c0_255 = arith.constant 0 : index
    %c0_256 = arith.constant 0 : index
    %304 = vector.load %arg9[%c7_254, %c0_255, %c0_256] : memref<9x3x8xf32, #tpu.memory_space<vmem>>, vector<1x3x8xf32>
    %305 = vector.shape_cast %304 : vector<1x3x8xf32> to vector<3x8xf32>
    %cst_257 = arith.constant dense<0.000000e+00> : vector<3x1024xf32>
    %306 = tpu.matmul %305, %303, %cst_257 {dimension_numbers = #tpu.dot_dimension_numbers<[1], [0], [0], [1], [0, 0, 1, 1], [], []>} : vector<3x8xf32>, vector<8x1024xf32>, vector<3x1024xf32> -> vector<3x1024xf32>
    %307 = arith.addf %298, %306 : vector<3x1024xf32>
    %c1007_i32_258 = arith.constant 1007 : i32
    %308 = tpu.dynamic_rotate %241 by %c1007_i32_258 dim 1 : vector<8x1024xf32>, i32 -> vector<8x1024xf32>
    %c8_259 = arith.constant 8 : index
    %c0_260 = arith.constant 0 : index
    %c0_261 = arith.constant 0 : index
    %309 = vector.load %arg1[%c8_259, %c0_260, %c0_261] : memref<9x1x1024xf32, #tpu.memory_space<vmem>>, vector<1x1x1024xf32>
    %310 = vector.shape_cast %309 : vector<1x1x1024xf32> to vector<1x1024xf32>
    %311 = vector.broadcast %310 : vector<1x1024xf32> to vector<8x1024xf32>
    %312 = arith.mulf %308, %311 : vector<8x1024xf32>
    %c8_262 = arith.constant 8 : index
    %c0_263 = arith.constant 0 : index
    %c0_264 = arith.constant 0 : index
    %313 = vector.load %arg9[%c8_262, %c0_263, %c0_264] : memref<9x3x8xf32, #tpu.memory_space<vmem>>, vector<1x3x8xf32>
    %314 = vector.shape_cast %313 : vector<1x3x8xf32> to vector<3x8xf32>
    %cst_265 = arith.constant dense<0.000000e+00> : vector<3x1024xf32>
    %315 = tpu.matmul %314, %312, %cst_265 {dimension_numbers = #tpu.dot_dimension_numbers<[1], [0], [0], [1], [0, 0, 1, 1], [], []>} : vector<3x8xf32>, vector<8x1024xf32>, vector<3x1024xf32> -> vector<3x1024xf32>
    %316 = arith.addf %307, %315 : vector<3x1024xf32>
    %c0_266 = arith.constant 0 : index
    %c0_267 = arith.constant 0 : index
    %317 = vector.load %arg10[%c0_266, %c0_267] : memref<3x1xf32, #tpu.memory_space<vmem>>, vector<3x1xf32>
    %318 = vector.broadcast %317 : vector<3x1xf32> to vector<3x1024xf32>
    %319 = arith.addf %316, %318 : vector<3x1024xf32>
    %c0_268 = arith.constant 0 : index
    %c0_269 = arith.constant 0 : index
    %c0_270 = arith.constant 0 : index
    %320 = vector.load %arg11[%c0_268, %c0_269, %c0_270] : memref<1x3x1024xf32, #tpu.memory_space<vmem>>, vector<1x3x1024xf32>
    %321 = vector.shape_cast %320 : vector<1x3x1024xf32> to vector<3x1024xf32>
    %322 = vector.shape_cast %319 : vector<3x1024xf32> to vector<1x3x1024xf32>
    tpu.vector_store %arg11[%c0_268, %c0_269, %c0_270], %322 {strides = array<i32>} : memref<1x3x1024xf32, #tpu.memory_space<vmem>>, vector<1x3x1024xf32>,
    return
  }
  func.func @transform_0(%arg0: i32) -> (i32, i32, i32) {
    %c0_i32 = arith.constant 0 : i32
    %c0_i32_0 = arith.constant 0 : i32
    %c0_i32_1 = arith.constant 0 : i32
    %c0_i32_2 = arith.constant 0 : i32
    return %c0_i32, %c0_i32_0, %c0_i32_1 : i32, i32, i32
  }
  func.func @transform_1(%arg0: i32) -> (i32, i32, i32) {
    %c0_i32 = arith.constant 0 : i32
    %c0_i32_0 = arith.constant 0 : i32
    %c0_i32_1 = arith.constant 0 : i32
    return %arg0, %c0_i32, %c0_i32_0 : i32, i32, i32
  }
  func.func @transform_2(%arg0: i32) -> (i32, i32, i32) {
    %c0_i32 = arith.constant 0 : i32
    %c0_i32_0 = arith.constant 0 : i32
    %c0_i32_1 = arith.constant 0 : i32
    %c0_i32_2 = arith.constant 0 : i32
    return %c0_i32, %c0_i32_0, %c0_i32_1 : i32, i32, i32
  }
  func.func @transform_3(%arg0: i32) -> (i32, i32) {
    %c0_i32 = arith.constant 0 : i32
    %c0_i32_0 = arith.constant 0 : i32
    %c0_i32_1 = arith.constant 0 : i32
    return %c0_i32, %c0_i32_0 : i32, i32
  }
  func.func @transform_4(%arg0: i32) -> (i32, i32, i32) {
    %c0_i32 = arith.constant 0 : i32
    %c0_i32_0 = arith.constant 0 : i32
    %c0_i32_1 = arith.constant 0 : i32
    %c0_i32_2 = arith.constant 0 : i32
    return %c0_i32, %c0_i32_0, %c0_i32_1 : i32, i32, i32
  }
  func.func @transform_5(%arg0: i32) -> (i32, i32) {
    %c0_i32 = arith.constant 0 : i32
    %c0_i32_0 = arith.constant 0 : i32
    %c0_i32_1 = arith.constant 0 : i32
    return %c0_i32, %c0_i32_0 : i32, i32
  }
  func.func @transform_6(%arg0: i32) -> (i32, i32, i32) {
    %c0_i32 = arith.constant 0 : i32
    %c0_i32_0 = arith.constant 0 : i32
    %c0_i32_1 = arith.constant 0 : i32
    %c0_i32_2 = arith.constant 0 : i32
    return %c0_i32, %c0_i32_0, %c0_i32_1 : i32, i32, i32
  }
  func.func @transform_7(%arg0: i32) -> (i32, i32) {
    %c0_i32 = arith.constant 0 : i32
    %c0_i32_0 = arith.constant 0 : i32
    %c0_i32_1 = arith.constant 0 : i32
    return %c0_i32, %c0_i32_0 : i32, i32
  }
  func.func @transform_8(%arg0: i32) -> (i32, i32, i32) {
    %c0_i32 = arith.constant 0 : i32
    %c0_i32_0 = arith.constant 0 : i32
    %c0_i32_1 = arith.constant 0 : i32
    %c0_i32_2 = arith.constant 0 : i32
    return %c0_i32, %c0_i32_0, %c0_i32_1 : i32, i32, i32
  }
  func.func @transform_9(%arg0: i32) -> (i32, i32) {
    %c0_i32 = arith.constant 0 : i32
    %c0_i32_0 = arith.constant 0 : i32
    %c0_i32_1 = arith.constant 0 : i32
    return %c0_i32, %c0_i32_0 : i32, i32
  }
  func.func @transform_10(%arg0: i32) -> (i32, i32, i32) {
    %c0_i32 = arith.constant 0 : i32
    %c0_i32_0 = arith.constant 0 : i32
    %c0_i32_1 = arith.constant 0 : i32
    return %arg0, %c0_i32, %c0_i32_0 : i32, i32, i32
  }
}

</mosaic_0001>

<bundles_post_ra>
// kernel: tiny_cnn_forward.1
= control target key start
LH: loop header
LB: loop body
LE: loop exit
PB: predicated region body
PF: predicated region fallthrough
CT: control target
= control target key end

     0   :  { %s8787_s13 = smov 0   ;;  %s11526_s0 = inlined_call_operand.vmem [shape: f32[9,1,1024], index: 0, kind: input, shape index: {}]   ;;  %s11527_s1 = inlined_call_operand.vmem [shape: f32[2,3,1024], index: 1, kind: input, shape index: {}]   ;;  %s11528_s2 = inlined_call_operand.vmem [shape: f32[9,8,3], index: 2, kind: input, shape index: {}]   ;;  %s11529_s3 = inlined_call_operand.vmem [shape: f32[8,1], index: 3, kind: input, shape index: {}]   ;;  %s11530_s4 = inlined_call_operand.vmem [shape: f32[9,8,8], index: 4, kind: input, shape index: {}]   ;;  %s11531_s5 = inlined_call_operand.vmem [shape: f32[8,1], index: 5, kind: input, shape index: {}]   ;;  %s11532_s6 = inlined_call_operand.vmem [shape: f32[9,8,8], index: 6, kind: input, shape index: {}]   ;;  %s11533_s7 = inlined_call_operand.vmem [shape: f32[8,1], index: 7, kind: input, shape index: {}]   ;;  %s11534_s8 = inlined_call_operand.vmem [shape: f32[9,3,8], index: 8, kind: input, shape index: {}]   ;;  %s11535_s9 = inlined_call_operand.vmem [shape: f32[3,1], index: 9, kind: input, shape index: {}]   ;;  %s11536_s10 = inlined_call_operand.vmem [shape: f32[2,3,1024], index: 10, kind: output, shape index: {}]  }
   0x1 LB: > { %s8283_s14 = sadd.s32 4294967295, %s8721_s13   ;;  %p8287_p0 = scmp.ge.s32.totalorder %s8721_s13, 1  ;;  %s8721_s13 = sphi %s8787_s13, %s20_s13  }
   0x2   : > { %p312_p1 = scmp.lt.s32.totalorder %s8721_s13, 3 }
   0x4   : > { %p313_p2 = pnand %p8287_p0, %p312_p1 }
   0x6   : > { %316 = sbr.rel (%p313_p2) target bundleno = 1692 (0x69c), region = 60 }
   0xb   : > { %p350_p3 = scmp.lt.s32.totalorder %s8283_s14, 1  ;;  %s8723_s19 = smov 17   ;;  %vm526_vm1 = vcmask 1042432   ;;  %vm522_vm3 = vcmask 23552   ;;  %vm2823_vm10 = vcmask 64512   ;;  %vm8215_vm11 = vcmask 1043456  }
   0xc   : > { %s8724_s20 = smov 16   ;;  %s8725_s21 = smov 15  }
   0xd   : > { %s11986_s14 = smov (!%p350_p3, %s8283_s14), 1  ;;  %s8726_s22 = smov 1  }
   0xe   : > { %s8693_s15 = sshll.u32 %s11986_s14, 5  ;;  %s8727_s23 = smov 127  }
   0xf   : > { %s354_s18 = scalar_lea.vmem %s11527_s1, %s8693_s15  ;;  %s8728_s24 = smov 113  }
  0x10   : > { %v8803_v0 = vld [vmem:[%s354_s18 + $0x8] sm:$0x77]  ;;  %v8805_v1 = vld [vmem:[%s354_s18] sm:$0x77]  ;;  %v8807_v2 = vld [vmem:[%s354_s18 + $0x10] sm:$0x77] }
  0x11   : > { %370 = vst [vmem:[#allocation1 + $0x10] ss:$2 sm:$0xff] %v8803_v0  ;;  %v8810_v3 = vld [vmem:[%s354_s18 + $0x18] sm:$0x77]  ;;  %s8729_s27 = smov 112   ;;  %s8730_s12 = smov 111  }
  0x12   : > { %368 = vst [vmem:[#allocation1] ss:$2 sm:$0xff] %v8805_v1 }
  0x13   : > { %372 = vst [vmem:[#allocation1 + $0x20] ss:$2 sm:$0xff] %v8807_v2 }
  0x14   : > { %374 = vst [vmem:[#allocation1 + $0x30] ss:$2 sm:$0xff] %v8810_v3 }
  0x18   : > { %v377_v4 = vld.sshfl [vmem:[#allocation1 + $0x10] sm:$0xff pattern:$0x75316420]  ;;  %v378_v5 = vld.sshfl [vmem:[#allocation1 + $0x18] sm:$0xff pattern:$0x75316420] }
  0x19   : > { %447 = vst [vmem:[#allocation1 + $0x10] ss:$2 sm:$0xff] %v8803_v0  ;;  %v375_v6 = vld.sshfl [vmem:[#allocation1] sm:$0xff pattern:$0x75316420] }
  0x1a   : > { %v376_v7 = vld.sshfl [vmem:[#allocation1 + $0x8] sm:$0xff pattern:$0x75316420]  ;;  %v379_v8 = vld.sshfl [vmem:[#allocation1 + $0x20] sm:$0xff pattern:$0x75316420] }
  0x1b   : > { %445 = vst [vmem:[#allocation1] ss:$2 sm:$0xff] %v8805_v1  ;;  %393 = vrot.lane.b32.xlu2 %v376_v7, %s8723_s19  ;;  %v380_v9 = vld.sshfl [vmem:[#allocation1 + $0x28] sm:$0xff pattern:$0x75316420] }
  0x1c   : > { %449 = vst [vmem:[#allocation1 + $0x20] ss:$2 sm:$0xff] %v8807_v2  ;;  %v381_v10 = vld.sshfl [vmem:[#allocation1 + $0x30] sm:$0xff pattern:$0x75316420] }
  0x1d   : > { %v382_v11 = vld.sshfl [vmem:[#allocation1 + $0x38] sm:$0xff pattern:$0x75316420] }
  0x1e   : > { %451 = vst [vmem:[#allocation1 + $0x30] ss:$2 sm:$0xff] %v8810_v3 }
  0x20   : > { %v455_v12 = vld.sshfl [vmem:[#allocation1 + $0x18] sm:$0xff pattern:$0x75316420]  ;;  %v454_v13 = vld.sshfl [vmem:[#allocation1 + $0x10] sm:$0xff pattern:$0x75316420] }
  0x21   : > { %474 = vrot.lane.b32.xlu1 %v455_v12, %s8724_s20  ;;  %900 = vst [vmem:[#allocation1 + $0x10] ss:$2 sm:$0xff] %v8803_v0 }
  0x22   : > { %v453_v14 = vld.sshfl [vmem:[#allocation1 + $0x8] sm:$0xff pattern:$0x75316420]  ;;  %v452_v15 = vld.sshfl [vmem:[#allocation1] sm:$0xff pattern:$0x75316420] }
  0x23   : > { %470 = vrot.lane.b32.xlu0 %v453_v14, %s8724_s20  ;;  %898 = vst [vmem:[#allocation1] ss:$2 sm:$0xff] %v8805_v1  ;;  %v457_v16 = vld.sshfl [vmem:[#allocation1 + $0x28] sm:$0xff pattern:$0x75316420] }
  0x24   : > { %478 = vrot.lane.b32.xlu2 %v457_v16, %s8724_s20  ;;  %v456_v17 = vld.sshfl [vmem:[#allocation1 + $0x20] sm:$0xff pattern:$0x75316420] }
  0x25   : > { %902 = vst [vmem:[#allocation1 + $0x20] ss:$2 sm:$0xff] %v8807_v2  ;;  %v459_v18 = vld.sshfl [vmem:[#allocation1 + $0x38] sm:$0xff pattern:$0x75316420] }
  0x26   : > { %v458_v19 = vld.sshfl [vmem:[#allocation1 + $0x30] sm:$0xff pattern:$0x75316420] }
  0x27   : > { %904 = vst [vmem:[#allocation1 + $0x30] ss:$2 sm:$0xff] %v8810_v3 }
  0x28   : > { %v908_v21 = vld.sshfl [vmem:[#allocation1 + $0x18] sm:$0xff pattern:$0x75316420]  ;;  %v907_v23 = vld.sshfl [vmem:[#allocation1 + $0x10] sm:$0xff pattern:$0x75316420] }
  0x29   : > { %468 = vrot.lane.b32.xlu1 %v452_v15, %s8724_s20  ;;  %1172 = vst [vmem:[#allocation1 + $0x10] ss:$2 sm:$0xff] %v8803_v0 }
  0x2a   : > { %v906_v20 = vld.sshfl [vmem:[#allocation1 + $0x8] sm:$0xff pattern:$0x75316420]  ;;  %v905_v22 = vld.sshfl [vmem:[#allocation1] sm:$0xff pattern:$0x75316420] }
  0x2b   : > { %472 = vrot.lane.b32.xlu0 %v454_v13, %s8724_s20  ;;  %1170 = vst [vmem:[#allocation1] ss:$2 sm:$0xff] %v8805_v1 }
  0x2c   : > { %480 = vrot.lane.b32.xlu2 %v458_v19, %s8724_s20  ;;  %v910_v26 = vld.sshfl [vmem:[#allocation1 + $0x28] sm:$0xff pattern:$0x75316420]  ;;  %v909_v27 = vld.sshfl [vmem:[#allocation1 + $0x20] sm:$0xff pattern:$0x75316420] }
  0x2d   : > { %1174 = vst [vmem:[#allocation1 + $0x20] ss:$2 sm:$0xff] %v8807_v2 }
  0x2e   : > { %v911_v24 = vld.sshfl [vmem:[#allocation1 + $0x30] sm:$0xff pattern:$0x75316420]  ;;  %v912_v25 = vld.sshfl [vmem:[#allocation1 + $0x38] sm:$0xff pattern:$0x75316420] }
  0x2f   : > { %1176 = vst [vmem:[#allocation1 + $0x30] ss:$2 sm:$0xff] %v8810_v3 }
  0x30   : > { %v1179_v28 = vld.sshfl [vmem:[#allocation1 + $0x10] sm:$0xff pattern:$0x75316420]  ;;  %v1180_v32 = vld.sshfl [vmem:[#allocation1 + $0x18] sm:$0xff pattern:$0x75316420] }
  0x31   : > { %476 = vrot.lane.b32.xlu1 %v456_v17, %s8724_s20  ;;  %1446 = vst [vmem:[#allocation1 + $0x10] ss:$2 sm:$0xff] %v8803_v0 }
  0x32   : > { %v1178_v29 = vld.sshfl [vmem:[#allocation1 + $0x8] sm:$0xff pattern:$0x75316420]  ;;  %v1177_v30 = vld.sshfl [vmem:[#allocation1] sm:$0xff pattern:$0x75316420] }
  0x33   : > { %482 = vrot.lane.b32.xlu0 %v459_v18, %s8724_s20  ;;  %1444 = vst [vmem:[#allocation1] ss:$2 sm:$0xff] %v8805_v1 }
  0x34   : > { %391 = vrot.lane.b32.xlu2 %v375_v6, %s8723_s19  ;;  %v1182_v31 = vld.sshfl [vmem:[#allocation1 + $0x28] sm:$0xff pattern:$0x75316420]  ;;  %v1181_v33 = vld.sshfl [vmem:[#allocation1 + $0x20] sm:$0xff pattern:$0x75316420] }
  0x35   : > { %1448 = vst [vmem:[#allocation1 + $0x20] ss:$2 sm:$0xff] %v8807_v2 }
  0x36   : > { %v1184_v36 = vld.sshfl [vmem:[#allocation1 + $0x38] sm:$0xff pattern:$0x75316420]  ;;  %v1183_v41 = vld.sshfl [vmem:[#allocation1 + $0x30] sm:$0xff pattern:$0x75316420] }
  0x37   : > { %1450 = vst [vmem:[#allocation1 + $0x30] ss:$2 sm:$0xff] %v8810_v3 }
  0x38   : > { %v8856_v37 = vld.sshfl [vmem:[#allocation1 + $0x10] sm:$0xff pattern:$0x75316420]  ;;  %v8858_v38 = vld.sshfl [vmem:[#allocation1 + $0x18] sm:$0xff pattern:$0x75316420] }
  0x39   : > { %397 = vrot.lane.b32.xlu1 %v378_v5, %s8723_s19  ;;  %1648 = vst [vmem:[#allocation1 + $0x10] ss:$2 sm:$0xff] %v8803_v0 }
  0x3a   : > { %v8850_v34 = vld.sshfl [vmem:[#allocation1] sm:$0xff pattern:$0x75316420]  ;;  %v8852_v35 = vld.sshfl [vmem:[#allocation1 + $0x8] sm:$0xff pattern:$0x75316420] }
  0x3b   : > { %395 = vrot.lane.b32.xlu0 %v377_v4, %s8723_s19  ;;  %1646 = vst [vmem:[#allocation1] ss:$2 sm:$0xff] %v8805_v1 }
  0x3c   : > { %405 = vrot.lane.b32.xlu2 %v382_v11, %s8723_s19  ;;  %v8862_v39 = vld.sshfl [vmem:[#allocation1 + $0x20] sm:$0xff pattern:$0x75316420]  ;;  %v8864_v40 = vld.sshfl [vmem:[#allocation1 + $0x28] sm:$0xff pattern:$0x75316420] }
  0x3d   : > { %1650 = vst [vmem:[#allocation1 + $0x20] ss:$2 sm:$0xff] %v8807_v2 }
  0x3e   : > { %v8872_v44 = vld.sshfl [vmem:[#allocation1 + $0x30] sm:$0xff pattern:$0x75316420]  ;;  %v8874_v45 = vld.sshfl [vmem:[#allocation1 + $0x38] sm:$0xff pattern:$0x75316420] }
  0x3f   : > { %1652 = vst [vmem:[#allocation1 + $0x30] ss:$2 sm:$0xff] %v8810_v3 }
  0x40   : > { %v1656_v42 = vld.sshfl [vmem:[#allocation1 + $0x18] sm:$0xff pattern:$0x75316420]  ;;  %v1655_v43 = vld.sshfl [vmem:[#allocation1 + $0x10] sm:$0xff pattern:$0x75316420] }
  0x41   : > { %403 = vrot.lane.b32.xlu1 %v381_v10, %s8723_s19  ;;  %1920 = vst [vmem:[#allocation1 + $0x10] ss:$2 sm:$0xff] %v8803_v0 }
  0x42   : > { %v1653_v47 = vld.sshfl [vmem:[#allocation1] sm:$0xff pattern:$0x75316420]  ;;  %v1654_v48 = vld.sshfl [vmem:[#allocation1 + $0x8] sm:$0xff pattern:$0x75316420] }
  0x43   : > { %401 = vrot.lane.b32.xlu0 %v380_v9, %s8723_s19  ;;  %1918 = vst [vmem:[#allocation1] ss:$2 sm:$0xff] %v8805_v1 }
  0x44   : > { %925 = vrot.lane.b32.xlu2 %v907_v23, %s8725_s21  ;;  %v1657_v46 = vld.sshfl [vmem:[#allocation1 + $0x20] sm:$0xff pattern:$0x75316420]  ;;  %v1658_v49 = vld.sshfl [vmem:[#allocation1 + $0x28] sm:$0xff pattern:$0x75316420] }
  0x45   : > { %1922 = vst [vmem:[#allocation1 + $0x20] ss:$2 sm:$0xff] %v8807_v2 }
  0x46   : > { %v1659_v50 = vld.sshfl [vmem:[#allocation1 + $0x30] sm:$0xff pattern:$0x75316420]  ;;  %v1660_v51 = vld.sshfl [vmem:[#allocation1 + $0x38] sm:$0xff pattern:$0x75316420] }
  0x47   : > { %1924 = vst [vmem:[#allocation1 + $0x30] ss:$2 sm:$0xff] %v8810_v3 }
  0x48   : > { %v1927_v53 = vld.sshfl [vmem:[#allocation1 + $0x10] sm:$0xff pattern:$0x75316420]  ;;  %v1928_v54 = vld.sshfl [vmem:[#allocation1 + $0x18] sm:$0xff pattern:$0x75316420] }
  0x49   : > { %923 = vrot.lane.b32.xlu1 %v906_v20, %s8725_s21  ;;  %2192 = vst [vmem:[#allocation1 + $0x10] ss:$2 sm:$0xff] %v8803_v0 }
  0x4a   : > { %v1926_v58 = vld.sshfl [vmem:[#allocation1 + $0x8] sm:$0xff pattern:$0x75316420]  ;;  %v1925_v61 = vld.sshfl [vmem:[#allocation1] sm:$0xff pattern:$0x75316420] }
  0x4b   : > { %399 = vrot.lane.b32.xlu0 %v379_v8, %s8723_s19  ;;  %2190 = vst [vmem:[#allocation1] ss:$2 sm:$0xff] %v8805_v1  ;;  %v407_v8 = vlaneseq }
  0x4c   : > { %931 = vrot.lane.b32.xlu2 %v910_v26, %s8725_s21  ;;  %v1929_v63 = vld.sshfl [vmem:[#allocation1 + $0x20] sm:$0xff pattern:$0x75316420]  ;;  %v1930_v4 = vld.sshfl [vmem:[#allocation1 + $0x28] sm:$0xff pattern:$0x75316420] }
  0x4d   : > { %2194 = vst [vmem:[#allocation1 + $0x20] ss:$2 sm:$0xff] %v8807_v2  ;;  %v8931_v13 = vand.u32 127, %v407_v8 }
  0x4e   : > { %v1931_v55 = vld.sshfl [vmem:[#allocation1 + $0x30] sm:$0xff pattern:$0x75316420]  ;;  %v1932_v56 = vld.sshfl [vmem:[#allocation1 + $0x38] sm:$0xff pattern:$0x75316420] }
  0x4f   : > { %2196 = vst [vmem:[#allocation1 + $0x30] ss:$2 sm:$0xff] %v8810_v3  ;;  %vm484_vm0 = vcmp.lt.s32.totalorder %v8931_v13, 16  ;;  %vm409_vm2 = vcmp.lt.s32.totalorder %v8931_v13, 17  ;;  %vm937_vm4 = vcmp.lt.s32.totalorder %v8931_v13, 15  ;;  %vm1209_vm5 = vcmp.lt.s32.totalorder %v8931_v13, 1 }
  0x50   : > { %v8899_v59 = vld.sshfl [vmem:[#allocation1 + $0x10] sm:$0xff pattern:$0x75316420]  ;;  %v8901_v60 = vld.sshfl [vmem:[#allocation1 + $0x18] sm:$0xff pattern:$0x75316420] }
  0x51   : > { %921 = vrot.lane.b32.xlu1 %v905_v22, %s8725_s21  ;;  %2464 = vst [vmem:[#allocation1 + $0x10] ss:$2 sm:$0xff] %v8803_v0  ;;  %vm1685_vm6 = vcmp.lt.s32.totalorder %v8931_v13, 127  ;;  %vm1957_vm7 = vcmp.lt.s32.totalorder %v8931_v13, 113  ;;  %vm2229_vm8 = vcmp.lt.s32.totalorder %v8931_v13, 112  ;;  %vm2501_vm9 = vcmp.lt.s32.totalorder %v8931_v13, 111 }
  0x52   : > { %v8913_v5 = vld.sshfl [vmem:[#allocation1 + $0x8] sm:$0xff pattern:$0x75316420]  ;;  %v8915_v0 = vld.sshfl [vmem:[#allocation1] sm:$0xff pattern:$0x75316420] }
  0x53   : > { %927 = vrot.lane.b32.xlu0 %v908_v21, %s8725_s21  ;;  %2462 = vst [vmem:[#allocation1] ss:$2 sm:$0xff] %v8805_v1  ;;  %v8292_v1 = vld [vmem:[%s11526_s0 + $0x8] sm:$0xff] }
  0x54   : > { %929 = vrot.lane.b32.xlu2 %v909_v27, %s8725_s21  ;;  %v8921_v7 = vld.sshfl [vmem:[#allocation1 + $0x28] sm:$0xff pattern:$0x75316420]  ;;  %v2201_v10 = vld.sshfl [vmem:[#allocation1 + $0x20] sm:$0xff pattern:$0x75316420] }
  0x55   : > { %2466 = vst [vmem:[#allocation1 + $0x20] ss:$2 sm:$0xff] %v8807_v2  ;;  %v8935_v14 = vperm.slane %v8292_v1, 1  ;;  %v8938_v2 = vperm.slane %v8292_v1, 2  ;;  %v8940_v17 = vperm.slane %v8292_v1, 3  ;;  %v8942_v18 = vperm.slane %v8292_v1, 6 }
  0x56   : > { %11669 = vst [vmem:[#allocation2_spill] sm:$0xff] %v8931_v13  ;;  %v2203_v15 = vld.sshfl [vmem:[#allocation1 + $0x30] sm:$0xff pattern:$0x75316420] }
  0x57   : > { %11670 = vst [vmem:[#allocation3_spill] sm:$0xff] %v8935_v14  ;;  %v8944_v19 = vld.sshfl [vmem:[#allocation1 + $0x38] sm:$0xff pattern:$0x75316420] }
  0x58   : > { %11671 = vst [vmem:[#allocation4_spill] sm:$0xff] %v8938_v2 }
  0x59   : > { %935 = vrot.lane.b32.xlu1 %v912_v25, %s8725_s21  ;;  %11672 = vst [vmem:[#allocation5_spill] sm:$0xff] %v8940_v17 }
  0x5a   : > { %11673 = vst [vmem:[#allocation6_spill] sm:$0xff] %v8942_v18 }
  0x5b   : > { %933 = vrot.lane.b32.xlu0 %v911_v24, %s8725_s21  ;;  %2468 = vst [vmem:[#allocation1 + $0x30] ss:$2 sm:$0xff] %v8810_v3  ;;  %v8959_v24 = vld [vmem:[%s11526_s0] sm:$0xff] }
  0x5c   : > { %1199 = vrot.lane.b32.xlu2 %v1180_v32, %s8726_s22  ;;  %v8983_v32 = vperm.slane %v8292_v1, 5 }
  0x5e   : > { %11675 = vst [vmem:[#allocation8_spill] sm:$0xff] %v8983_v32 }
  0x61   : > { %1197 = vrot.lane.b32.xlu1 %v1179_v28, %s8726_s22 }
  0x63   : > { %1195 = vrot.lane.b32.xlu0 %v1178_v29, %s8726_s22  ;;  %v8973_v29 = vld [vmem:[%s11528_s2 + $0x8] sm:$0xff] }
  0x64   : > { %1205 = vrot.lane.b32.xlu2 %v1183_v41, %s8726_s22 }
  0x69   : > { %1203 = vrot.lane.b32.xlu1 %v1182_v31, %s8726_s22  ;;  %v8979_v31 = vperm.slane %v8959_v24, 1 }
  0x6b   : > { %1193 = vrot.lane.b32.xlu0 %v1177_v30, %s8726_s22  ;;  %11674 = vst [vmem:[#allocation7_spill] sm:$0xff] %v8979_v31 }
  0x6c   : > { %1673 = vrot.lane.b32.xlu2 %v1655_v43, %s8727_s23  ;;  %v9000_v43 = vperm.slane %v8292_v1, 7 }
  0x6e   : > { %11678 = vst [vmem:[#allocation11_spill] sm:$0xff] %v9000_v43 }
  0x71   : > { %1201 = vrot.lane.b32.xlu1 %v1181_v33, %s8726_s22 }
  0x73   : > { %1207 = vrot.lane.b32.xlu0 %v1184_v36, %s8726_s22  ;;  %v8993_v36 = vperm.slane %v8292_v1, 4 }
  0x74   : > { %1671 = vrot.lane.b32.xlu2 %v1654_v48, %s8727_s23 }
  0x75   : > { %v8889_v52 = vpop.permute.xlu2 %393  ;;  %11676 = vst [vmem:[#allocation9_spill] sm:$0xff] %v8993_v36 }
  0x79   : > { %1677 = vrot.lane.b32.xlu1 %v1657_v46, %s8727_s23 }
  0x7b   : > { %1675 = vrot.lane.b32.xlu0 %v1656_v42, %s8727_s23  ;;  %v8998_v42 = vperm.slane %v8292_v1, 0  ;;  %v9081_v1 = vperm.slane %v8959_v24, 6 }
  0x7c   : > { %1683 = vrot.lane.b32.xlu2 %v1660_v51, %s8727_s23  ;;  %v9013_v51 = vperm.slane %v8959_v24, 0 }
  0x7d   : > { %11677 = vst [vmem:[#allocation10_spill] sm:$0xff] %v8998_v42 }
  0x7e   : > { %v8896_v57 = vpop.permute.xlu2 %478  ;;  %11679 = vst [vmem:[#allocation12_spill] sm:$0xff] %v9013_v51 }
  0x7f   : > { %11683 = vst [vmem:[#allocation16_spill] sm:$0xff] %v9081_v1 }
  0x81   : > { %1681 = vrot.lane.b32.xlu1 %v1659_v50, %s8727_s23 }
  0x83   : > { %1669 = vrot.lane.b32.xlu0 %v1653_v47, %s8727_s23 }
  0x84   : > { %1947 = vrot.lane.b32.xlu2 %v1928_v54, %s8728_s24 }
  0x86   : > { %v8907_v62 = vpop.permute.xlu2 %480 }
  0x87   : > { %v486_v20 = vsel %vm484_vm0, %v8896_v57, %v8907_v62 }
  0x88   : > { %v518_v30 = vmul.f32 %v8942_v18, %v486_v20 }
  0x89   : > { %1945 = vrot.lane.b32.xlu1 %v1927_v53, %s8728_s24 }
  0x8b   : > { %1679 = vrot.lane.b32.xlu0 %v1658_v49, %s8727_s23 }
  0x8c   : > { %1941 = vrot.lane.b32.xlu2 %v1925_v61, %s8728_s24  ;;  %v9042_v61 = vperm.slane %v8959_v24, 2 }
  0x8e   : > { %v8918_v6 = vpop.permute.xlu2 %391  ;;  %11680 = vst [vmem:[#allocation13_spill] sm:$0xff] %v9042_v61 }
  0x8f   : > { %v416_v33 = vsel %vm409_vm2, %v8918_v6, %v8889_v52 }
  0x90   : > { %v437_v48 = vmul.f32 %v8979_v31, %v416_v33  ;;  %v2476_v33 = vld.sshfl [vmem:[#allocation1 + $0x38] sm:$0xff pattern:$0x75316420] }
  0x91   : > { %1943 = vrot.lane.b32.xlu1 %v1926_v58, %s8728_s24 }
  0x93   : > { %1949 = vrot.lane.b32.xlu0 %v1929_v63, %s8728_s24  ;;  %v475_v9 = vpop.permute.xlu1 %474 }
  0x94   : > { %1951 = vrot.lane.b32.xlu2 %v1930_v4, %s8728_s24  ;;  %v2471_v4 = vld.sshfl [vmem:[#allocation1 + $0x10] sm:$0xff pattern:$0x75316420] }
  0x95   : > { %v471_v11 = vpop.permute.xlu0 %470 }
  0x96   : > { %v8929_v12 = vpop.permute.xlu2 %405 }
  0x99   : > { %1955 = vrot.lane.b32.xlu1 %v1932_v56, %s8728_s24  ;;  %v417_v56 = vsel %vm409_vm2, %v8929_v12, %v8918_v6 }
  0x9b   : > { %1953 = vrot.lane.b32.xlu0 %v1931_v55, %s8728_s24  ;;  %v469_v16 = vpop.permute.xlu1 %468 }
  0x9c   : > { %v491_v21 = vsel %vm484_vm0, %v469_v16, %v471_v11  ;;  %2221 = vrot.lane.b32.xlu2 %v2201_v10, %s8729_s27 }
  0x9d   : > { %v473_v22 = vpop.permute.xlu0 %472  ;;  %v513_v23 = vmul.f32 %v8935_v14, %v491_v21 }
  0x9e   : > { %v490_v25 = vsel %vm484_vm0, %v471_v11, %v473_v22  ;;  %v489_v26 = vsel %vm484_vm0, %v473_v22, %v475_v9  ;;  %v8965_v27 = vpop.permute.xlu2 %925  ;;  %v9067_v11 = vld [vmem:[%s11528_s2] sm:$0xff]  ;;  %v8326_v22 = vld [vmem:[%s11526_s0 + $0x10] sm:$0xff] }
  0x9f   : > { %8296 = vmatpush.msk.msra.mxu1 %vm526_vm1, %v513_v23  ;;  %v514_v3 = vmul.f32 %v8938_v2, %v490_v25  ;;  %v515_v28 = vmul.f32 %v8940_v17, %v489_v26  ;;  %v2472_v25 = vld.sshfl [vmem:[#allocation1 + $0x18] sm:$0xff pattern:$0x75316420]  ;;  %v2473_v26 = vld.sshfl [vmem:[#allocation1 + $0x20] sm:$0xff pattern:$0x75316420] }
  0xa0   : > { %8297 = vmatmul.msk.f32.vlgmr.msra.gmra.mxu1 %vm522_vm3, %v8973_v29 }
  0xa1   : > { %8298 = vmatpush.msk.msra.mxu2 %vm526_vm1, %v514_v3  ;;  %8300 = vmatpush.msk.msra.mxu3 %vm526_vm1, %v515_v28  ;;  %v9105_v3 = vperm.slane %v8326_v22, 2  ;;  %v9112_v28 = vperm.slane %v8959_v24, 4 }
  0xa2   : > { %8299 = vmatmul.msk.f32.vlgmr.msra.gmra.mxu2 %vm522_vm3, %v8973_v29  ;;  %2219 = vrot.lane.b32.xlu1 %v8901_v60, %s8729_s27  ;;  %v436_v60 = vmul.f32 %v9013_v51, %v417_v56  ;;  %v9138_v56 = vperm.slane %v8326_v22, 5 }
  0xa3   : > { %2217 = vrot.lane.b32.xlu0 %v8899_v59, %s8729_s27  ;;  %v477_v41 = vpop.permute.xlu1 %476  ;;  %8306 = vmatpush.msk.msrb.mxu2 %vm526_vm1, %v518_v30  ;;  %11684 = vst [vmem:[#allocation17_spill] sm:$0xff] %v9105_v3 }
  0xa4   : > { %v487_v46 = vsel %vm484_vm0, %v477_v41, %v8896_v57  ;;  %v488_v47 = vsel %vm484_vm0, %v475_v9, %v477_v41  ;;  %8301 = vmatmul.msk.f32.vlgmr.msra.gmra.mxu3 %vm522_vm3, %v8973_v29  ;;  %2225 = vrot.lane.b32.xlu2 %v2203_v15, %s8729_s27  ;;  %11685 = vst [vmem:[#allocation18_spill] sm:$0xff] %v9112_v28 }
  0xa5   : > { %v483_v49 = vpop.permute.xlu0 %482  ;;  %v517_v50 = vmul.f32 %v8983_v32, %v487_v46  ;;  %v516_v55 = vmul.f32 %v8993_v36, %v488_v47  ;;  %11687 = vst [vmem:[#allocation20_spill] sm:$0xff] %v9138_v56 }
  0xa6   : > { %v485_v53 = vsel %vm484_vm0, %v8907_v62, %v483_v49  ;;  %v492_v54 = vsel %vm484_vm0, %v483_v49, %v469_v16  ;;  %v9025_v57 = vpop.permute.xlu2 %931  ;;  %v9045_v62 = vperm.slane %v8959_v24, 3  ;;  %v2470_v16 = vld.sshfl [vmem:[#allocation1 + $0x8] sm:$0xff pattern:$0x75316420] }
  0xa7   : > { %v512_v58 = vmul.f32 %v8998_v42, %v492_v54  ;;  %8304 = vmatpush.msk.msrb.mxu1 %vm526_vm1, %v517_v50  ;;  %v519_v59 = vmul.f32 %v9000_v43, %v485_v53  ;;  %v9136_v53 = vld [vmem:[%s11528_s2 + $0x10] sm:$0xff]  ;;  %v2469_v54 = vld.sshfl [vmem:[#allocation1] sm:$0xff pattern:$0x75316420] }
  0xa8   : > { %11681 = vst [vmem:[#allocation14_spill] sm:$0xff] %v9045_v62  ;;  %8305 = vmatmul.msk.f32.vlgmr.msrb.gmra.mxu1 %vm522_vm3, %v8973_v29 }
  0xa9   : > { %8312 = vmatpush.msk.msra.mxu1 %vm526_vm1, %v437_v48  ;;  %8294 = vmatpush.msk.msra.mxu0 %vm526_vm1, %v512_v58 }
  0xaa   : > { %8308 = vmatpush.msk.msrb.mxu3 %vm526_vm1, %v519_v59  ;;  %8307 = vmatmul.msk.f32.vlgmr.msrb.gmra.mxu2 %vm522_vm3, %v8973_v29  ;;  %v9146_v59 = vperm.slane %v8326_v22, 1 }
  0xab   : > { %8302 = vmatpush.msk.msrb.mxu0 %vm526_vm1, %v516_v55  ;;  %2215 = vrot.lane.b32.xlu0 %v8913_v5, %s8729_s27  ;;  %v398_v63 = vpop.permute.xlu1 %397  ;;  %v2475_v55 = vld.sshfl [vmem:[#allocation1 + $0x30] sm:$0xff pattern:$0x75316420] }
  0xac   : > { %2213 = vrot.lane.b32.xlu1 %v8915_v0, %s8729_s27  ;;  %8295 = vmatmul.msk.f32.vlgmr.msra.gmra.mxu0 %vm522_vm3, %v8973_v29  ;;  %11688 = vst [vmem:[#allocation21_spill] sm:$0xff] %v9146_v59 }
  0xad   : > { %v396_v6 = vpop.permute.xlu0 %395  ;;  %8309 = vmatmul.msk.f32.vlgmr.msrb.gmra.mxu3 %vm522_vm3, %v8973_v29  ;;  %8310 = vmatpush.msk.msra.mxu0 %vm526_vm1, %v436_v60 }
  0xae   : > { %v415_v5 = vsel %vm409_vm2, %v8889_v52, %v396_v6  ;;  %v414_v0 = vsel %vm409_vm2, %v396_v6, %v398_v63  ;;  %v9059_v8 = vpop.permute.xlu2 %929  ;;  %2489 = vrot.lane.b32.xlu2 %v2471_v4, %s8730_s12  ;;  %v9072_v52 = vperm.slane %v8959_v24, 7 }
  0xaf   : > { %v438_v9 = vmul.f32 %v9042_v61, %v415_v5  ;;  %v439_v10 = vmul.f32 %v9045_v62, %v414_v0  ;;  %v940_v58 = vsel %vm937_vm4, %v9059_v8, %v9025_v57 }
  0xb0   : > { %11682 = vst [vmem:[#allocation15_spill] sm:$0xff] %v9072_v52  ;;  %8313 = vmatmul.msk.f32.vlgmr.msra.gmra.mxu1 %vm522_vm3, %v9067_v11  ;;  %v970_v6 = vmul.f32 %v9138_v56, %v940_v58 }
  0xb1   : > { %8314 = vmatpush.msk.msra.mxu2 %vm526_vm1, %v438_v9  ;;  %8316 = vmatpush.msk.msra.mxu3 %vm526_vm1, %v439_v10 }
  0xb2   : > { %8315 = vmatmul.msk.f32.vlgmr.msra.gmra.mxu2 %vm522_vm3, %v9067_v11 }
  0xb3   : > { %2227 = vrot.lane.b32.xlu0 %v8944_v19, %s8729_s27  ;;  %v404_v15 = vpop.permute.xlu1 %403 }
  0xb4   : > { %2223 = vrot.lane.b32.xlu1 %v8921_v7, %s8729_s27  ;;  %v410_v20 = vsel %vm409_vm2, %v404_v15, %v8929_v12  ;;  %8303 = vmatmul.msk.f32.vlgmr.msrb.gmra.mxu0 %vm522_vm3, %v8973_v29  ;;  %v9115_v29 = vperm.slane %v8959_v24, 5 }
  0xb5   : > { %v402_v21 = vpop.permute.xlu0 %401  ;;  %v443_v19 = vmul.f32 %v9072_v52, %v410_v20  ;;  %8317 = vmatmul.msk.f32.vlgmr.msra.gmra.mxu3 %vm522_vm3, %v9067_v11  ;;  %v9171_v20 = vperm.slane %v8326_v22, 0 }
  0xb6   : > { %v411_v7 = vsel %vm409_vm2, %v402_v21, %v404_v15  ;;  %2487 = vrot.lane.b32.xlu2 %v2470_v16, %s8730_s12  ;;  %v9101_v23 = vpop.permute.xlu2 %1199  ;;  %11686 = vst [vmem:[#allocation19_spill] sm:$0xff] %v9115_v29  ;;  %v2474_v16 = vld.sshfl [vmem:[#allocation1 + $0x28] sm:$0xff pattern:$0x75316420] }
  0xb7   : > { %v442_v12 = vmul.f32 %v9081_v1, %v411_v7  ;;  %8324 = vmatpush.msk.msrb.mxu3 %vm526_vm1, %v443_v19  ;;  %11690 = vst [vmem:[#allocation23_spill] sm:$0xff] %v9171_v20  ;;  %v9184_v7 = vperm.slane %v8326_v22, 4 }
  0xb9   : > { %8322 = vmatpush.msk.msrb.mxu2 %vm526_vm1, %v442_v12  ;;  %11693 = vst [vmem:[#allocation26_spill] sm:$0xff] %v9184_v7 }
  0xba   : > { %8323 = vmatmul.msk.f32.vlgmr.msrb.gmra.mxu2 %vm522_vm3, %v9067_v11 }
  0xbb   : > { %2491 = vrot.lane.b32.xlu0 %v2472_v25, %s8730_s12  ;;  %v924_v30 = vpop.permute.xlu1 %923 }
  0xbc   : > { %2493 = vrot.lane.b32.xlu1 %v2473_v26, %s8730_s12  ;;  %v943_v41 = vsel %vm937_vm4, %v924_v30, %v8965_v27  ;;  %8311 = vmatmul.msk.f32.vlgmr.msra.gmra.mxu0 %vm522_vm3, %v9067_v11 }
  0xbd   : > { %v400_v46 = vpop.permute.xlu0 %399  ;;  %v967_v47 = vmul.f32 %v9105_v3, %v943_v41  ;;  %8325 = vmatmul.msk.f32.vlgmr.msrb.gmra.mxu3 %vm522_vm3, %v9067_v11 }
  0xbe   : > { %v412_v48 = vsel %vm409_vm2, %v400_v46, %v402_v21  ;;  %v413_v24 = vsel %vm409_vm2, %v398_v63, %v400_v46  ;;  %2499 = vrot.lane.b32.xlu2 %v2476_v33, %s8730_s12  ;;  %v9148_v60 = vpop.permute.xlu2 %1205  ;;  %v9156_v63 = vperm.slane %v8326_v22, 3 }
  0xbf   : > { %v440_v49 = vmul.f32 %v9112_v28, %v413_v24  ;;  %v441_v50 = vmul.f32 %v9115_v29, %v412_v48  ;;  %8332 = vmatpush.msk.msra.mxu2 %vm526_vm1, %v967_v47 }
  0xc0   : > { %11689 = vst [vmem:[#allocation22_spill] sm:$0xff] %v9156_v63 }
  0xc1   : > { %8318 = vmatpush.msk.msrb.mxu0 %vm526_vm1, %v440_v49  ;;  %8320 = vmatpush.msk.msrb.mxu1 %vm526_vm1, %v441_v50 }
  0xc2   : > { %8321 = vmatmul.msk.f32.vlgmr.msrb.gmra.mxu1 %vm522_vm3, %v9067_v11  ;;  %8333 = vmatmul.msk.f32.vlgmr.msra.gmra.mxu2 %vm522_vm3, %v9136_v53 }
  0xc3   : > { %2485 = vrot.lane.b32.xlu0 %v2469_v54, %s8730_s12  ;;  %v922_v4 = vpop.permute.xlu1 %921 }
  0xc4   : > { %2497 = vrot.lane.b32.xlu1 %v2475_v55, %s8730_s12  ;;  %v944_v5 = vsel %vm937_vm4, %v922_v4, %v924_v30  ;;  %8319 = vmatmul.msk.f32.vlgmr.msrb.gmra.mxu0 %vm522_vm3, %v9067_v11  ;;  %v9180_v11 = vperm.slane %v8326_v22, 7 }
  0xc5   : > { %v928_v0 = vpop.permute.xlu0 %927  ;;  %v966_v9 = vmul.f32 %v9146_v59, %v944_v5 }
  0xc6   : > { %v942_v10 = vsel %vm937_vm4, %v8965_v27, %v928_v0  ;;  %v9178_v27 = vperm.slane %v8326_v22, 6  ;;  %11692 = vst [vmem:[#allocation25_spill] sm:$0xff] %v9180_v11  ;;  %v9182_v19 = vpop.permute.xlu2 %1673  ;;  %v941_v25 = vsel %vm937_vm4, %v928_v0, %v9059_v8  ;;  %v8344_v22 = vld [vmem:[%s11526_s0 + $0x18] sm:$0xff] }
  0xc7   : > { %v968_v15 = vmul.f32 %v9156_v63, %v942_v10  ;;  %8330 = vmatpush.msk.msra.mxu1 %vm526_vm1, %v966_v9  ;;  %v969_v8 = vmul.f32 %v9184_v7, %v941_v25  ;;  %v9218_v24 = vperm.slane %v8344_v22, 2  ;;  %v9238_v5 = vperm.slane %v8344_v22, 6 }
  0xc8   : > { %11691 = vst [vmem:[#allocation24_spill] sm:$0xff] %v9178_v27  ;;  %v9244_v9 = vperm.slane %v8344_v22, 1  ;;  %v9259_v25 = vperm.slane %v8344_v22, 5 }
  0xc9   : > { %8338 = vmatpush.msk.msrb.mxu1 %vm526_vm1, %v970_v6  ;;  %8334 = vmatpush.msk.msra.mxu3 %vm526_vm1, %v968_v15  ;;  %11695 = vst [vmem:[#allocation28_spill] sm:$0xff] %v9218_v24  ;;  %v9235_v6 = vld [vmem:[%s11528_s2 + $0x18] sm:$0xff] }
  0xca   : > { %8331 = vmatmul.msk.f32.vlgmr.msra.gmra.mxu1 %vm522_vm3, %v9136_v53  ;;  %8335 = vmatmul.msk.f32.vlgmr.msra.gmra.mxu3 %vm522_vm3, %v9136_v53  ;;  %11696 = vst [vmem:[#allocation29_spill] sm:$0xff] %v9238_v5 }
  0xcb   : > { %2495 = vrot.lane.b32.xlu0 %v2474_v16, %s8730_s12  ;;  %v936_v21 = vpop.permute.xlu1 %935  ;;  %11697 = vst [vmem:[#allocation30_spill] sm:$0xff] %v9244_v9 }
  0xcc   : > { %v945_v12 = vsel %vm937_vm4, %v936_v21, %v922_v4  ;;  %11698 = vst [vmem:[#allocation31_spill] sm:$0xff] %v9259_v25 }
  0xcd   : > { %v934_v26 = vpop.permute.xlu0 %933  ;;  %v965_v30 = vmul.f32 %v9171_v20, %v945_v12 }
  0xce   : > { %v939_v33 = vsel %vm937_vm4, %v9025_v57, %v934_v26  ;;  %v938_v41 = vsel %vm937_vm4, %v934_v26, %v936_v21  ;;  %v9209_v57 = vperm.slane %v8344_v22, 3  ;;  %v9224_v55 = vpop.permute.xlu2 %1671  ;;  %v9265_v26 = vperm.slane %v8344_v22, 4 }
  0xcf   : > { %v971_v46 = vmul.f32 %v9178_v27, %v939_v33  ;;  %v972_v47 = vmul.f32 %v9180_v11, %v938_v41  ;;  %8328 = vmatpush.msk.msra.mxu0 %vm526_vm1, %v965_v30  ;;  %v9267_v33 = vperm.slane %v8344_v22, 0  ;;  %v9269_v41 = vperm.slane %v8344_v22, 7 }
  0xd0   : > { %8329 = vmatmul.msk.f32.vlgmr.msra.gmra.mxu0 %vm522_vm3, %v9136_v53  ;;  %11694 = vst [vmem:[#allocation27_spill] sm:$0xff] %v9209_v57 }
  0xd1   : > { %8340 = vmatpush.msk.msrb.mxu2 %vm526_vm1, %v971_v46  ;;  %8342 = vmatpush.msk.msrb.mxu3 %vm526_vm1, %v972_v47  ;;  %11699 = vst [vmem:[#allocation32_spill] sm:$0xff] %v9265_v26 }
  0xd2   : > { %8336 = vmatpush.msk.msrb.mxu0 %vm526_vm1, %v969_v8  ;;  %8339 = vmatmul.msk.f32.vlgmr.msrb.gmra.mxu1 %vm522_vm3, %v9136_v53  ;;  %11700 = vst [vmem:[#allocation33_spill] sm:$0xff] %v9267_v33 }
  0xd3   : > { %8341 = vmatmul.msk.f32.vlgmr.msrb.gmra.mxu2 %vm522_vm3, %v9136_v53  ;;  %8343 = vmatmul.msk.f32.vlgmr.msrb.gmra.mxu3 %vm522_vm3, %v9136_v53  ;;  %v1198_v48 = vpop.permute.xlu1 %1197  ;;  %11701 = vst [vmem:[#allocation34_spill] sm:$0xff] %v9269_v41 }
  0xd4   : > { %v1214_v49 = vsel %vm1209_vm5, %v1198_v48, %v9101_v23 }
  0xd5   : > { %v1240_v50 = vmul.f32 %v9209_v57, %v1214_v49  ;;  %v1196_v54 = vpop.permute.xlu0 %1195 }
  0xd6   : > { %v1215_v58 = vsel %vm1209_vm5, %v1196_v54, %v1198_v48  ;;  %v9254_v12 = vpop.permute.xlu2 %1683 }
  0xd7   : > { %v1239_v4 = vmul.f32 %v9218_v24, %v1215_v58  ;;  %8352 = vmatpush.msk.msra.mxu3 %vm526_vm1, %v1240_v50 }
  0xd8   : > { %8337 = vmatmul.msk.f32.vlgmr.msrb.gmra.mxu0 %vm522_vm3, %v9136_v53 }
  0xd9   : > { %8350 = vmatpush.msk.msra.mxu2 %vm526_vm1, %v1239_v4 }
  0xdb   : > { %8351 = vmatmul.msk.f32.vlgmr.msra.gmra.mxu2 %vm522_vm3, %v9235_v6  ;;  %8353 = vmatmul.msk.f32.vlgmr.msra.gmra.mxu3 %vm522_vm3, %v9235_v6  ;;  %v1204_v0 = vpop.permute.xlu1 %1203 }
  0xdc   : > { %v1211_v53 = vsel %vm1209_vm5, %v1204_v0, %v9148_v60 }
  0xdd   : > { %v1243_v10 = vmul.f32 %v9238_v5, %v1211_v53  ;;  %v1194_v15 = vpop.permute.xlu0 %1193 }
  0xde   : > { %v1216_v16 = vsel %vm1209_vm5, %v1194_v15, %v1196_v54 }
  0xdf   : > { %v1238_v21 = vmul.f32 %v9244_v9, %v1216_v16  ;;  %8358 = vmatpush.msk.msrb.mxu2 %vm526_vm1, %v1243_v10  ;;  %v1691_v10 = vsel %vm1685_vm6, %v9224_v55, %v9182_v19 }
  0xe1   : > { %8367 = vmatpush.msk.msra.mxu2 %vm526_vm1, %v8856_v37  ;;  %8348 = vmatpush.msk.msra.mxu1 %vm526_vm1, %v1238_v21 }
  0xe2   : > { %8349 = vmatmul.msk.f32.vlgmr.msra.gmra.mxu1 %vm522_vm3, %v9235_v6 }
  0xe3   : > { %8359 = vmatmul.msk.f32.vlgmr.msrb.gmra.mxu2 %vm522_vm3, %v9235_v6  ;;  %v1202_v30 = vpop.permute.xlu1 %1201 }
  0xe4   : > { %v1212_v37 = vsel %vm1209_vm5, %v1202_v30, %v1204_v0  ;;  %v1213_v46 = vsel %vm1209_vm5, %v9101_v23, %v1202_v30  ;;  %8375 = vmatpush.msk.msrb.mxu2 %vm526_vm1, %v8872_v44  ;;  %v9295_v44 = vld [vmem:[%s11528_s2 + $0x20] sm:$0xff]  ;;  %v9297_v23 = vpop.permute.xlu2 %1947 }
  0xe5   : > { %v1242_v47 = vmul.f32 %v9259_v25, %v1212_v37  ;;  %v1208_v8 = vpop.permute.xlu0 %1207  ;;  %v1241_v49 = vmul.f32 %v9265_v26, %v1213_v46 }
  0xe6   : > { %v1210_v48 = vsel %vm1209_vm5, %v9148_v60, %v1208_v8  ;;  %v1217_v22 = vsel %vm1209_vm5, %v1208_v8, %v1194_v15  ;;  %v8379_v60 = vld [vmem:[%s11526_s0 + $0x28] sm:$0xff] }
  0xe7   : > { %v1237_v50 = vmul.f32 %v9267_v33, %v1217_v22  ;;  %v1244_v54 = vmul.f32 %v9269_v41, %v1210_v48  ;;  %8356 = vmatpush.msk.msrb.mxu1 %vm526_vm1, %v1242_v47  ;;  %v9310_v58 = vperm.slane %v8379_v60, 2  ;;  %v9314_v4 = vperm.slane %v8379_v60, 3  ;;  %v8397_v22 = vld [vmem:[%s11526_s0 + $0x30] sm:$0xff] }
  0xe8   : > { %v9318_v0 = vperm.slane %v8379_v60, 1  ;;  %v9339_v21 = vperm.slane %v8379_v60, 6  ;;  %v9358_v37 = vperm.slane %v8379_v60, 7 }
  0xe9   : > { %8365 = vmatpush.msk.msra.mxu1 %vm526_vm1, %v8852_v35  ;;  %8346 = vmatpush.msk.msra.mxu0 %vm526_vm1, %v1237_v50  ;;  %11702 = vst [vmem:[#allocation35_spill] sm:$0xff] %v9310_v58 }
  0xea   : > { %8360 = vmatpush.msk.msrb.mxu3 %vm526_vm1, %v1244_v54  ;;  %8347 = vmatmul.msk.f32.vlgmr.msra.gmra.mxu0 %vm522_vm3, %v9235_v6  ;;  %11703 = vst [vmem:[#allocation36_spill] sm:$0xff] %v9314_v4  ;;  %v9390_v54 = vperm.slane %v8379_v60, 4 }
  0xeb   : > { %8357 = vmatmul.msk.f32.vlgmr.msrb.gmra.mxu1 %vm522_vm3, %v9235_v6  ;;  %8354 = vmatpush.msk.msrb.mxu0 %vm526_vm1, %v1241_v49  ;;  %v1678_v35 = vpop.permute.xlu1 %1677  ;;  %11704 = vst [vmem:[#allocation37_spill] sm:$0xff] %v9318_v0 }
  0xec   : > { %8361 = vmatmul.msk.f32.vlgmr.msrb.gmra.mxu3 %vm522_vm3, %v9235_v6  ;;  %8368 = vmatmul.msk.f32.vlgmr.msra.gmra.mxu2 %vm522_vm3, %v9295_v44  ;;  %11705 = vst [vmem:[#allocation38_spill] sm:$0xff] %v9339_v21  ;;  %v9350_v30 = vpop.permute.xlu2 %1941 }
  0xed   : > { %8369 = vmatpush.msk.msra.mxu3 %vm526_vm1, %v8858_v38  ;;  %v1676_v53 = vpop.permute.xlu0 %1675  ;;  %8373 = vmatpush.msk.msrb.mxu1 %vm526_vm1, %v8864_v40  ;;  %11707 = vst [vmem:[#allocation40_spill] sm:$0xff] %v9358_v37 }
  0xee   : > { %v1689_v15 = vsel %vm1685_vm6, %v1676_v53, %v1678_v35  ;;  %v1690_v38 = vsel %vm1685_vm6, %v9182_v19, %v1676_v53  ;;  %8363 = vmatpush.msk.msra.mxu0 %vm526_vm1, %v8850_v34  ;;  %v9348_v19 = vperm.slane %v8379_v60, 0  ;;  %11709 = vst [vmem:[#allocation42_spill] sm:$0xff] %v9390_v54  ;;  %v9392_v53 = vperm.slane %v8379_v60, 5 }
  0xef   : > { %8377 = vmatpush.msk.msrb.mxu3 %vm526_vm1, %v8874_v45  ;;  %v1715_v40 = vmul.f32 %v9310_v58, %v1690_v38  ;;  %v1716_v16 = vmul.f32 %v9314_v4, %v1689_v15  ;;  %v1714_v45 = vmul.f32 %v9318_v0, %v1691_v10 }
  0xf0   : > { %11706 = vst [vmem:[#allocation39_spill] sm:$0xff] %v9348_v19 }
  0xf1   : > { %8385 = vmatpush.msk.msra.mxu2 %vm526_vm1, %v1715_v40  ;;  %11710 = vst [vmem:[#allocation43_spill] sm:$0xff] %v9392_v53 }
  0xf2   : > { %8355 = vmatmul.msk.f32.vlgmr.msrb.gmra.mxu0 %vm522_vm3, %v9235_v6 }
  0xf3   : > { %8366 = vmatmul.msk.f32.vlgmr.msra.gmra.mxu1 %vm522_vm3, %v9295_v44  ;;  %v1682_v34 = vpop.permute.xlu1 %1681  ;;  %8371 = vmatpush.msk.msrb.mxu0 %vm526_vm1, %v8862_v39  ;;  %v9378_v39 = vld [vmem:[%s11528_s2 + $0x28] sm:$0xff] }
  0xf4   : > { %8370 = vmatmul.msk.f32.vlgmr.msra.gmra.mxu3 %vm522_vm3, %v9295_v44  ;;  %8383 = vmatpush.msk.msra.mxu1 %vm526_vm1, %v1714_v45  ;;  %v1686_v6 = vsel %vm1685_vm6, %v1682_v34, %v9254_v12  ;;  %v1952_v40 = vpop.permute.xlu2 %1951 }
  0xf5   : > { %8376 = vmatmul.msk.f32.vlgmr.msrb.gmra.mxu2 %vm522_vm3, %v9295_v44  ;;  %8387 = vmatpush.msk.msra.mxu3 %vm526_vm1, %v1716_v16  ;;  %v1719_v46 = vmul.f32 %v9339_v21, %v1686_v6  ;;  %v1670_v47 = vpop.permute.xlu0 %1669 }
  0xf6   : > { %v1692_v8 = vsel %vm1685_vm6, %v1670_v47, %v9224_v55  ;;  %v1693_v48 = vsel %vm1685_vm6, %v9254_v12, %v1670_v47  ;;  %v9381_v55 = vperm.slane %v8397_v22, 2 }
  0xf7   : > { %v1713_v49 = vmul.f32 %v9348_v19, %v1692_v8  ;;  %8393 = vmatpush.msk.msrb.mxu2 %vm526_vm1, %v1719_v46  ;;  %v1720_v50 = vmul.f32 %v9358_v37, %v1693_v48  ;;  %v9409_v46 = vperm.slane %v8397_v22, 1 }
  0xf8   : > { %11708 = vst [vmem:[#allocation41_spill] sm:$0xff] %v9381_v55 }
  0xf9   : > { %11711 = vst [vmem:[#allocation44_spill] sm:$0xff] %v9409_v46 }
  0xfa   : > { %8364 = vmatmul.msk.f32.vlgmr.msra.gmra.mxu0 %vm522_vm3, %v9295_v44 }
  0xfb   : > { %8374 = vmatmul.msk.f32.vlgmr.msrb.gmra.mxu1 %vm522_vm3, %v9295_v44  ;;  %8381 = vmatpush.msk.msra.mxu0 %vm526_vm1, %v1713_v49  ;;  %v1946_v12 = vpop.permute.xlu1 %1945 }
  0xfc   : > { %8378 = vmatmul.msk.f32.vlgmr.msrb.gmra.mxu3 %vm522_vm3, %v9295_v44  ;;  %v1962_v10 = vsel %vm1957_vm7, %v1946_v12, %v9297_v23 }
  0xfd   : > { %8386 = vmatmul.msk.f32.vlgmr.msra.gmra.mxu2 %vm522_vm3, %v9378_v39  ;;  %8395 = vmatpush.msk.msrb.mxu3 %vm526_vm1, %v1720_v50  ;;  %v1987_v15 = vmul.f32 %v9381_v55, %v1962_v10  ;;  %v1680_v38 = vpop.permute.xlu0 %1679  ;;  %v9430_v50 = vpop.permute.xlu2 %2221 }
  0xfe   : > { %v1687_v16 = vsel %vm1685_vm6, %v1680_v38, %v1682_v34  ;;  %v1688_v60 = vsel %vm1685_vm6, %v1678_v35, %v1680_v38  ;;  %v9418_v35 = vperm.slane %v8397_v22, 3  ;;  %v9420_v34 = vperm.slane %v8397_v22, 0 }
  0xff   : > { %v1717_v45 = vmul.f32 %v9390_v54, %v1688_v60  ;;  %v1718_v6 = vmul.f32 %v9392_v53, %v1687_v16  ;;  %8403 = vmatpush.msk.msra.mxu2 %vm526_vm1, %v1987_v15  ;;  %v9442_v16 = vperm.slane %v8397_v22, 7  ;;  %v9452_v60 = vperm.slane %v8397_v22, 6 }
 0x100   : > { %11712 = vst [vmem:[#allocation45_spill] sm:$0xff] %v9418_v35 }
 0x101   : > { %8391 = vmatpush.msk.msrb.mxu1 %vm526_vm1, %v1718_v6  ;;  %11713 = vst [vmem:[#allocation46_spill] sm:$0xff] %v9420_v34 }
 0x102   : > { %8372 = vmatmul.msk.f32.vlgmr.msrb.gmra.mxu0 %vm522_vm3, %v9295_v44  ;;  %11714 = vst [vmem:[#allocation47_spill] sm:$0xff] %v9442_v16 }
 0x103   : > { %8384 = vmatmul.msk.f32.vlgmr.msra.gmra.mxu1 %vm522_vm3, %v9378_v39  ;;  %8389 = vmatpush.msk.msrb.mxu0 %vm526_vm1, %v1717_v45  ;;  %v1944_v47 = vpop.permute.xlu1 %1943  ;;  %11716 = vst [vmem:[#allocation49_spill] sm:$0xff] %v9452_v60 }
 0x104   : > { %8388 = vmatmul.msk.f32.vlgmr.msra.gmra.mxu3 %vm522_vm3, %v9378_v39  ;;  %v1963_v8 = vsel %vm1957_vm7, %v1944_v47, %v1946_v12  ;;  %v1964_v44 = vsel %vm1957_vm7, %v9350_v30, %v1944_v47  ;;  %v8398_v12 = vld [vmem:[%s11528_s2 + $0x30] sm:$0xff]  ;;  %v9459_v47 = vperm.slane %v8397_v22, 4 }
 0x105   : > { %8394 = vmatmul.msk.f32.vlgmr.msrb.gmra.mxu2 %vm522_vm3, %v9378_v39  ;;  %v1950_v48 = vpop.permute.xlu0 %1949  ;;  %v1986_v49 = vmul.f32 %v9409_v46, %v1963_v8  ;;  %v1985_v38 = vmul.f32 %v9420_v34, %v1964_v44 }
 0x106   : > { %v1961_v10 = vsel %vm1957_vm7, %v9297_v23, %v1950_v48  ;;  %v9450_v23 = vperm.slane %v8397_v22, 5  ;;  %11717 = vst [vmem:[#allocation50_spill] sm:$0xff] %v9459_v47  ;;  %v8415_v22 = vld [vmem:[%s11526_s0 + $0x38] sm:$0xff] }
 0x107   : > { %v1988_v15 = vmul.f32 %v9418_v35, %v1961_v10  ;;  %8401 = vmatpush.msk.msra.mxu1 %vm526_vm1, %v1986_v49  ;;  %v1960_v49 = vsel %vm1957_vm7, %v1950_v48, %v1952_v40 }
 0x108   : > { %11715 = vst [vmem:[#allocation48_spill] sm:$0xff] %v9450_v23  ;;  %v1989_v48 = vmul.f32 %v9459_v47, %v1960_v49 }
 0x109   : > { %8405 = vmatpush.msk.msra.mxu3 %vm526_vm1, %v1988_v15 }
 0x10a   : > { %8382 = vmatmul.msk.f32.vlgmr.msra.gmra.mxu0 %vm522_vm3, %v9378_v39 }
 0x10b   : > { %8392 = vmatmul.msk.f32.vlgmr.msrb.gmra.mxu1 %vm522_vm3, %v9378_v39  ;;  %v1956_v45 = vpop.permute.xlu1 %1955  ;;  %8399 = vmatpush.msk.msra.mxu0 %vm526_vm1, %v1985_v38 }
 0x10c   : > { %8396 = vmatmul.msk.f32.vlgmr.msrb.gmra.mxu3 %vm522_vm3, %v9378_v39  ;;  %v1965_v6 = vsel %vm1957_vm7, %v1956_v45, %v9350_v30  ;;  %v9471_v30 = vpop.permute.xlu2 %2225 }
 0x10d   : > { %8404 = vmatmul.msk.f32.vlgmr.msra.gmra.mxu2 %vm522_vm3, %v8398_v12  ;;  %v1954_v8 = vpop.permute.xlu0 %1953  ;;  %v1992_v44 = vmul.f32 %v9442_v16, %v1965_v6  ;;  %v2734_v16 = vld [vmem:[%s11529_s3] sm:$0xff] }
 0x10e   : > { %v1959_v10 = vsel %vm1957_vm7, %v1952_v40, %v1954_v8  ;;  %v1958_v15 = vsel %vm1957_vm7, %v1954_v8, %v1956_v45  ;;  %v9482_v40 = vperm.slane %v8415_v22, 3  ;;  %v9487_v45 = vperm.slane %v8415_v22, 2 }
 0x10f   : > { %v1990_v38 = vmul.f32 %v9450_v23, %v1959_v10  ;;  %v1991_v55 = vmul.f32 %v9452_v60, %v1958_v15  ;;  %8413 = vmatpush.msk.msrb.mxu3 %vm526_vm1, %v1992_v44  ;;  %v9502_v10 = vld [vmem:[%s11528_s2 + $0x38] sm:$0xff] }
 0x110   : > { %11718 = vst [vmem:[#allocation51_spill] sm:$0xff] %v9482_v40 }
 0x111   : > { %8409 = vmatpush.msk.msrb.mxu1 %vm526_vm1, %v1990_v38  ;;  %8411 = vmatpush.msk.msrb.mxu2 %vm526_vm1, %v1991_v55  ;;  %11719 = vst [vmem:[#allocation52_spill] sm:$0xff] %v9487_v45  ;;  %v9507_v38 = vperm.slane %v8415_v22, 1 }
 0x112   : > { %8390 = vmatmul.msk.f32.vlgmr.msrb.gmra.mxu0 %vm522_vm3, %v9378_v39 }
 0x113   : > { %8402 = vmatmul.msk.f32.vlgmr.msra.gmra.mxu1 %vm522_vm3, %v8398_v12  ;;  %8407 = vmatpush.msk.msrb.mxu0 %vm526_vm1, %v1989_v48  ;;  %11720 = vst [vmem:[#allocation53_spill] sm:$0xff] %v9507_v38  ;;  %v9509_v48 = vperm.slane %v8415_v22, 0 }
 0x114   : > { %8406 = vmatmul.msk.f32.vlgmr.msra.gmra.mxu3 %vm522_vm3, %v8398_v12  ;;  %v2220_v6 = vpop.permute.xlu1 %2219  ;;  %v2490_v15 = vpop.permute.xlu2 %2489 }
 0x115   : > { %8412 = vmatmul.msk.f32.vlgmr.msrb.gmra.mxu2 %vm522_vm3, %v8398_v12  ;;  %v2218_v8 = vpop.permute.xlu0 %2217  ;;  %v2233_v39 = vsel %vm2229_vm8, %v2220_v6, %v9430_v50  ;;  %11721 = vst [vmem:[#allocation54_spill] sm:$0xff] %v9509_v48 }
 0x116   : > { %v2234_v55 = vsel %vm2229_vm8, %v2218_v8, %v2220_v6  ;;  %v2260_v44 = vmul.f32 %v9482_v40, %v2233_v39 }
 0x117   : > { %v2259_v49 = vmul.f32 %v9487_v45, %v2234_v55  ;;  %v8731_v45 = vmov 0  }
 0x118   : > { %8423 = vmatpush.msk.msra.mxu3 %vm526_vm1, %v2260_v44  ;;  %8712 = vset.pattern.permute.xlu1 %v8731_v45 }
 0x119   : > { %8421 = vmatpush.msk.msra.mxu2 %vm526_vm1, %v2259_v49  ;;  %8713 = vset.pattern.permute.xlu0 %v8731_v45 }
 0x11a   : > { %8400 = vmatmul.msk.f32.vlgmr.msra.gmra.mxu0 %vm522_vm3, %v8398_v12  ;;  %2737 = vperm.xlu1 %8712, %v2734_v16  }
 0x11b   : > { %8410 = vmatmul.msk.f32.vlgmr.msrb.gmra.mxu1 %vm522_vm3, %v8398_v12  ;;  %8714 = vset.pattern.permute.xlu2 %v8731_v45 }
 0x11c   : > { %8414 = vmatmul.msk.f32.vlgmr.msrb.gmra.mxu3 %vm522_vm3, %v8398_v12 }
 0x11d   : > { %8422 = vmatmul.msk.f32.vlgmr.msra.gmra.mxu2 %vm522_vm3, %v9502_v10  ;;  %v2216_v6 = vpop.permute.xlu0 %2215 }
 0x11e   : > { %v2214_v39 = vpop.permute.xlu1 %2213  ;;  %v2235_v55 = vsel %vm2229_vm8, %v2216_v6, %v2218_v8  ;;  %v9530_v8 = vld [vmem:[%s11526_s0 + $0x40] sm:$0xff] }
 0x11f   : > { %v2236_v44 = vsel %vm2229_vm8, %v2214_v39, %v2216_v6  ;;  %v2258_v49 = vmul.f32 %v9507_v38, %v2235_v55  ;;  %v9534_v6 = vperm.slane %v8415_v22, 6  ;;  %v9536_v55 = vperm.slane %v8415_v22, 7 }
 0x120   : > { %v2257_v40 = vmul.f32 %v9509_v48, %v2236_v44  ;;  %v9541_v44 = vperm.slane %v8415_v22, 5  ;;  %v9544_v48 = vperm.slane %v9530_v8, 1 }
 0x121   : > { %8419 = vmatpush.msk.msra.mxu1 %vm526_vm1, %v2258_v49  ;;  %11722 = vst [vmem:[#allocation55_spill] sm:$0xff] %v9534_v6 }
 0x122   : > { %8417 = vmatpush.msk.msra.mxu0 %vm526_vm1, %v2257_v40  ;;  %11723 = vst [vmem:[#allocation56_spill] sm:$0xff] %v9536_v55  ;;  %v2488_v40 = vpop.permute.xlu2 %2487 }
 0x123   : > { %8408 = vmatmul.msk.f32.vlgmr.msrb.gmra.mxu0 %vm522_vm3, %v8398_v12  ;;  %8420 = vmatmul.msk.f32.vlgmr.msra.gmra.mxu1 %vm522_vm3, %v9502_v10  ;;  %v9539_v12 = vperm.slane %v8415_v22, 4  ;;  %11725 = vst [vmem:[#allocation58_spill] sm:$0xff] %v9541_v44  ;;  %v2507_v16 = vsel %vm2501_vm9, %v2488_v40, %v2490_v15  ;;  %v9555_v22 = vpop.f32.mrf.mxu1 }
 0x124   : > { %8424 = vmatmul.msk.f32.vlgmr.msra.gmra.mxu3 %vm522_vm3, %v9502_v10  ;;  %11726 = vst [vmem:[#allocation59_spill] sm:$0xff] %v9544_v48 }
 0x125   : > { %11724 = vst [vmem:[#allocation57_spill] sm:$0xff] %v9539_v12  ;;  %v2228_v49 = vpop.permute.xlu0 %2227  ;;  %v9546_v60 = vpop.f32.mrf.mxu2 }
 0x126   : > { %v2230_v47 = vsel %vm2229_vm8, %v9471_v30, %v2228_v49  ;;  %v2237_v38 = vsel %vm2229_vm8, %v2228_v49, %v2214_v39  ;;  %v2224_v46 = vpop.permute.xlu1 %2223 }
 0x127   : > { %v2263_v45 = vmul.f32 %v9534_v6, %v2230_v47  ;;  %v2264_v34 = vmul.f32 %v9536_v55, %v2237_v38  ;;  %v2231_v23 = vsel %vm2229_vm8, %v2224_v46, %v9471_v30  ;;  %v2232_v21 = vsel %vm2229_vm8, %v9430_v50, %v2224_v46  ;;  %v9572_v38 = vpop.f32.mrf.mxu3 }
 0x128   : > { %v2261_v39 = vmul.f32 %v9539_v12, %v2232_v21  ;;  %v2262_v49 = vmul.f32 %v9541_v44, %v2231_v23  ;;  %v2530_v47 = vmul.f32 %v9544_v48, %v2507_v16  ;;  %v9579_v21 = vperm.slane %v9530_v8, 2  ;;  %v8434_v48 = vld [vmem:[%s11528_s2 + $0x40] sm:$0xff] }
 0x129   : > { %8429 = vmatpush.msk.msrb.mxu2 %vm526_vm1, %v2263_v45  ;;  %8431 = vmatpush.msk.msrb.mxu3 %vm526_vm1, %v2264_v34  ;;  %v9586_v46 = vperm.slane %v9530_v8, 3  ;;  %v9591_v30 = vpop.f32.mrf.mxu0 }
 0x12a   : > { %8425 = vmatpush.msk.msrb.mxu0 %vm526_vm1, %v2261_v39  ;;  %8427 = vmatpush.msk.msrb.mxu1 %vm526_vm1, %v2262_v49  ;;  %11727 = vst [vmem:[#allocation60_spill] sm:$0xff] %v9579_v21 }
 0x12b   : > { %8418 = vmatmul.msk.f32.vlgmr.msra.gmra.mxu0 %vm522_vm3, %v9502_v10  ;;  %8428 = vmatmul.msk.f32.vlgmr.msrb.gmra.mxu1 %vm522_vm3, %v9502_v10  ;;  %11728 = vst [vmem:[#allocation61_spill] sm:$0xff] %v9586_v46 }
 0x12c   : > { %8430 = vmatmul.msk.f32.vlgmr.msrb.gmra.mxu2 %vm522_vm3, %v9502_v10  ;;  %8432 = vmatmul.msk.f32.vlgmr.msrb.gmra.mxu3 %vm522_vm3, %v9502_v10 }
 0x12d   : > { %v2492_v34 = vpop.permute.xlu0 %2491  ;;  %8437 = vmatpush.msk.msra.mxu1 %vm526_vm1, %v2530_v47  ;;  %v9596_v39 = vpop.f32.mrf.mxu2 }
 0x12e   : > { %v2506_v50 = vsel %vm2501_vm9, %v2490_v15, %v2492_v34  ;;  %v2494_v23 = vpop.permute.xlu1 %2493  ;;  %v9602_v47 = vpop.f32.mrf.mxu1 }
 0x12f   : > { %v2531_v16 = vmul.f32 %v9579_v21, %v2506_v50  ;;  %v2505_v45 = vsel %vm2501_vm9, %v2492_v34, %v2494_v23  ;;  %v2500_v15 = vpop.permute.xlu2 %2499  ;;  %v9610_v34 = vperm.slane %v9530_v8, 0  ;;  %v9613_v50 = vperm.slane %v9530_v8, 7 }
 0x130   : > { %v2532_v49 = vmul.f32 %v9586_v46, %v2505_v45  ;;  %v9617_v45 = vpop.f32.mrf.mxu3 }
 0x131   : > { %8439 = vmatpush.msk.msra.mxu2 %vm526_vm1, %v2531_v16  ;;  %11729 = vst [vmem:[#allocation62_spill] sm:$0xff] %v9610_v34  ;;  %v9620_v16 = vperm.slane %v9530_v8, 6  ;;  %v9631_v53 = vpop.f32.mrf.mxu0 }
 0x132   : > { %8441 = vmatpush.msk.msra.mxu3 %vm526_vm1, %v2532_v49  ;;  %11730 = vst [vmem:[#allocation63_spill] sm:$0xff] %v9613_v50 }
 0x133   : > { %8426 = vmatmul.msk.f32.vlgmr.msrb.gmra.mxu0 %vm522_vm3, %v9502_v10  ;;  %8438 = vmatmul.msk.f32.vlgmr.msra.gmra.mxu1 %vm522_vm3, %v8434_v48  ;;  %11731 = vst [vmem:[#allocation64_spill] sm:$0xff] %v9620_v16 }
 0x134   : > { %8440 = vmatmul.msk.f32.vlgmr.msra.gmra.mxu2 %vm522_vm3, %v8434_v48  ;;  %8442 = vmatmul.msk.f32.vlgmr.msra.gmra.mxu3 %vm522_vm3, %v8434_v48 }
 0x135   : > { %v2486_v49 = vpop.permute.xlu0 %2485  ;;  %v9635_v35 = vpop.f32.mrf.mxu2 }
 0x136   : > { %v2498_v10 = vpop.permute.xlu1 %2497  ;;  %v2508_v46 = vsel %vm2501_vm9, %v2486_v49, %v2488_v40  ;;  %v2509_v44 = vsel %vm2501_vm9, %v2500_v15, %v2486_v49  ;;  %v775_v40 = vpop.f32.mrf.mxu1 }
 0x137   : > { %v2502_v12 = vsel %vm2501_vm9, %v2498_v10, %v2500_v15  ;;  %v2529_v21 = vmul.f32 %v9610_v34, %v2508_v46  ;;  %v2536_v6 = vmul.f32 %v9613_v50, %v2509_v44  ;;  %v9640_v15 = vperm.slane %v9530_v8, 4 }
 0x138   : > { %v2535_v55 = vmul.f32 %v9620_v16, %v2502_v12  ;;  %v9643_v44 = vperm.slane %v9530_v8, 5  ;;  %v776_v43 = vadd.f32 %v775_v40, %v9555_v22 }
 0x139   : > { %8435 = vmatpush.msk.msra.mxu0 %vm526_vm1, %v2529_v21  ;;  %8449 = vmatpush.msk.msrb.mxu3 %vm526_vm1, %v2536_v6  ;;  %11732 = vst [vmem:[#allocation65_spill] sm:$0xff] %v9640_v15  ;;  %v9647_v21 = vpop.f32.mrf.mxu3  ;;  %v755_v8 = vpop.f32.mrf.mxu0 }
 0x13a   : > { %8447 = vmatpush.msk.msrb.mxu2 %vm526_vm1, %v2535_v55  ;;  %11733 = vst [vmem:[#allocation66_spill] sm:$0xff] %v9643_v44  ;;  %v816_v22 = vadd.f32 %v9647_v21, %v9572_v38 }
 0x13b   : > { %8436 = vmatmul.msk.f32.vlgmr.msra.gmra.mxu0 %vm522_vm3, %v8434_v48 }
 0x13c   : > { %8448 = vmatmul.msk.f32.vlgmr.msrb.gmra.mxu2 %vm522_vm3, %v8434_v48  ;;  %8450 = vmatmul.msk.f32.vlgmr.msrb.gmra.mxu3 %vm522_vm3, %v8434_v48 }
 0x13d   : > { %v2496_v12 = vpop.permute.xlu0 %2495  ;;  %v9661_v50 = vpop.f32.mrf.mxu2 }
 0x13e   : > { %v2503_v6 = vsel %vm2501_vm9, %v2496_v12, %v2498_v10  ;;  %v2504_v55 = vsel %vm2501_vm9, %v2494_v23, %v2496_v12 }
 0x13f   : > { %v2533_v46 = vmul.f32 %v9640_v15, %v2504_v55  ;;  %v2534_v49 = vmul.f32 %v9643_v44, %v2503_v6  ;;  %v9658_v16 = vpop.f32.mrf.mxu1 }
 0x141   : > { %8443 = vmatpush.msk.msrb.mxu0 %vm526_vm1, %v2533_v46  ;;  %8445 = vmatpush.msk.msrb.mxu1 %vm526_vm1, %v2534_v49  ;;  %v9663_v10 = vpop.f32.mrf.mxu3  ;;  %v9665_v23 = vpop.f32.mrf.mxu0 }
 0x142   : > { %8446 = vmatmul.msk.f32.vlgmr.msrb.gmra.mxu1 %vm522_vm3, %v8434_v48 }
 0x143   : > { %8444 = vmatmul.msk.f32.vlgmr.msrb.gmra.mxu0 %vm522_vm3, %v8434_v48 }
 0x145   : > { %v1059_v55 = vpop.f32.mrf.mxu2 }
 0x147   : > { %v1039_v12 = vpop.f32.mrf.mxu1 }
 0x148   : > { %v1163_v18 = vadd.f32 %v1039_v12, %v776_v43 }
 0x14d   : > { %v1079_v6 = vpop.f32.mrf.mxu3  ;;  %v1019_v44 = vpop.f32.mrf.mxu0 }
 0x14f   : > { %v9669_v49 = vpop.f32.mrf.mxu1 }
 0x155   : > { %v9673_v54 = vpop.f32.mrf.mxu0 }
 0x156   : > { %v9667_v46 = vpop.f32.mrf.mxu2  ;;  %v9671_v15 = vpop.f32.mrf.mxu3 }
 0x15e   : > { %v1331_v34 = vpop.f32.mrf.mxu2  ;;  %v1351_v37 = vpop.f32.mrf.mxu3 }
 0x15f   : > { %v1311_v48 = vpop.f32.mrf.mxu1 }
 0x160   : > { %v1435_v42 = vadd.f32 %v1311_v48, %v1163_v18 }
 0x166   : > { %v9675_v19 = vpop.f32.mrf.mxu2 }
 0x167   : > { %v1291_v58 = vpop.f32.mrf.mxu0 }
 0x168   : > { %v9677_v0 = vpop.f32.mrf.mxu1 }
 0x16f   : > { %v9679_v4 = vpop.f32.mrf.mxu3  ;;  %v1535_v25 = vpop.f32.mrf.mxu2 }
 0x170   : > { %11734 = vst [vmem:[#allocation67_spill] sm:$0xff] %v9679_v4  ;;  %v9681_v26 = vpop.f32.mrf.mxu0  ;;  %v1515_v41 = vpop.f32.mrf.mxu1 }
 0x177   : > { %v1555_v5 = vpop.f32.mrf.mxu3 }
 0x178   : > { %v9683_v33 = vpop.f32.mrf.mxu2  ;;  %v1495_v57 = vpop.f32.mrf.mxu0 }
 0x179   : > { %v9685_v7 = vpop.f32.mrf.mxu1 }
 0x17f   : > { %v9687_v11 = vpop.f32.mrf.mxu3 }
 0x180   : > { %11735 = vst [vmem:[#allocation68_spill] sm:$0xff] %v9687_v11  ;;  %v1807_v20 = vpop.f32.mrf.mxu2  ;;  %v9689_v24 = vpop.f32.mrf.mxu0  ;;  %v756_v11 = vadd.f32 %v755_v8, %v9591_v30 }
 0x181   : > { %11736 = vst [vmem:[#allocation69_spill] sm:$0xff] %v9689_v24  ;;  %v1787_v9 = vpop.f32.mrf.mxu1 }
 0x182   : > { %v1162_v4 = vadd.f32 %v1019_v44, %v756_v11 }
 0x184   : > { %v1434_v18 = vadd.f32 %v1291_v58, %v1162_v4  ;;  %v876_v4 = vadd.f32 %v9661_v50, %v9596_v39 }
 0x187   : > { %v1827_v27 = vpop.f32.mrf.mxu3 }
 0x188   : > { %v1767_v63 = vpop.f32.mrf.mxu0  ;;  %v9693_v56 = vpop.f32.mrf.mxu2 }
 0x189   : > { %v9691_v3 = vpop.f32.mrf.mxu1 }
 0x18c   : > { %v9715_v40 = vpop.permute.xlu1 %2737 }
 0x18f   : > { %v9695_v52 = vpop.f32.mrf.mxu3 }
 0x190   : > { %11737 = vst [vmem:[#allocation70_spill] sm:$0xff] %v9695_v52  ;;  %v9697_v1 = vpop.f32.mrf.mxu0  ;;  %v2079_v51 = vpop.f32.mrf.mxu2  ;;  %v1639_v52 = vadd.f32 %v1515_v41, %v1435_v42  ;;  %v1165_v42 = vadd.f32 %v1079_v6, %v816_v22 }
 0x191   : > { %11738 = vst [vmem:[#allocation71_spill] sm:$0xff] %v9697_v1  ;;  %v2059_v28 = vpop.f32.mrf.mxu1  ;;  %v796_v1 = vadd.f32 %v9635_v35, %v9546_v60 }
 0x192   : > { %v1911_v24 = vadd.f32 %v1787_v9, %v1639_v52  ;;  %v1638_v52 = vadd.f32 %v1495_v57, %v1434_v18  ;;  %v1437_v11 = vadd.f32 %v1351_v37, %v1165_v42  ;;  %v11744_v18 = vld [vmem:[#allocation69_spill] sm:$0xff]  ;;  %v11745_v42 = vld [vmem:[#allocation68_spill] sm:$0xff] }
 0x197   : > { %v2099_v59 = vpop.f32.mrf.mxu3 }
 0x198   : > { %v2039_v29 = vpop.f32.mrf.mxu0  ;;  %v9701_v32 = vpop.f32.mrf.mxu2 }
 0x199   : > { %v9699_v31 = vpop.f32.mrf.mxu1 }
 0x19f   : > { %v9703_v36 = vpop.f32.mrf.mxu3 }
 0x1a0   : > { %11739 = vst [vmem:[#allocation72_spill] sm:$0xff] %v9703_v36  ;;  %v9705_v62 = vpop.f32.mrf.mxu0  ;;  %v2351_v2 = vpop.f32.mrf.mxu2  ;;  %v1164_v36 = vadd.f32 %v1059_v55, %v796_v1  ;;  %v836_v55 = vadd.f32 %v9665_v23, %v9631_v53 }
 0x1a1   : > { %11740 = vst [vmem:[#allocation73_spill] sm:$0xff] %v9705_v62  ;;  %v2331_v61 = vpop.f32.mrf.mxu1  ;;  %v2183_v62 = vadd.f32 %v2059_v28, %v1911_v24  ;;  %v1910_v24 = vadd.f32 %v1767_v63, %v1638_v52 }
 0x1a2   : > { %v1436_v43 = vadd.f32 %v1331_v34, %v1164_v36  ;;  %v1641_v36 = vadd.f32 %v1555_v5, %v1437_v11  ;;  %v1168_v5 = vadd.f32 %v9667_v46, %v876_v4 }
 0x1a3   : > { %v2455_v12 = vadd.f32 %v2331_v61, %v2183_v62  ;;  %v2182_v30 = vadd.f32 %v2039_v29, %v1910_v24  ;;  %v856_v61 = vadd.f32 %v9658_v16, %v9602_v47 }
 0x1a4   : > { %v1640_v41 = vadd.f32 %v1535_v25, %v1436_v43  ;;  %v1913_v62 = vadd.f32 %v1827_v27, %v1641_v36  ;;  %v1440_v47 = vadd.f32 %v9675_v19, %v1168_v5  ;;  %v11751_v5 = vld [vmem:[#allocation3_spill] sm:$0xff] }
 0x1a6   : > { %v1912_v28 = vadd.f32 %v1807_v20, %v1640_v41  ;;  %v2185_v29 = vadd.f32 %v2099_v59, %v1913_v62  ;;  %v1644_v21 = vadd.f32 %v9683_v33, %v1440_v47  ;;  %v1166_v33 = vadd.f32 %v9673_v54, %v836_v55 }
 0x1a7   : > { %v2371_v17 = vpop.f32.mrf.mxu3 }
 0x1a8   : > { %v2311_v14 = vpop.f32.mrf.mxu0  ;;  %v2184_v38 = vadd.f32 %v2079_v51, %v1912_v28  ;;  %v1167_v51 = vadd.f32 %v9669_v49, %v856_v61  ;;  %v2457_v39 = vadd.f32 %v2371_v17, %v2185_v29  ;;  %v11743_v49 = vld [vmem:[#allocation67_spill] sm:$0xff]  ;;  %v11749_v28 = vld [vmem:[#allocation72_spill] sm:$0xff] }
 0x1a9   : > { %v9708_v13 = vpop.f32.mrf.mxu1  ;;  %v2454_v57 = vadd.f32 %v2311_v14, %v2182_v30 }
 0x1aa   : > { %11741 = vst [vmem:[#allocation74_spill] sm:$0xff] %v9708_v13  ;;  %v2456_v25 = vadd.f32 %v2351_v2, %v2184_v38  ;;  %v1439_v37 = vadd.f32 %v9677_v0, %v1167_v51  ;;  %v896_v0 = vadd.f32 %v9663_v10, %v9617_v45  ;;  %v1438_v45 = vadd.f32 %v9681_v26, %v1166_v33 }
 0x1ac   : > { %v1643_v16 = vadd.f32 %v9685_v7, %v1439_v37  ;;  %v1916_v7 = vadd.f32 %v9693_v56, %v1644_v21  ;;  %v1169_v53 = vadd.f32 %v9671_v15, %v896_v0  ;;  %v11746_v15 = vld [vmem:[#allocation71_spill] sm:$0xff]  ;;  %v11752_v21 = vld [vmem:[#allocation4_spill] sm:$0xff]  ;;  %v11753_v0 = vld [vmem:[#allocation10_spill] sm:$0xff] }
 0x1ae   : > { %v1915_v17 = vadd.f32 %v9691_v3, %v1643_v16  ;;  %v2188_v23 = vadd.f32 %v9701_v32, %v1916_v7  ;;  %v1441_v22 = vadd.f32 %v11743_v49, %v1169_v53  ;;  %v11747_v32 = vld [vmem:[#allocation70_spill] sm:$0xff] }
 0x1af   : > { %v2431_v48 = vpop.f32.mrf.mxu2  ;;  %v9717_v13 = vpop.f32.mrf.mxu3 }
 0x1b0   : > { %v9719_v35 = vpop.f32.mrf.mxu0  ;;  %v2187_v19 = vadd.f32 %v9699_v31, %v1915_v17  ;;  %v2460_v43 = vadd.f32 %v2431_v48, %v2188_v23  ;;  %v1645_v41 = vadd.f32 %v11745_v42, %v1441_v22  ;;  %v11748_v48 = vld [vmem:[#allocation73_spill] sm:$0xff] }
 0x1b1   : > { %v2603_v60 = vpop.f32.mrf.mxu1  ;;  %v11742_v56 = vld [vmem:[#allocation74_spill] sm:$0xff]  ;;  %v11754_v23 = vld [vmem:[#allocation5_spill] sm:$0xff] }
 0x1b2   : > { %v2727_v1 = vadd.f32 %v2603_v60, %v2455_v12  ;;  %v2459_v10 = vadd.f32 %v11742_v56, %v2187_v19  ;;  %v1642_v12 = vadd.f32 %v11744_v18, %v1438_v45  ;;  %v1917_v26 = vadd.f32 %v11747_v32, %v1645_v41  ;;  %v11755_v18 = vld [vmem:[#allocation6_spill] sm:$0xff]  ;;  %v11757_v41 = vld [vmem:[#allocation13_spill] sm:$0xff] }
 0x1b4   : > { %v2741_v9 = vadd.f32 %v9715_v40, %v2727_v1  ;;  %v1914_v52 = vadd.f32 %v11746_v15, %v1642_v12  ;;  %v2189_v24 = vadd.f32 %v11749_v28, %v1917_v26  ;;  %v11758_v15 = vld [vmem:[#allocation14_spill] sm:$0xff] }
 0x1b6   : > { %v9722_v58 = vmax.f32 %v2741_v9, 0.0  ;;  %v2186_v1 = vadd.f32 %v11748_v48, %v1914_v52  ;;  %v2461_v61 = vadd.f32 %v9717_v13, %v2189_v24 }
 0x1b7   : > { %v2623_v34 = vpop.f32.mrf.mxu2  ;;  %v2643_v27 = vpop.f32.mrf.mxu3 }
 0x1b8   : > { %2758 = vrot.lane.b32.xlu1 %v9722_v58, %s8723_s19  ;;  %2791 = vrot.lane.b32.xlu2 %v9722_v58, %s8724_s20  ;;  %v2728_v63 = vadd.f32 %v2623_v34, %v2456_v25  ;;  %v2583_v20 = vpop.f32.mrf.mxu0  ;;  %v2729_v59 = vadd.f32 %v2643_v27, %v2457_v39  ;;  %v2458_v38 = vadd.f32 %v9719_v35, %v2186_v1 }
 0x1b9   : > { %v2726_v2 = vadd.f32 %v2583_v20, %v2454_v57 }
 0x1ba   : > { %v2742_v14 = vadd.f32 %v9715_v40, %v2728_v63  ;;  %v2743_v3 = vadd.f32 %v9715_v40, %v2729_v59 }
 0x1bb   : > { %v2740_v50 = vadd.f32 %v9715_v40, %v2726_v2  ;;  %v9864_v2 = vld [vmem:[%s11530_s4 + $0x8] sm:$0xff] }
 0x1bc   : > { %v9739_v44 = vmax.f32 %v2742_v14, 0.0  ;;  %v9765_v54 = vmax.f32 %v2743_v3, 0.0 }
 0x1bd   : > { %v9742_v8 = vmax.f32 %v2740_v50, 0.0 }
 0x1be   : > { %2793 = vrot.lane.b32.xlu0 %v9739_v44, %s8724_s20 }
 0x1bf   : > { %v2683_v6 = vpop.f32.mrf.mxu1  ;;  %v2703_v46 = vpop.f32.mrf.mxu2 }
 0x1c0   : > { %2756 = vrot.lane.b32.xlu1 %v9742_v8, %s8723_s19  ;;  %2789 = vrot.lane.b32.xlu2 %v9742_v8, %s8724_s20  ;;  %v2731_v31 = vadd.f32 %v2683_v6, %v2459_v10  ;;  %v2732_v60 = vadd.f32 %v2703_v46, %v2460_v43  ;;  %v2663_v36 = vpop.f32.mrf.mxu0  ;;  %v2723_v30 = vpop.f32.mrf.mxu3 }
 0x1c1   : > { %v2730_v62 = vadd.f32 %v2663_v36, %v2458_v38  ;;  %v2733_v57 = vadd.f32 %v2723_v30, %v2461_v61  ;;  %v11760_v38 = vld [vmem:[#allocation8_spill] sm:$0xff]  ;;  %v11761_v61 = vld [vmem:[#allocation7_spill] sm:$0xff] }
 0x1c2   : > { %v2745_v11 = vadd.f32 %v9715_v40, %v2731_v31  ;;  %v2746_v9 = vadd.f32 %v9715_v40, %v2732_v60  ;;  %v11756_v31 = vld [vmem:[#allocation11_spill] sm:$0xff] }
 0x1c3   : > { %v2744_v35 = vadd.f32 %v9715_v40, %v2730_v62  ;;  %v2747_v34 = vadd.f32 %v9715_v40, %v2733_v57  ;;  %v9953_v57 = vld [vmem:[%s11530_s4] sm:$0xff] }
 0x1c4   : > { %v9782_v25 = vmax.f32 %v2745_v11, 0.0  ;;  %v9784_v4 = vmax.f32 %v2746_v9, 0.0  ;;  %v11759_v9 = vld [vmem:[#allocation9_spill] sm:$0xff] }
 0x1c5   : > { %v9794_v13 = vmax.f32 %v2744_v35, 0.0  ;;  %v9796_v51 = vmax.f32 %v2747_v34, 0.0  ;;  %v11762_v35 = vld [vmem:[#allocation19_spill] sm:$0xff] }
 0x1c6   : > { %2762 = vrot.lane.b32.xlu0 %v9765_v54, %s8723_s19 }
 0x1c8   : > { %2795 = vrot.lane.b32.xlu1 %v9765_v54, %s8724_s20  ;;  %2760 = vrot.lane.b32.xlu2 %v9739_v44, %s8723_s19 }
 0x1ce   : > { %2799 = vrot.lane.b32.xlu0 %v9782_v25, %s8724_s20 }
 0x1d0   : > { %2801 = vrot.lane.b32.xlu1 %v9784_v4, %s8724_s20  ;;  %2766 = vrot.lane.b32.xlu2 %v9782_v25, %s8723_s19 }
 0x1d6   : > { %2797 = vrot.lane.b32.xlu0 %v9794_v13, %s8724_s20 }
 0x1d8   : > { %3154 = vrot.lane.b32.xlu1 %v9739_v44, %s8725_s21  ;;  %2803 = vrot.lane.b32.xlu2 %v9796_v51, %s8724_s20 }
 0x1de   : > { %3152 = vrot.lane.b32.xlu0 %v9722_v58, %s8725_s21 }
 0x1e0   : > { %3160 = vrot.lane.b32.xlu1 %v9782_v25, %s8725_s21  ;;  %2764 = vrot.lane.b32.xlu2 %v9794_v13, %s8723_s19 }
 0x1e6   : > { %3150 = vrot.lane.b32.xlu0 %v9742_v8, %s8725_s21 }
 0x1e8   : > { %2770 = vrot.lane.b32.xlu1 %v9796_v51, %s8723_s19  ;;  %3156 = vrot.lane.b32.xlu2 %v9765_v54, %s8725_s21 }
 0x1ee   : > { %2768 = vrot.lane.b32.xlu0 %v9784_v4, %s8723_s19 }
 0x1f0   : > { %3158 = vrot.lane.b32.xlu1 %v9794_v13, %s8725_s21  ;;  %3357 = vrot.lane.b32.xlu2 %v9722_v58, %s8726_s22 }
 0x1f6   : > { %3359 = vrot.lane.b32.xlu0 %v9739_v44, %s8726_s22 }
 0x1f8   : > { %3361 = vrot.lane.b32.xlu1 %v9765_v54, %s8726_s22  ;;  %3162 = vrot.lane.b32.xlu2 %v9784_v4, %s8725_s21 }
 0x1fe   : > { %3164 = vrot.lane.b32.xlu0 %v9796_v51, %s8725_s21 }
 0x200   : > { %3737 = vrot.lane.b32.xlu1 %v9739_v44, %s8727_s23  ;;  %3355 = vrot.lane.b32.xlu2 %v9742_v8, %s8726_s22 }
 0x206   : > { %3365 = vrot.lane.b32.xlu0 %v9782_v25, %s8726_s22 }
 0x208   : > { %3367 = vrot.lane.b32.xlu1 %v9784_v4, %s8726_s22  ;;  %3369 = vrot.lane.b32.xlu2 %v9796_v51, %s8726_s22 }
 0x20e   : > { %3363 = vrot.lane.b32.xlu0 %v9794_v13, %s8726_s22 }
 0x210   : > { %3735 = vrot.lane.b32.xlu1 %v9722_v58, %s8727_s23  ;;  %3739 = vrot.lane.b32.xlu2 %v9765_v54, %s8727_s23 }
 0x212   : > { %v2792_v40 = vpop.permute.xlu2 %2791 }
 0x216   : > { %3741 = vrot.lane.b32.xlu0 %v9794_v13, %s8727_s23 }
 0x218   : > { %3944 = vrot.lane.b32.xlu1 %v9765_v54, %s8728_s24  ;;  %3733 = vrot.lane.b32.xlu2 %v9742_v8, %s8727_s23 }
 0x21a   : > { %v2790_v29 = vpop.permute.xlu2 %2789 }
 0x21b   : > { %v2811_v20 = vsel %vm484_vm0, %v2790_v29, %v2792_v40 }
 0x21c   : > { %v2814_v27 = vmul.f32 %v2811_v20, %v11751_v5 }
 0x21e   : > { %2862 = vmatpush.msra.mxu1 %v2814_v27  ;;  %3942 = vrot.lane.b32.xlu0 %v9739_v44, %s8728_s24 }
 0x21f   : > { %8453 = vmatmul.msk.f32.vlgmr.msra.gmra.mxu1 %vm2823_vm10, %v9864_v2 }
 0x220   : > { %3938 = vrot.lane.b32.xlu1 %v9742_v8, %s8728_s24  ;;  %3743 = vrot.lane.b32.xlu2 %v9782_v25, %s8727_s23 }
 0x222   : > { %v2761_v37 = vpop.permute.xlu2 %2760 }
 0x226   : > { %3940 = vrot.lane.b32.xlu0 %v9722_v58, %s8728_s24 }
 0x228   : > { %3747 = vrot.lane.b32.xlu1 %v9796_v51, %s8727_s23  ;;  %3946 = vrot.lane.b32.xlu2 %v9794_v13, %s8728_s24 }
 0x22a   : > { %v2759_v39 = vpop.permute.xlu1 %2758  ;;  %v9874_v14 = vpop.permute.xlu2 %2766 }
 0x22b   : > { %v2777_v46 = vsel %vm409_vm2, %v2759_v39, %v2761_v37 }
 0x22c   : > { %v2782_v60 = vmul.f32 %v2777_v46, %v11757_v41 }
 0x22e   : > { %3745 = vrot.lane.b32.xlu0 %v9784_v4, %s8727_s23 }
 0x230   : > { %3948 = vrot.lane.b32.xlu1 %v9782_v25, %s8728_s24  ;;  %4147 = vrot.lane.b32.xlu2 %v9739_v44, %s8729_s27  ;;  %v2794_v47 = vpop.permute.xlu0 %2793 }
 0x231   : > { %v2810_v50 = vsel %vm484_vm0, %v2792_v40, %v2794_v47 }
 0x232   : > { %v9884_v16 = vpop.permute.xlu1 %2756  ;;  %v2804_v59 = vpop.permute.xlu2 %2803  ;;  %v2815_v55 = vmul.f32 %v2810_v50, %v11752_v21  ;;  %v11763_v50 = vld [vmem:[#allocation21_spill] sm:$0xff] }
 0x233   : > { %v2812_v17 = vsel %vm484_vm0, %v2804_v59, %v2790_v29  ;;  %v2778_v26 = vsel %vm409_vm2, %v9884_v16, %v2759_v39 }
 0x234   : > { %v2813_v7 = vmul.f32 %v2812_v17, %v11753_v0  ;;  %2882 = vmatpush.msra.mxu2 %v2815_v55  ;;  %v2781_v62 = vmul.f32 %v2778_v26, %v11761_v61  ;;  %v11764_v17 = vld [vmem:[#allocation12_spill] sm:$0xff]  ;;  %v8468_v26 = vld [vmem:[%s11530_s4 + $0x10] sm:$0xff] }
 0x235   : > { %8454 = vmatmul.msk.f32.vlgmr.msra.gmra.mxu2 %vm2823_vm10, %v9864_v2 }
 0x236   : > { %2842 = vmatpush.msra.mxu0 %v2813_v7  ;;  %4149 = vrot.lane.b32.xlu0 %v9765_v54, %s8729_s27 }
 0x237   : > { %8452 = vmatmul.msk.f32.vlgmr.msra.gmra.mxu0 %vm2823_vm10, %v9864_v2 }
 0x238   : > { %4151 = vrot.lane.b32.xlu1 %v9794_v13, %s8729_s27  ;;  %3950 = vrot.lane.b32.xlu2 %v9784_v4, %s8728_s24  ;;  %v2763_v33 = vpop.permute.xlu0 %2762 }
 0x239   : > { %v2776_v49 = vsel %vm409_vm2, %v2761_v37, %v2763_v33 }
 0x23a   : > { %v2796_v19 = vpop.permute.xlu1 %2795  ;;  %v2765_v3 = vpop.permute.xlu2 %2764  ;;  %v2783_v52 = vmul.f32 %v2776_v49, %v11758_v15  ;;  %v11766_v49 = vld [vmem:[#allocation16_spill] sm:$0xff] }
 0x23b   : > { %v2809_v53 = vsel %vm484_vm0, %v2794_v47, %v2796_v19  ;;  %v2774_v24 = vsel %vm409_vm2, %v2765_v3, %v9874_v14 }
 0x23c   : > { %v2816_v6 = vmul.f32 %v2809_v53, %v11754_v23  ;;  %v2785_v34 = vmul.f32 %v2774_v24, %v11762_v35 }
 0x23e   : > { %2902 = vmatpush.msra.mxu3 %v2816_v6  ;;  %3952 = vrot.lane.b32.xlu0 %v9796_v51, %s8728_s24 }
 0x23f   : > { %8455 = vmatmul.msk.f32.vlgmr.msra.gmra.mxu3 %vm2823_vm10, %v9864_v2 }
 0x240   : > { %4352 = vrot.lane.b32.xlu1 %v9739_v44, %s8730_s12  ;;  %4145 = vrot.lane.b32.xlu2 %v9722_v58, %s8729_s27  ;;  %v2800_v45 = vpop.permute.xlu0 %2799 }
 0x242   : > { %v2802_v56 = vpop.permute.xlu1 %2801  ;;  %v9911_v10 = vpop.permute.xlu2 %3156 }
 0x243   : > { %v2805_v22 = vsel %vm484_vm0, %v2802_v56, %v2804_v59  ;;  %v2806_v43 = vsel %vm484_vm0, %v2800_v45, %v2802_v56 }
 0x244   : > { %v2819_v12 = vmul.f32 %v2806_v43, %v11755_v18  ;;  %v2820_v42 = vmul.f32 %v2805_v22, %v11756_v31  ;;  %v11767_v43 = vld [vmem:[#allocation15_spill] sm:$0xff] }
 0x246   : > { %2962 = vmatpush.msrb.mxu2 %v2819_v12  ;;  %2982 = vmatpush.msrb.mxu3 %v2820_v42 }
 0x247   : > { %4143 = vrot.lane.b32.xlu0 %v9742_v8, %s8729_s27  ;;  %8459 = vmatmul.msk.f32.vlgmr.msrb.gmra.mxu3 %vm2823_vm10, %v9864_v2 }
 0x248   : > { %3045 = vmatpush.msra.mxu2 %v2782_v60  ;;  %3065 = vmatpush.msra.mxu3 %v2783_v52  ;;  %v2798_v32 = vpop.permute.xlu0 %2797  ;;  %v11768_v52 = vld [vmem:[#allocation20_spill] sm:$0xff] }
 0x249   : > { %4155 = vrot.lane.b32.xlu1 %v9784_v4, %s8729_s27  ;;  %4157 = vrot.lane.b32.xlu2 %v9796_v51, %s8729_s27  ;;  %v2807_v48 = vsel %vm484_vm0, %v2798_v32, %v2800_v45  ;;  %v2808_v1 = vsel %vm484_vm0, %v2796_v19, %v2798_v32  ;;  %v11765_v19 = vld [vmem:[#allocation18_spill] sm:$0xff] }
 0x24a   : > { %v3155_v11 = vpop.permute.xlu1 %3154  ;;  %v9940_v28 = vpop.permute.xlu2 %3357  ;;  %8458 = vmatmul.msk.f32.vlgmr.msrb.gmra.mxu2 %vm2823_vm10, %v9864_v2  ;;  %v2817_v36 = vmul.f32 %v2808_v1, %v11759_v9  ;;  %v2818_v30 = vmul.f32 %v2807_v48, %v11760_v38  ;;  %v11769_v48 = vld [vmem:[#allocation17_spill] sm:$0xff] }
 0x24b   : > { %v3170_v46 = vsel %vm937_vm4, %v3155_v11, %v9911_v10 }
 0x24c   : > { %2922 = vmatpush.msrb.mxu0 %v2817_v36  ;;  %2942 = vmatpush.msrb.mxu1 %v2818_v30  ;;  %v11771_v36 = vld [vmem:[#allocation24_spill] sm:$0xff] }
 0x24d   : > { %8457 = vmatmul.msk.f32.vlgmr.msrb.gmra.mxu1 %vm2823_vm10, %v9864_v2  ;;  %8456 = vmatmul.msk.f32.vlgmr.msrb.gmra.mxu0 %vm2823_vm10, %v9864_v2  ;;  %v2775_v2 = vsel %vm409_vm2, %v2763_v33, %v2765_v3 }
 0x24e   : > { %3025 = vmatpush.msra.mxu1 %v2781_v62  ;;  %v2784_v53 = vmul.f32 %v2775_v2, %v11765_v19  ;;  %v11772_v62 = vld [vmem:[#allocation30_spill] sm:$0xff] }
 0x24f   : > { %4153 = vrot.lane.b32.xlu0 %v9782_v25, %s8729_s27  ;;  %8463 = vmatmul.msk.f32.vlgmr.msra.gmra.mxu3 %vm2823_vm10, %v9953_v57 }
 0x250   : > { %3105 = vmatpush.msrb.mxu1 %v2785_v34  ;;  %v3153_v40 = vpop.permute.xlu0 %3152 }
 0x251   : > { %4350 = vrot.lane.b32.xlu1 %v9722_v58, %s8730_s12  ;;  %4354 = vrot.lane.b32.xlu2 %v9765_v54, %s8730_s12  ;;  %v3171_v33 = vsel %vm937_vm4, %v3153_v40, %v3155_v11  ;;  %v11770_v11 = vld [vmem:[#allocation22_spill] sm:$0xff] }
 0x252   : > { %v3161_v29 = vpop.permute.xlu1 %3160  ;;  %v9968_v20 = vpop.permute.xlu2 %3162  ;;  %8462 = vmatmul.msk.f32.vlgmr.msra.gmra.mxu2 %vm2823_vm10, %v9953_v57  ;;  %v3176_v1 = vmul.f32 %v3171_v33, %v11769_v48  ;;  %v3177_v24 = vmul.f32 %v3170_v46, %v11770_v11  ;;  %v11775_v46 = vld [vmem:[#allocation25_spill] sm:$0xff] }
 0x253   : > { %v3167_v60 = vsel %vm937_vm4, %v3161_v29, %v9968_v20 }
 0x254   : > { %v3180_v30 = vmul.f32 %v3167_v60, %v11771_v36  ;;  %v11778_v60 = vld [vmem:[#allocation33_spill] sm:$0xff] }
 0x255   : > { %8461 = vmatmul.msk.f32.vlgmr.msra.gmra.mxu1 %vm2823_vm10, %v9953_v57 }
 0x257   : > { %4356 = vrot.lane.b32.xlu0 %v9794_v13, %s8730_s12 }
 0x258   : > { %v3151_v27 = vpop.permute.xlu0 %3150 }
 0x259   : > { %4362 = vrot.lane.b32.xlu1 %v9796_v51, %s8730_s12  ;;  %4348 = vrot.lane.b32.xlu2 %v9742_v8, %s8730_s12  ;;  %v3172_v37 = vsel %vm937_vm4, %v3151_v27, %v3153_v40 }
 0x25a   : > { %v2771_v39 = vpop.permute.xlu1 %2770  ;;  %v3356_v47 = vpop.permute.xlu2 %3355  ;;  %v3175_v59 = vmul.f32 %v3172_v37, %v11763_v50 }
 0x25b   : > { %v2779_v55 = vsel %vm409_vm2, %v2771_v39, %v9884_v16 }
 0x25c   : > { %v2780_v7 = vmul.f32 %v2779_v55, %v11764_v17  ;;  %3222 = vmatpush.msra.mxu1 %v3175_v59 }
 0x25d   : > { %8465 = vmatmul.msk.f32.vlgmr.msrb.gmra.mxu1 %vm2823_vm10, %v9953_v57 }
 0x25e   : > { %3005 = vmatpush.msra.mxu0 %v2780_v7 }
 0x25f   : > { %4360 = vrot.lane.b32.xlu0 %v9784_v4, %s8730_s12  ;;  %8460 = vmatmul.msk.f32.vlgmr.msra.gmra.mxu0 %vm2823_vm10, %v9953_v57 }
 0x260   : > { %3085 = vmatpush.msrb.mxu0 %v2784_v53  ;;  %v2769_v16 = vpop.permute.xlu0 %2768 }
 0x261   : > { %4358 = vrot.lane.b32.xlu2 %v9782_v25, %s8730_s12  ;;  %v2772_v3 = vsel %vm409_vm2, %v2769_v16, %v2771_v39  ;;  %v2773_v6 = vsel %vm409_vm2, %v9874_v14, %v2769_v16  ;;  %v3377_v14 = vsel %vm1209_vm5, %v3356_v47, %v9940_v28  ;;  %v11773_v39 = vld [vmem:[#allocation28_spill] sm:$0xff] }
 0x262   : > { %v3159_v45 = vpop.permute.xlu1 %3158  ;;  %v3370_v56 = vpop.permute.xlu2 %3369  ;;  %v2786_v22 = vmul.f32 %v2773_v6, %v11766_v49  ;;  %v2787_v12 = vmul.f32 %v2772_v3, %v11767_v43  ;;  %v3380_v34 = vmul.f32 %v3377_v14, %v11772_v62  ;;  %v11774_v3 = vld [vmem:[#allocation23_spill] sm:$0xff] }
 0x263   : > { %v3168_v42 = vsel %vm937_vm4, %v3159_v45, %v3161_v29 }
 0x264   : > { %v3179_v32 = vmul.f32 %v3168_v42, %v11768_v52  ;;  %3125 = vmatpush.msrb.mxu2 %v2786_v22  ;;  %3145 = vmatpush.msrb.mxu3 %v2787_v12 }
 0x265   : > { %8466 = vmatmul.msk.f32.vlgmr.msrb.gmra.mxu2 %vm2823_vm10, %v9953_v57  ;;  %8467 = vmatmul.msk.f32.vlgmr.msrb.gmra.mxu3 %vm2823_vm10, %v9953_v57 }
 0x266   : > { %8470 = vmatmul.msk.f32.vlgmr.msra.gmra.mxu1 %vm2823_vm10, %v8468_v26  ;;  %3242 = vmatpush.msra.mxu2 %v3176_v1 }
 0x267   : > { %3262 = vmatpush.msra.mxu3 %v3177_v24  ;;  %3302 = vmatpush.msrb.mxu1 %v3179_v32 }
 0x268   : > { %3322 = vmatpush.msrb.mxu2 %v3180_v30  ;;  %v3360_v40 = vpop.permute.xlu0 %3359  ;;  %8464 = vmatmul.msk.f32.vlgmr.msrb.gmra.mxu0 %vm2823_vm10, %v9953_v57 }
 0x269   : > { %3427 = vmatpush.msra.mxu1 %v3380_v34  ;;  %v3376_v29 = vsel %vm1209_vm5, %v9940_v28, %v3360_v40  ;;  %v3169_v28 = vsel %vm937_vm4, %v9911_v10, %v3159_v45  ;;  %v3378_v10 = vsel %vm1209_vm5, %v3370_v56, %v3356_v47  ;;  %v11776_v45 = vld [vmem:[#allocation26_spill] sm:$0xff]  ;;  %v11779_v34 = vld [vmem:[#allocation29_spill] sm:$0xff] }
 0x26a   : > { %v3362_v2 = vpop.permute.xlu1 %3361  ;;  %v10034_v37 = vpop.permute.xlu2 %3739  ;;  %v3381_v59 = vmul.f32 %v3376_v29, %v11773_v39  ;;  %v3178_v12 = vmul.f32 %v3169_v28, %v11776_v45  ;;  %v3379_v14 = vmul.f32 %v3378_v10, %v11778_v60  ;;  %v11780_v29 = vld [vmem:[#allocation34_spill] sm:$0xff] }
 0x26b   : > { %v3375_v33 = vsel %vm1209_vm5, %v3360_v40, %v3362_v2 }
 0x26d   : > { %8471 = vmatmul.msk.f32.vlgmr.msra.gmra.mxu2 %vm2823_vm10, %v8468_v26  ;;  %8472 = vmatmul.msk.f32.vlgmr.msra.gmra.mxu3 %vm2823_vm10, %v8468_v26 }
 0x26e   : > { %8474 = vmatmul.msk.f32.vlgmr.msrb.gmra.mxu1 %vm2823_vm10, %v8468_v26  ;;  %3447 = vmatpush.msra.mxu2 %v3381_v59 }
 0x270   : > { %v3165_v55 = vpop.permute.xlu0 %3164 }
 0x271   : > { %v3166_v7 = vsel %vm937_vm4, %v9968_v20, %v3165_v55  ;;  %v3173_v57 = vsel %vm937_vm4, %v3165_v55, %v3151_v27  ;;  %v8477_v20 = vld [vmem:[%s11530_s4 + $0x18] sm:$0xff]  ;;  %v11777_v27 = vld [vmem:[#allocation27_spill] sm:$0xff] }
 0x272   : > { %v3738_v53 = vpop.permute.xlu1 %3737  ;;  %v10050_v16 = vpop.permute.xlu2 %3733  ;;  %v3174_v6 = vmul.f32 %v3173_v57, %v11774_v3  ;;  %v3181_v22 = vmul.f32 %v3166_v7, %v11775_v46  ;;  %v3382_v42 = vmul.f32 %v3375_v33, %v11777_v27  ;;  %v11781_v57 = vld [vmem:[#allocation32_spill] sm:$0xff]  ;;  %v11782_v33 = vld [vmem:[#allocation31_spill] sm:$0xff] }
 0x274   : > { %3202 = vmatpush.msra.mxu0 %v3174_v6  ;;  %3342 = vmatpush.msrb.mxu3 %v3181_v22 }
 0x275   : > { %8469 = vmatmul.msk.f32.vlgmr.msra.gmra.mxu0 %vm2823_vm10, %v8468_v26  ;;  %8475 = vmatmul.msk.f32.vlgmr.msrb.gmra.mxu2 %vm2823_vm10, %v8468_v26 }
 0x276   : > { %3282 = vmatpush.msrb.mxu0 %v3178_v12  ;;  %8476 = vmatmul.msk.f32.vlgmr.msrb.gmra.mxu3 %vm2823_vm10, %v8468_v26 }
 0x277   : > { %8479 = vmatmul.msk.f32.vlgmr.msra.gmra.mxu1 %vm2823_vm10, %v8477_v20  ;;  %3467 = vmatpush.msra.mxu3 %v3382_v42 }
 0x278   : > { %3407 = vmatpush.msra.mxu0 %v3379_v14  ;;  %v3366_v47 = vpop.permute.xlu0 %3365  ;;  %v11785_v14 = vld [vmem:[#allocation35_spill] sm:$0xff] }
 0x27a   : > { %v3368_v32 = vpop.permute.xlu1 %3367  ;;  %v10068_v1 = vpop.permute.xlu2 %3743 }
 0x27b   : > { %v3371_v24 = vsel %vm1209_vm5, %v3368_v32, %v3370_v56  ;;  %v3372_v30 = vsel %vm1209_vm5, %v3366_v47, %v3368_v32  ;;  %v11786_v32 = vld [vmem:[#allocation39_spill] sm:$0xff] }
 0x27c   : > { %v3385_v40 = vmul.f32 %v3372_v30, %v11779_v34  ;;  %v3386_v59 = vmul.f32 %v3371_v24, %v11780_v29 }
 0x27d   : > { %8473 = vmatmul.msk.f32.vlgmr.msrb.gmra.mxu0 %vm2823_vm10, %v8468_v26  ;;  %8480 = vmatmul.msk.f32.vlgmr.msra.gmra.mxu2 %vm2823_vm10, %v8477_v20 }
 0x27e   : > { %8481 = vmatmul.msk.f32.vlgmr.msra.gmra.mxu3 %vm2823_vm10, %v8477_v20  ;;  %3527 = vmatpush.msrb.mxu2 %v3385_v40 }
 0x27f   : > { %3547 = vmatpush.msrb.mxu3 %v3386_v59 }
 0x280   : > { %3620 = vmatpush.msra.mxu2 %v9739_v44  ;;  %v3364_v56 = vpop.permute.xlu0 %3363 }
 0x281   : > { %3640 = vmatpush.msra.mxu3 %v9765_v54  ;;  %v3373_v55 = vsel %vm1209_vm5, %v3364_v56, %v3366_v47  ;;  %v3374_v28 = vsel %vm1209_vm5, %v3362_v2, %v3364_v56 }
 0x282   : > { %v3736_v7 = vpop.permute.xlu1 %3735  ;;  %v3383_v26 = vmul.f32 %v3374_v28, %v11781_v57  ;;  %v3384_v6 = vmul.f32 %v3373_v55, %v11782_v33  ;;  %v10087_v22 = vpop.permute.xlu2 %3946  ;;  %v8495_v55 = vld [vmem:[%s11530_s4 + $0x28] sm:$0xff] }
 0x283   : > { %v3754_v10 = vsel %vm1685_vm6, %v3736_v7, %v3738_v53 }
 0x284   : > { %3487 = vmatpush.msrb.mxu0 %v3383_v26  ;;  %3507 = vmatpush.msrb.mxu1 %v3384_v6  ;;  %v11788_v6 = vld [vmem:[#allocation42_spill] sm:$0xff] }
 0x285   : > { %8478 = vmatmul.msk.f32.vlgmr.msra.gmra.mxu0 %vm2823_vm10, %v8477_v20  ;;  %8483 = vmatmul.msk.f32.vlgmr.msrb.gmra.mxu1 %vm2823_vm10, %v8477_v20 }
 0x286   : > { %8484 = vmatmul.msk.f32.vlgmr.msrb.gmra.mxu2 %vm2823_vm10, %v8477_v20  ;;  %8485 = vmatmul.msk.f32.vlgmr.msrb.gmra.mxu3 %vm2823_vm10, %v8477_v20 }
 0x287   : > { %3580 = vmatpush.msra.mxu0 %v9742_v8  ;;  %3600 = vmatpush.msra.mxu1 %v9722_v58  ;;  %v8486_v8 = vld [vmem:[%s11530_s4 + $0x20] sm:$0xff]  ;;  %v3753_v58 = vsel %vm1685_vm6, %v3738_v53, %v10034_v37 }
 0x288   : > { %3700 = vmatpush.msrb.mxu2 %v9784_v4  ;;  %3720 = vmatpush.msrb.mxu3 %v9796_v51  ;;  %v3742_v44 = vpop.permute.xlu0 %3741  ;;  %v11783_v4 = vld [vmem:[#allocation36_spill] sm:$0xff]  ;;  %v3759_v47 = vmul.f32 %v3753_v58, %v11785_v14 }
 0x289   : > { %3680 = vmatpush.msrb.mxu1 %v9782_v25  ;;  %v3752_v54 = vsel %vm1685_vm6, %v10034_v37, %v3742_v44  ;;  %v11784_v25 = vld [vmem:[#allocation37_spill] sm:$0xff]  ;;  %v3751_v59 = vsel %vm1685_vm6, %v3742_v44, %v10068_v1 }
 0x28a   : > { %v3945_v2 = vpop.permute.xlu1 %3944  ;;  %v3760_v51 = vmul.f32 %v3752_v54, %v11783_v4  ;;  %v10110_v12 = vpop.permute.xlu2 %4147  ;;  %v3758_v42 = vmul.f32 %v3754_v10, %v11784_v25  ;;  %v3761_v54 = vmul.f32 %v3751_v59, %v11788_v6  ;;  %v11789_v44 = vld [vmem:[#allocation45_spill] sm:$0xff] }
 0x28b   : > { %v3957_v28 = vsel %vm1957_vm7, %v3945_v2, %v10087_v22 }
 0x28c   : > { %v3965_v10 = vmul.f32 %v3957_v28, %v11789_v44  ;;  %v11794_v44 = vld [vmem:[#allocation44_spill] sm:$0xff] }
 0x28d   : > { %8482 = vmatmul.msk.f32.vlgmr.msrb.gmra.mxu0 %vm2823_vm10, %v8477_v20  ;;  %8488 = vmatmul.msk.f32.vlgmr.msra.gmra.mxu1 %vm2823_vm10, %v8486_v8  ;;  %v3755_v20 = vsel %vm1685_vm6, %v10050_v16, %v3736_v7  ;;  %v11787_v7 = vld [vmem:[#allocation40_spill] sm:$0xff] }
 0x28e   : > { %8489 = vmatmul.msk.f32.vlgmr.msra.gmra.mxu2 %vm2823_vm10, %v8486_v8  ;;  %8490 = vmatmul.msk.f32.vlgmr.msra.gmra.mxu3 %vm2823_vm10, %v8486_v8  ;;  %v3757_v24 = vmul.f32 %v3755_v20, %v11786_v32 }
 0x28f   : > { %3660 = vmatpush.msrb.mxu0 %v9794_v13  ;;  %3805 = vmatpush.msra.mxu1 %v3758_v42 }
 0x290   : > { %3825 = vmatpush.msra.mxu2 %v3759_v47  ;;  %3845 = vmatpush.msra.mxu3 %v3760_v51  ;;  %v3943_v37 = vpop.permute.xlu0 %3942 }
 0x292   : > { %v10119_v53 = vpop.permute.xlu1 %3938  ;;  %v3951_v30 = vpop.permute.xlu2 %3950 }
 0x295   : > { %8487 = vmatmul.msk.f32.vlgmr.msra.gmra.mxu0 %vm2823_vm10, %v8486_v8  ;;  %8492 = vmatmul.msk.f32.vlgmr.msrb.gmra.mxu1 %vm2823_vm10, %v8486_v8 }
 0x296   : > { %8493 = vmatmul.msk.f32.vlgmr.msrb.gmra.mxu2 %vm2823_vm10, %v8486_v8  ;;  %8494 = vmatmul.msk.f32.vlgmr.msrb.gmra.mxu3 %vm2823_vm10, %v8486_v8 }
 0x297   : > { %3785 = vmatpush.msra.mxu0 %v3757_v24  ;;  %v11790_v24 = vld [vmem:[#allocation43_spill] sm:$0xff] }
 0x298   : > { %v3941_v13 = vpop.permute.xlu0 %3940 }
 0x299   : > { %v3959_v51 = vsel %vm1957_vm7, %v3941_v13, %v3943_v37  ;;  %v3960_v20 = vsel %vm1957_vm7, %v10119_v53, %v3941_v13  ;;  %v11795_v13 = vld [vmem:[#allocation41_spill] sm:$0xff] }
 0x29a   : > { %v3748_v40 = vpop.permute.xlu1 %3747  ;;  %v3963_v6 = vmul.f32 %v3959_v51, %v11794_v44 }
 0x29b   : > { %v3756_v56 = vsel %vm1685_vm6, %v3748_v40, %v10050_v16  ;;  %v10148_v16 = vpop.permute.xlu2 %4145 }
 0x29c   : > { %v3764_v26 = vmul.f32 %v3756_v56, %v11787_v7  ;;  %v11791_v56 = vld [vmem:[#allocation38_spill] sm:$0xff]  ;;  %v4164_v51 = vsel %vm2229_vm8, %v10148_v16, %v10110_v12 }
 0x29d   : > { %8491 = vmatmul.msk.f32.vlgmr.msrb.gmra.mxu0 %vm2823_vm10, %v8486_v8  ;;  %8497 = vmatmul.msk.f32.vlgmr.msra.gmra.mxu1 %vm2823_vm10, %v8495_v55 }
 0x29e   : > { %8498 = vmatmul.msk.f32.vlgmr.msra.gmra.mxu2 %vm2823_vm10, %v8495_v55  ;;  %8499 = vmatmul.msk.f32.vlgmr.msra.gmra.mxu3 %vm2823_vm10, %v8495_v55 }
 0x29f   : > { %3865 = vmatpush.msrb.mxu0 %v3761_v54  ;;  %3925 = vmatpush.msrb.mxu3 %v3764_v26  ;;  %v3958_v54 = vsel %vm1957_vm7, %v3943_v37, %v3945_v2 }
 0x2a0   : > { %v3746_v58 = vpop.permute.xlu0 %3745 }
 0x2a1   : > { %4050 = vmatpush.msra.mxu3 %v3965_v10  ;;  %v3749_v8 = vsel %vm1685_vm6, %v3746_v58, %v3748_v40  ;;  %v3750_v42 = vsel %vm1685_vm6, %v10068_v1, %v3746_v58  ;;  %v11792_v40 = vld [vmem:[#allocation48_spill] sm:$0xff]  ;;  %v11793_v1 = vld [vmem:[#allocation46_spill] sm:$0xff] }
 0x2a2   : > { %v3949_v47 = vpop.permute.xlu1 %3948  ;;  %v3762_v59 = vmul.f32 %v3750_v42, %v11790_v24  ;;  %v3763_v28 = vmul.f32 %v3749_v8, %v11791_v56  ;;  %v3962_v58 = vmul.f32 %v3960_v20, %v11793_v1  ;;  %v3964_v8 = vmul.f32 %v3958_v54, %v11795_v13 }
 0x2a3   : > { %v3955_v26 = vsel %vm1957_vm7, %v3949_v47, %v3951_v30  ;;  %v3956_v42 = vsel %vm1957_vm7, %v10087_v22, %v3949_v47  ;;  %v4158_v20 = vpop.permute.xlu2 %4157 }
 0x2a4   : > { %v3967_v10 = vmul.f32 %v3955_v26, %v11792_v40  ;;  %3885 = vmatpush.msrb.mxu1 %v3762_v59  ;;  %3905 = vmatpush.msrb.mxu2 %v3763_v28  ;;  %v8504_v59 = vld [vmem:[%s11530_s4 + $0x30] sm:$0xff]  ;;  %v11796_v28 = vld [vmem:[#allocation53_spill] sm:$0xff]  ;;  %v11797_v26 = vld [vmem:[#allocation50_spill] sm:$0xff] }
 0x2a5   : > { %8496 = vmatmul.msk.f32.vlgmr.msra.gmra.mxu0 %vm2823_vm10, %v8495_v55  ;;  %8501 = vmatmul.msk.f32.vlgmr.msrb.gmra.mxu1 %vm2823_vm10, %v8495_v55  ;;  %v3966_v54 = vmul.f32 %v3956_v42, %v11797_v26  ;;  %v11801_v26 = vld [vmem:[#allocation51_spill] sm:$0xff] }
 0x2a6   : > { %8502 = vmatmul.msk.f32.vlgmr.msrb.gmra.mxu2 %vm2823_vm10, %v8495_v55  ;;  %8503 = vmatmul.msk.f32.vlgmr.msrb.gmra.mxu3 %vm2823_vm10, %v8495_v55 }
 0x2a7   : > { %3990 = vmatpush.msra.mxu0 %v3962_v58  ;;  %4010 = vmatpush.msra.mxu1 %v3963_v6  ;;  %v4168_v6 = vmul.f32 %v4164_v51, %v11796_v28  ;;  %v11798_v51 = vld [vmem:[#allocation49_spill] sm:$0xff] }
 0x2a8   : > { %4030 = vmatpush.msra.mxu2 %v3964_v8  ;;  %v4150_v2 = vpop.permute.xlu0 %4149 }
 0x2a9   : > { %4090 = vmatpush.msrb.mxu1 %v3967_v10 }
 0x2aa   : > { %v4152_v37 = vpop.permute.xlu1 %4151 }
 0x2ab   : > { %v4162_v8 = vsel %vm2229_vm8, %v4150_v2, %v4152_v37  ;;  %v4355_v28 = vpop.permute.xlu2 %4354 }
 0x2ac   : > { %v4170_v44 = vmul.f32 %v4162_v8, %v11801_v26  ;;  %v10231_v26 = vpop.f32.mrf.mxu1 }
 0x2ad   : > { %8500 = vmatmul.msk.f32.vlgmr.msrb.gmra.mxu0 %vm2823_vm10, %v8495_v55  ;;  %8506 = vmatmul.msk.f32.vlgmr.msra.gmra.mxu1 %vm2823_vm10, %v8504_v59  ;;  %v4163_v55 = vsel %vm2229_vm8, %v10110_v12, %v4150_v2  ;;  %v4553_v12 = vld [vmem:[%s11531_s5] sm:$0xff] }
 0x2ae   : > { %8507 = vmatmul.msk.f32.vlgmr.msra.gmra.mxu2 %vm2823_vm10, %v8504_v59  ;;  %8508 = vmatmul.msk.f32.vlgmr.msra.gmra.mxu3 %vm2823_vm10, %v8504_v59 }
 0x2af   : > { %4070 = vmatpush.msrb.mxu0 %v3966_v54  ;;  %4215 = vmatpush.msra.mxu1 %v4168_v6  ;;  %v11799_v54 = vld [vmem:[#allocation47_spill] sm:$0xff] }
 0x2b0   : > { %v3953_v22 = vpop.permute.xlu0 %3952  ;;  %4556 = vperm.xlu0 %8713, %v4553_v12   ;;  %v11804_v12 = vld [vmem:[#allocation55_spill] sm:$0xff] }
 0x2b1   : > { %v3954_v47 = vsel %vm1957_vm7, %v3951_v30, %v3953_v22  ;;  %v3961_v10 = vsel %vm1957_vm7, %v3953_v22, %v10119_v53  ;;  %v11800_v30 = vld [vmem:[#allocation52_spill] sm:$0xff] }
 0x2b2   : > { %v4353_v58 = vpop.permute.xlu1 %4352  ;;  %v3968_v42 = vmul.f32 %v3954_v47, %v11798_v51  ;;  %v3969_v6 = vmul.f32 %v3961_v10, %v11799_v54  ;;  %v4169_v40 = vmul.f32 %v4163_v55, %v11800_v30  ;;  %v11802_v47 = vld [vmem:[#allocation54_spill] sm:$0xff]  ;;  %v11803_v55 = vld [vmem:[#allocation56_spill] sm:$0xff]  ;;  %v11809_v30 = vld [vmem:[#allocation59_spill] sm:$0xff] }
 0x2b4   : > { %4110 = vmatpush.msrb.mxu2 %v3968_v42  ;;  %4130 = vmatpush.msrb.mxu3 %v3969_v6  ;;  %v8513_v6 = vld [vmem:[%s11530_s4 + $0x38] sm:$0xff] }
 0x2b5   : > { %8505 = vmatmul.msk.f32.vlgmr.msra.gmra.mxu0 %vm2823_vm10, %v8504_v59  ;;  %8510 = vmatmul.msk.f32.vlgmr.msrb.gmra.mxu1 %vm2823_vm10, %v8504_v59 }
 0x2b6   : > { %8511 = vmatmul.msk.f32.vlgmr.msrb.gmra.mxu2 %vm2823_vm10, %v8504_v59  ;;  %8512 = vmatmul.msk.f32.vlgmr.msrb.gmra.mxu3 %vm2823_vm10, %v8504_v59 }
 0x2b7   : > { %4235 = vmatpush.msra.mxu2 %v4169_v40  ;;  %4255 = vmatpush.msra.mxu3 %v4170_v44  ;;  %v4368_v44 = vsel %vm2501_vm9, %v4353_v58, %v4355_v28 }
 0x2b9   : > { %v4144_v53 = vpop.permute.xlu0 %4143 }
 0x2ba   : > { %v4165_v2 = vsel %vm2229_vm8, %v4144_v53, %v10148_v16  ;;  %v4166_v22 = vsel %vm2229_vm8, %v4158_v20, %v4144_v53  ;;  %v11805_v53 = vld [vmem:[#allocation60_spill] sm:$0xff] }
 0x2bb   : > { %v4167_v10 = vmul.f32 %v4165_v2, %v11802_v47  ;;  %v4174_v8 = vmul.f32 %v4166_v22, %v11803_v55  ;;  %v4156_v42 = vpop.permute.xlu1 %4155  ;;  %v4374_v2 = vmul.f32 %v4368_v44, %v11805_v53  ;;  %v4349_v22 = vpop.permute.xlu2 %4348 }
 0x2bc   : > { %v4159_v40 = vsel %vm2229_vm8, %v4156_v42, %v4158_v20 }
 0x2bd   : > { %v4173_v16 = vmul.f32 %v4159_v40, %v11804_v12  ;;  %4195 = vmatpush.msra.mxu0 %v4167_v10  ;;  %4335 = vmatpush.msrb.mxu3 %v4174_v8  ;;  %v11806_v10 = vld [vmem:[#allocation57_spill] sm:$0xff]  ;;  %v11807_v40 = vld [vmem:[#allocation58_spill] sm:$0xff] }
 0x2be   : > { %8509 = vmatmul.msk.f32.vlgmr.msrb.gmra.mxu0 %vm2823_vm10, %v8504_v59  ;;  %8515 = vmatmul.msk.f32.vlgmr.msra.gmra.mxu1 %vm2823_vm10, %v8513_v6 }
 0x2bf   : > { %8516 = vmatmul.msk.f32.vlgmr.msra.gmra.mxu2 %vm2823_vm10, %v8513_v6  ;;  %8517 = vmatmul.msk.f32.vlgmr.msra.gmra.mxu3 %vm2823_vm10, %v8513_v6 }
 0x2c0   : > { %4315 = vmatpush.msrb.mxu2 %v4173_v16 }
 0x2c1   : > { %v4154_v55 = vpop.permute.xlu0 %4153 }
 0x2c2   : > { %4440 = vmatpush.msra.mxu2 %v4374_v2  ;;  %v4160_v20 = vsel %vm2229_vm8, %v4154_v55, %v4156_v42  ;;  %v4161_v59 = vsel %vm2229_vm8, %v4152_v37, %v4154_v55  ;;  %v11808_v2 = vld [vmem:[#allocation62_spill] sm:$0xff] }
 0x2c3   : > { %v4171_v8 = vmul.f32 %v4161_v59, %v11806_v10  ;;  %v4172_v44 = vmul.f32 %v4160_v20, %v11807_v40  ;;  %v4351_v53 = vpop.permute.xlu1 %4350  ;;  %v4359_v37 = vpop.permute.xlu2 %4358 }
 0x2c4   : > { %v4369_v12 = vsel %vm2501_vm9, %v4351_v53, %v4353_v58  ;;  %v4370_v16 = vsel %vm2501_vm9, %v4349_v22, %v4351_v53  ;;  %v11810_v53 = vld [vmem:[#allocation61_spill] sm:$0xff] }
 0x2c5   : > { %v4372_v47 = vmul.f32 %v4370_v16, %v11808_v2  ;;  %v4373_v54 = vmul.f32 %v4369_v12, %v11809_v30  ;;  %4275 = vmatpush.msrb.mxu0 %v4171_v8  ;;  %4295 = vmatpush.msrb.mxu1 %v4172_v44  ;;  %v10253_v12 = vpop.f32.mrf.mxu0  ;;  %v10264_v2 = vpop.f32.mrf.mxu3 }
 0x2c6   : > { %8514 = vmatmul.msk.f32.vlgmr.msra.gmra.mxu0 %vm2823_vm10, %v8513_v6  ;;  %8519 = vmatmul.msk.f32.vlgmr.msrb.gmra.mxu1 %vm2823_vm10, %v8513_v6  ;;  %v10266_v30 = vpop.f32.mrf.mxu2 }
 0x2c7   : > { %8520 = vmatmul.msk.f32.vlgmr.msrb.gmra.mxu2 %vm2823_vm10, %v8513_v6  ;;  %8521 = vmatmul.msk.f32.vlgmr.msrb.gmra.mxu3 %vm2823_vm10, %v8513_v6 }
 0x2c8   : > { %4400 = vmatpush.msra.mxu0 %v4372_v47  ;;  %4420 = vmatpush.msra.mxu1 %v4373_v54  ;;  %v8522_v47 = vld [vmem:[%s11530_s4 + $0x40] sm:$0xff] }
 0x2c9   : > { %v4357_v58 = vpop.permute.xlu0 %4356  ;;  %v11811_v54 = vld [vmem:[#allocation65_spill] sm:$0xff] }
 0x2ca   : > { %v4366_v55 = vsel %vm2501_vm9, %v4357_v58, %v4359_v37  ;;  %v4367_v42 = vsel %vm2501_vm9, %v4355_v28, %v4357_v58  ;;  %v10256_v8 = vpop.f32.mrf.mxu1  ;;  %v11812_v28 = vld [vmem:[#allocation63_spill] sm:$0xff] }
 0x2cb   : > { %v4375_v20 = vmul.f32 %v4367_v42, %v11810_v53  ;;  %v4363_v59 = vpop.permute.xlu1 %4362  ;;  %v4376_v44 = vmul.f32 %v4366_v55, %v11811_v54  ;;  %v11813_v54 = vld [vmem:[#allocation66_spill] sm:$0xff] }
 0x2cc   : > { %v4371_v16 = vsel %vm2501_vm9, %v4363_v59, %v4349_v22 }
 0x2cd   : > { %v4379_v58 = vmul.f32 %v4371_v16, %v11812_v28  ;;  %4460 = vmatpush.msra.mxu3 %v4375_v20  ;;  %v11814_v20 = vld [vmem:[#allocation64_spill] sm:$0xff]  ;;  %v10279_v53 = vpop.f32.mrf.mxu0 }
 0x2ce   : > { %8518 = vmatmul.msk.f32.vlgmr.msrb.gmra.mxu0 %vm2823_vm10, %v8513_v6  ;;  %8524 = vmatmul.msk.f32.vlgmr.msra.gmra.mxu1 %vm2823_vm10, %v8522_v47 }
 0x2cf   : > { %8525 = vmatmul.msk.f32.vlgmr.msra.gmra.mxu2 %vm2823_vm10, %v8522_v47  ;;  %8526 = vmatmul.msk.f32.vlgmr.msra.gmra.mxu3 %vm2823_vm10, %v8522_v47 }
 0x2d0   : > { %4480 = vmatpush.msrb.mxu0 %v4376_v44  ;;  %4540 = vmatpush.msrb.mxu3 %v4379_v58  ;;  %v10283_v44 = vpop.f32.mrf.mxu3  ;;  %v10285_v58 = vpop.f32.mrf.mxu2 }
 0x2d1   : > { %v4361_v55 = vpop.permute.xlu0 %4360 }
 0x2d2   : > { %v4364_v22 = vsel %vm2501_vm9, %v4361_v55, %v4363_v59  ;;  %v4365_v42 = vsel %vm2501_vm9, %v4359_v37, %v4361_v55  ;;  %v3027_v6 = vpop.f32.mrf.mxu1 }
 0x2d3   : > { %v4377_v16 = vmul.f32 %v4365_v42, %v11813_v54  ;;  %v4378_v28 = vmul.f32 %v4364_v22, %v11814_v20  ;;  %v3028_v38 = vadd.f32 %v3027_v6, %v10231_v26 }
 0x2d5   : > { %4500 = vmatpush.msrb.mxu1 %v4377_v16  ;;  %4520 = vmatpush.msrb.mxu2 %v4378_v28 }
 0x2d6   : > { %8523 = vmatmul.msk.f32.vlgmr.msra.gmra.mxu0 %vm2823_vm10, %v8522_v47  ;;  %8528 = vmatmul.msk.f32.vlgmr.msrb.gmra.mxu1 %vm2823_vm10, %v8522_v47 }
 0x2d7   : > { %8529 = vmatmul.msk.f32.vlgmr.msrb.gmra.mxu2 %vm2823_vm10, %v8522_v47  ;;  %8530 = vmatmul.msk.f32.vlgmr.msrb.gmra.mxu3 %vm2823_vm10, %v8522_v47 }
 0x2d8   : > { %v3067_v55 = vpop.f32.mrf.mxu3  ;;  %v3047_v22 = vpop.f32.mrf.mxu2 }
 0x2da   : > { %v3107_v37 = vpop.f32.mrf.mxu1 }
 0x2dc   : > { %v10290_v59 = vpop.f32.mrf.mxu0 }
 0x2de   : > { %8527 = vmatmul.msk.f32.vlgmr.msrb.gmra.mxu0 %vm2823_vm10, %v8522_v47 }
 0x2e3   : > { %v3224_v28 = vpop.f32.mrf.mxu1 }
 0x2e4   : > { %v3348_v9 = vadd.f32 %v3224_v28, %v3028_v38 }
 0x2e5   : > { %v10292_v42 = vpop.f32.mrf.mxu0 }
 0x2e8   : > { %v10294_v16 = vpop.f32.mrf.mxu2  ;;  %v10296_v20 = vpop.f32.mrf.mxu3 }
 0x2eb   : > { %v3304_v54 = vpop.f32.mrf.mxu1 }
 0x2f0   : > { %v3244_v40 = vpop.f32.mrf.mxu2  ;;  %v3264_v10 = vpop.f32.mrf.mxu3 }
 0x2f2   : > { %v10298_v51 = vpop.f32.mrf.mxu0 }
 0x2f4   : > { %v3429_v47 = vpop.f32.mrf.mxu1 }
 0x2f5   : > { %v3553_v0 = vadd.f32 %v3429_v47, %v3348_v9 }
 0x2f8   : > { %v10300_v1 = vpop.f32.mrf.mxu2 }
 0x2f9   : > { %v10302_v13 = vpop.f32.mrf.mxu3 }
 0x2fa   : > { %11815 = vst [vmem:[#allocation74_spill] sm:$0xff] %v10302_v13  ;;  %v10304_v24 = vpop.f32.mrf.mxu0 }
 0x300   : > { %v3449_v7 = vpop.f32.mrf.mxu2 }
 0x301   : > { %v3469_v56 = vpop.f32.mrf.mxu3 }
 0x302   : > { %v10306_v32 = vpop.f32.mrf.mxu0  ;;  %v3509_v25 = vpop.f32.mrf.mxu1 }
 0x309   : > { %v10308_v14 = vpop.f32.mrf.mxu2  ;;  %v10310_v4 = vpop.f32.mrf.mxu3 }
 0x30a   : > { %11816 = vst [vmem:[#allocation67_spill] sm:$0xff] %v10310_v4  ;;  %v10312_v33 = vpop.f32.mrf.mxu0  ;;  %v3602_v57 = vpop.f32.mrf.mxu1 }
 0x30b   : > { %v3726_v63 = vadd.f32 %v3602_v57, %v3553_v0 }
 0x311   : > { %v3622_v60 = vpop.f32.mrf.mxu2  ;;  %v3642_v62 = vpop.f32.mrf.mxu3 }
 0x312   : > { %v10314_v52 = vpop.f32.mrf.mxu0  ;;  %v3682_v45 = vpop.f32.mrf.mxu1 }
 0x319   : > { %v10316_v29 = vpop.f32.mrf.mxu2  ;;  %v10318_v34 = vpop.f32.mrf.mxu3 }
 0x31a   : > { %11817 = vst [vmem:[#allocation69_spill] sm:$0xff] %v10318_v34  ;;  %v10320_v39 = vpop.f32.mrf.mxu0  ;;  %v3807_v27 = vpop.f32.mrf.mxu1  ;;  %v3108_v34 = vadd.f32 %v3107_v37, %v10256_v8 }
 0x31b   : > { %v3931_v4 = vadd.f32 %v3807_v27, %v3726_v63 }
 0x321   : > { %v3827_v46 = vpop.f32.mrf.mxu2  ;;  %v3847_v36 = vpop.f32.mrf.mxu3 }
 0x322   : > { %v10322_v3 = vpop.f32.mrf.mxu0  ;;  %v3887_v11 = vpop.f32.mrf.mxu1 }
 0x323   : > { %11818 = vst [vmem:[#allocation68_spill] sm:$0xff] %v10322_v3  ;;  %v10346_v57 = vpop.permute.xlu0 %4556 }
 0x329   : > { %v10324_v48 = vpop.f32.mrf.mxu2  ;;  %v10326_v19 = vpop.f32.mrf.mxu3 }
 0x32a   : > { %11819 = vst [vmem:[#allocation71_spill] sm:$0xff] %v10326_v19  ;;  %v10328_v17 = vpop.f32.mrf.mxu0  ;;  %v4012_v43 = vpop.f32.mrf.mxu1  ;;  %v3068_v19 = vadd.f32 %v3067_v55, %v10264_v2 }
 0x32b   : > { %11820 = vst [vmem:[#allocation70_spill] sm:$0xff] %v10328_v17  ;;  %v4136_v17 = vadd.f32 %v4012_v43, %v3931_v4 }
 0x331   : > { %v4032_v49 = vpop.f32.mrf.mxu2  ;;  %v4052_v15 = vpop.f32.mrf.mxu3 }
 0x332   : > { %v10330_v41 = vpop.f32.mrf.mxu0  ;;  %v4092_v50 = vpop.f32.mrf.mxu1 }
 0x333   : > { %11821 = vst [vmem:[#allocation73_spill] sm:$0xff] %v10330_v41  ;;  %v3350_v41 = vadd.f32 %v3264_v10, %v3068_v19 }
 0x335   : > { %v3555_v3 = vadd.f32 %v3469_v56, %v3350_v41 }
 0x337   : > { %v3728_v28 = vadd.f32 %v3642_v62, %v3555_v3  ;;  %v3128_v62 = vadd.f32 %v10294_v16, %v10285_v58  ;;  %v3008_v58 = vadd.f32 %v10290_v59, %v10253_v12 }
 0x339   : > { %v10332_v35 = vpop.f32.mrf.mxu2  ;;  %v10334_v31 = vpop.f32.mrf.mxu3  ;;  %v3933_v19 = vadd.f32 %v3847_v36, %v3728_v28 }
 0x33a   : > { %11822 = vst [vmem:[#allocation72_spill] sm:$0xff] %v10334_v31  ;;  %v3352_v31 = vadd.f32 %v3304_v54, %v3108_v34 }
 0x33b   : > { %v4217_v18 = vpop.f32.mrf.mxu1  ;;  %v10336_v61 = vpop.f32.mrf.mxu0  ;;  %v4138_v41 = vadd.f32 %v4052_v15, %v3933_v19  ;;  %v11830_v19 = vld [vmem:[#allocation69_spill] sm:$0xff] }
 0x33c   : > { %11823 = vst [vmem:[#allocation75_spill] sm:$0xff] %v10336_v61  ;;  %v3048_v61 = vadd.f32 %v3047_v22, %v10266_v30  ;;  %v3557_v26 = vadd.f32 %v3509_v25, %v3352_v31  ;;  %v4341_v38 = vadd.f32 %v4217_v18, %v4136_v17 }
 0x33e   : > { %v3349_v2 = vadd.f32 %v3244_v40, %v3048_v61  ;;  %v3730_v8 = vadd.f32 %v3682_v45, %v3557_v26  ;;  %v11825_v26 = vld [vmem:[#allocation70_spill] sm:$0xff] }
 0x340   : > { %v3554_v27 = vadd.f32 %v3449_v7, %v3349_v2  ;;  %v3935_v10 = vadd.f32 %v3887_v11, %v3730_v8 }
 0x342   : > { %v4237_v23 = vpop.f32.mrf.mxu2  ;;  %v4257_v5 = vpop.f32.mrf.mxu3  ;;  %v3727_v34 = vadd.f32 %v3622_v60, %v3554_v27  ;;  %v4140_v4 = vadd.f32 %v4092_v50, %v3935_v10  ;;  %v3353_v50 = vadd.f32 %v10300_v1, %v3128_v62 }
 0x343   : > { %v4297_v21 = vpop.f32.mrf.mxu1  ;;  %v10341_v13 = vpop.f32.mrf.mxu0  ;;  %v4343_v18 = vadd.f32 %v4257_v5, %v4138_v41 }
 0x344   : > { %v3932_v3 = vadd.f32 %v3827_v46, %v3727_v34  ;;  %v4345_v25 = vadd.f32 %v4297_v21, %v4140_v4  ;;  %v3558_v7 = vadd.f32 %v10308_v14, %v3353_v50  ;;  %v11831_v34 = vld [vmem:[#allocation71_spill] sm:$0xff] }
 0x346   : > { %v4137_v45 = vadd.f32 %v4032_v49, %v3932_v3  ;;  %v3731_v56 = vadd.f32 %v10316_v29, %v3558_v7  ;;  %v3088_v49 = vadd.f32 %v10292_v42, %v10279_v53  ;;  %v3347_v29 = vadd.f32 %v10298_v51, %v3008_v58  ;;  %v11824_v51 = vld [vmem:[#allocation68_spill] sm:$0xff] }
 0x348   : > { %v4342_v46 = vadd.f32 %v4237_v23, %v4137_v45  ;;  %v3936_v1 = vadd.f32 %v10324_v48, %v3731_v56  ;;  %v3351_v14 = vadd.f32 %v10304_v24, %v3088_v49  ;;  %v3552_v48 = vadd.f32 %v10306_v32, %v3347_v29 }
 0x349   : > { %v3148_v24 = vadd.f32 %v10296_v20, %v10283_v44 }
 0x34a   : > { %v4317_v9 = vpop.f32.mrf.mxu2  ;;  %v10344_v6 = vpop.f32.mrf.mxu3  ;;  %v4141_v12 = vadd.f32 %v10332_v35, %v3936_v1  ;;  %v3556_v59 = vadd.f32 %v10312_v33, %v3351_v14  ;;  %v3725_v22 = vadd.f32 %v10314_v52, %v3552_v48  ;;  %v11826_v52 = vld [vmem:[#allocation74_spill] sm:$0xff]  ;;  %v11827_v33 = vld [vmem:[#allocation73_spill] sm:$0xff]  ;;  %v11835_v14 = vld [vmem:[#allocation3_spill] sm:$0xff] }
 0x34b   : > { %v4422_v0 = vpop.f32.mrf.mxu1  ;;  %v4277_v17 = vpop.f32.mrf.mxu0 }
 0x34c   : > { %v4546_v63 = vadd.f32 %v4422_v0, %v4341_v38  ;;  %v4346_v55 = vadd.f32 %v4317_v9, %v4141_v12  ;;  %v3729_v42 = vadd.f32 %v10320_v39, %v3556_v59  ;;  %v3930_v35 = vadd.f32 %v11824_v51, %v3725_v22  ;;  %v11828_v9 = vld [vmem:[#allocation75_spill] sm:$0xff] }
 0x34d   : > { %v3354_v39 = vadd.f32 %v11826_v52, %v3148_v24  ;;  %v11829_v0 = vld [vmem:[#allocation67_spill] sm:$0xff] }
 0x34e   : > { %v4560_v43 = vadd.f32 %v10346_v57, %v4546_v63  ;;  %v3934_v38 = vadd.f32 %v11825_v26, %v3729_v42  ;;  %v4135_v32 = vadd.f32 %v11827_v33, %v3930_v35  ;;  %v11837_v42 = vld [vmem:[#allocation10_spill] sm:$0xff] }
 0x34f   : > { %v3559_v2 = vadd.f32 %v11829_v0, %v3354_v39  ;;  %v11840_v0 = vld [vmem:[#allocation7_spill] sm:$0xff] }
 0x350   : > { %v10349_v31 = vmax.f32 %v4560_v43, 0.0  ;;  %v4139_v28 = vadd.f32 %v11828_v9, %v3934_v38  ;;  %v4340_v8 = vadd.f32 %v10341_v13, %v4135_v32  ;;  %v11838_v32 = vld [vmem:[#allocation9_spill] sm:$0xff] }
 0x351   : > { %v3732_v27 = vadd.f32 %v11830_v19, %v3559_v2 }
 0x352   : > { %v4462_v61 = vpop.f32.mrf.mxu3  ;;  %4577 = vrot.lane.b32.xlu0 %v10349_v31, %s8723_s19  ;;  %4610 = vrot.lane.b32.xlu1 %v10349_v31, %s8724_s20  ;;  %v4442_v11 = vpop.f32.mrf.mxu2  ;;  %v4344_v63 = vadd.f32 %v4277_v17, %v4139_v28  ;;  %v11839_v28 = vld [vmem:[#allocation8_spill] sm:$0xff] }
 0x353   : > { %v4548_v15 = vadd.f32 %v4462_v61, %v4343_v18  ;;  %v4502_v36 = vpop.f32.mrf.mxu1  ;;  %v4547_v30 = vadd.f32 %v4442_v11, %v4342_v46  ;;  %v4402_v23 = vpop.f32.mrf.mxu0  ;;  %v3937_v4 = vadd.f32 %v11831_v34, %v3732_v27  ;;  %v11832_v18 = vld [vmem:[#allocation72_spill] sm:$0xff] }
 0x354   : > { %v4550_v5 = vadd.f32 %v4502_v36, %v4345_v25  ;;  %v4545_v10 = vadd.f32 %v4402_v23, %v4340_v8 }
 0x355   : > { %v4562_v60 = vadd.f32 %v10346_v57, %v4548_v15  ;;  %v4561_v53 = vadd.f32 %v10346_v57, %v4547_v30  ;;  %v4142_v13 = vadd.f32 %v11832_v18, %v3937_v4  ;;  %v10506_v30 = vld [vmem:[%s11532_s6 + $0x8] sm:$0xff] }
 0x356   : > { %v4564_v21 = vadd.f32 %v10346_v57, %v4550_v5  ;;  %v4559_v17 = vadd.f32 %v10346_v57, %v4545_v10 }
 0x357   : > { %v10364_v54 = vmax.f32 %v4562_v60, 0.0  ;;  %v10385_v16 = vmax.f32 %v4561_v53, 0.0  ;;  %v4347_v25 = vadd.f32 %v10344_v6, %v4142_v13  ;;  %v11836_v53 = vld [vmem:[#allocation5_spill] sm:$0xff]  ;;  %v11841_v13 = vld [vmem:[#allocation6_spill] sm:$0xff] }
 0x358   : > { %v10362_v40 = vmax.f32 %v4564_v21, 0.0  ;;  %v10417_v61 = vmax.f32 %v4559_v17, 0.0  ;;  %v11834_v21 = vld [vmem:[#allocation4_spill] sm:$0xff] }
 0x35a   : > { %4585 = vrot.lane.b32.xlu2 %v10362_v40, %s8723_s19  ;;  %4970 = vrot.lane.b32.xlu0 %v10349_v31, %s8725_s21  ;;  %v4522_v37 = vpop.f32.mrf.mxu2  ;;  %v4542_v3 = vpop.f32.mrf.mxu3 }
 0x35b   : > { %4614 = vrot.lane.b32.xlu1 %v10364_v54, %s8724_s20  ;;  %v4551_v47 = vadd.f32 %v4522_v37, %v4346_v55  ;;  %v4482_v44 = vpop.f32.mrf.mxu0  ;;  %v4552_v11 = vadd.f32 %v4542_v3, %v4347_v25  ;;  %v11843_v25 = vld [vmem:[#allocation19_spill] sm:$0xff] }
 0x35c   : > { %v4549_v41 = vadd.f32 %v4482_v44, %v4344_v63 }
 0x35d   : > { %v4565_v20 = vadd.f32 %v10346_v57, %v4551_v47  ;;  %v4566_v36 = vadd.f32 %v10346_v57, %v4552_v11 }
 0x35e   : > { %v4563_v62 = vadd.f32 %v10346_v57, %v4549_v41 }
 0x35f   : > { %v10404_v43 = vmax.f32 %v4565_v20, 0.0  ;;  %v10428_v50 = vmax.f32 %v4566_v36, 0.0  ;;  %v4607_v36 = vld [vmem:[%s11532_s6] sm:$0xff] }
 0x360   : > { %v10419_v15 = vmax.f32 %v4563_v62, 0.0  ;;  %v11842_v62 = vld [vmem:[#allocation11_spill] sm:$0xff] }
 0x362   : > { %4612 = vrot.lane.b32.xlu2 %v10385_v16, %s8724_s20  ;;  %4618 = vrot.lane.b32.xlu0 %v10362_v40, %s8724_s20 }
 0x363   : > { %4579 = vrot.lane.b32.xlu1 %v10385_v16, %s8723_s19 }
 0x36a   : > { %4581 = vrot.lane.b32.xlu2 %v10364_v54, %s8723_s19  ;;  %4587 = vrot.lane.b32.xlu0 %v10404_v43, %s8723_s19 }
 0x36b   : > { %4972 = vrot.lane.b32.xlu1 %v10385_v16, %s8725_s21 }
 0x372   : > { %4616 = vrot.lane.b32.xlu0 %v10419_v15, %s8724_s20  ;;  %4608 = vrot.lane.b32.xlu2 %v10417_v61, %s8724_s20 }
 0x373   : > { %4575 = vrot.lane.b32.xlu1 %v10417_v61, %s8723_s19 }
 0x37a   : > { %4968 = vrot.lane.b32.xlu0 %v10417_v61, %s8725_s21  ;;  %4622 = vrot.lane.b32.xlu2 %v10428_v50, %s8724_s20 }
 0x37b   : > { %4620 = vrot.lane.b32.xlu1 %v10404_v43, %s8724_s20 }
 0x382   : > { %4982 = vrot.lane.b32.xlu0 %v10428_v50, %s8725_s21  ;;  %4974 = vrot.lane.b32.xlu2 %v10364_v54, %s8725_s21 }
 0x383   : > { %4589 = vrot.lane.b32.xlu1 %v10428_v50, %s8723_s19 }
 0x38a   : > { %5177 = vrot.lane.b32.xlu0 %v10385_v16, %s8726_s22  ;;  %4980 = vrot.lane.b32.xlu2 %v10404_v43, %s8725_s21 }
 0x38b   : > { %4978 = vrot.lane.b32.xlu1 %v10362_v40, %s8725_s21 }
 0x392   : > { %5183 = vrot.lane.b32.xlu0 %v10362_v40, %s8726_s22  ;;  %4583 = vrot.lane.b32.xlu2 %v10419_v15, %s8723_s19 }
 0x393   : > { %5179 = vrot.lane.b32.xlu1 %v10364_v54, %s8726_s22 }
 0x39a   : > { %5563 = vrot.lane.b32.xlu0 %v10404_v43, %s8727_s23  ;;  %5175 = vrot.lane.b32.xlu2 %v10349_v31, %s8726_s22 }
 0x39b   : > { %5185 = vrot.lane.b32.xlu1 %v10404_v43, %s8726_s22 }
 0x3a2   : > { %5181 = vrot.lane.b32.xlu0 %v10419_v15, %s8726_s22  ;;  %5173 = vrot.lane.b32.xlu2 %v10417_v61, %s8726_s22 }
 0x3a3   : > { %4976 = vrot.lane.b32.xlu1 %v10419_v15, %s8725_s21 }
 0x3aa   : > { %5760 = vrot.lane.b32.xlu0 %v10385_v16, %s8728_s24  ;;  %5187 = vrot.lane.b32.xlu2 %v10428_v50, %s8726_s22 }
 0x3ab   : > { %5555 = vrot.lane.b32.xlu1 %v10385_v16, %s8727_s23 }
 0x3b2   : > { %5559 = vrot.lane.b32.xlu0 %v10419_v15, %s8727_s23  ;;  %5557 = vrot.lane.b32.xlu2 %v10364_v54, %s8727_s23 }
 0x3b3   : > { %5551 = vrot.lane.b32.xlu1 %v10417_v61, %s8727_s23 }
 0x3b4   : > { %v10478_v6 = vpop.permute.xlu2 %4585 }
 0x3ba   : > { %5756 = vrot.lane.b32.xlu0 %v10417_v61, %s8728_s24  ;;  %5553 = vrot.lane.b32.xlu2 %v10349_v31, %s8727_s23 }
 0x3bb   : > { %5565 = vrot.lane.b32.xlu1 %v10428_v50, %s8727_s23 }
 0x3bc   : > { %v4613_v57 = vpop.permute.xlu2 %4612 }
 0x3c2   : > { %5770 = vrot.lane.b32.xlu0 %v10428_v50, %s8728_s24  ;;  %5561 = vrot.lane.b32.xlu2 %v10362_v40, %s8727_s23 }
 0x3c3   : > { %5762 = vrot.lane.b32.xlu1 %v10364_v54, %s8728_s24 }
 0x3c4   : > { %v10492_v45 = vpop.permute.xlu2 %4581  ;;  %v10494_v5 = vpop.permute.xlu0 %4577 }
 0x3c5   : > { %v4611_v60 = vpop.permute.xlu1 %4610 }
 0x3c6   : > { %v4629_v46 = vsel %vm484_vm0, %v4611_v60, %v4613_v57 }
 0x3c7   : > { %v4634_v56 = vmul.f32 %v4629_v46, %v11834_v21 }
 0x3c9   : > { %4700 = vmatpush.msra.mxu2 %v4634_v56  ;;  %v11845_v56 = vld [vmem:[#allocation13_spill] sm:$0xff] }
 0x3ca   : > { %5967 = vrot.lane.b32.xlu0 %v10364_v54, %s8729_s27  ;;  %5768 = vrot.lane.b32.xlu2 %v10404_v43, %s8728_s24 }
 0x3cb   : > { %5758 = vrot.lane.b32.xlu1 %v10349_v31, %s8728_s24  ;;  %8534 = vmatmul.msk.f32.vlgmr.msra.gmra.mxu2 %vm2823_vm10, %v10506_v30 }
 0x3cc   : > { %v10512_v58 = vpop.permute.xlu0 %4970  ;;  %v4609_v49 = vpop.permute.xlu2 %4608 }
 0x3cd   : > { %v4615_v1 = vpop.permute.xlu1 %4614  ;;  %v4630_v23 = vsel %vm484_vm0, %v4609_v49, %v4611_v60  ;;  %v11844_v60 = vld [vmem:[#allocation21_spill] sm:$0xff] }
 0x3ce   : > { %v4628_v29 = vsel %vm484_vm0, %v4613_v57, %v4615_v1  ;;  %v4633_v12 = vmul.f32 %v4630_v23, %v11835_v14  ;;  %v6371_v23 = vld [vmem:[%s11533_s7] sm:$0xff] }
 0x3cf   : > { %v4635_v37 = vmul.f32 %v4628_v29, %v11836_v53 }
 0x3d0   : > { %4680 = vmatpush.msra.mxu1 %v4633_v12 }
 0x3d1   : > { %4720 = vmatpush.msra.mxu3 %v4635_v37  ;;  %8533 = vmatmul.msk.f32.vlgmr.msra.gmra.mxu1 %vm2823_vm10, %v10506_v30 }
 0x3d2   : > { %5963 = vrot.lane.b32.xlu0 %v10349_v31, %s8729_s27  ;;  %5764 = vrot.lane.b32.xlu2 %v10419_v15, %s8728_s24 }
 0x3d3   : > { %5766 = vrot.lane.b32.xlu1 %v10362_v40, %s8728_s24  ;;  %8535 = vmatmul.msk.f32.vlgmr.msra.gmra.mxu3 %vm2823_vm10, %v10506_v30 }
 0x3d4   : > { %v4619_v48 = vpop.permute.xlu0 %4618  ;;  %v4623_v59 = vpop.permute.xlu2 %4622 }
 0x3d5   : > { %v4580_v55 = vpop.permute.xlu1 %4579  ;;  %v4631_v22 = vsel %vm484_vm0, %v4623_v59, %v4609_v49  ;;  %v11846_v49 = vld [vmem:[#allocation14_spill] sm:$0xff] }
 0x3d6   : > { %v4632_v47 = vmul.f32 %v4631_v22, %v11837_v42  ;;  %v4595_v10 = vsel %vm409_vm2, %v4580_v55, %v10492_v45  ;;  %v4596_v18 = vsel %vm409_vm2, %v10494_v5, %v4580_v55  ;;  %v11848_v22 = vld [vmem:[#allocation15_spill] sm:$0xff] }
 0x3d8   : > { %4660 = vmatpush.msra.mxu0 %v4632_v47 }
 0x3d9   : > { %8532 = vmatmul.msk.f32.vlgmr.msra.gmra.mxu0 %vm2823_vm10, %v10506_v30 }
 0x3da   : > { %5971 = vrot.lane.b32.xlu0 %v10362_v40, %s8729_s27  ;;  %5965 = vrot.lane.b32.xlu2 %v10385_v16, %s8729_s27 }
 0x3db   : > { %5973 = vrot.lane.b32.xlu1 %v10404_v43, %s8729_s27 }
 0x3dc   : > { %v4588_v24 = vpop.permute.xlu0 %4587  ;;  %v10541_v51 = vpop.permute.xlu2 %4974 }
 0x3dd   : > { %v4973_v35 = vpop.permute.xlu1 %4972  ;;  %v4592_v57 = vsel %vm409_vm2, %v10478_v6, %v4588_v24 }
 0x3e2   : > { %6174 = vrot.lane.b32.xlu0 %v10419_v15, %s8730_s12  ;;  %5961 = vrot.lane.b32.xlu2 %v10417_v61, %s8729_s27 }
 0x3e3   : > { %5969 = vrot.lane.b32.xlu1 %v10419_v15, %s8729_s27 }
 0x3e4   : > { %v4617_v26 = vpop.permute.xlu0 %4616  ;;  %v10549_v38 = vpop.permute.xlu2 %4980 }
 0x3e5   : > { %v4626_v52 = vsel %vm484_vm0, %v4617_v26, %v4619_v48  ;;  %v4627_v39 = vsel %vm484_vm0, %v4615_v1, %v4617_v26  ;;  %v4576_v33 = vpop.permute.xlu1 %4575  ;;  %v4602_v1 = vmul.f32 %v4595_v10, %v11846_v49  ;;  %v4989_v26 = vsel %vm937_vm4, %v10512_v58, %v4973_v35 }
 0x3e6   : > { %v4636_v9 = vmul.f32 %v4627_v39, %v11838_v32  ;;  %v4637_v20 = vmul.f32 %v4626_v52, %v11839_v28  ;;  %v4597_v44 = vsel %vm409_vm2, %v4576_v33, %v10494_v5  ;;  %v4601_v5 = vmul.f32 %v4596_v18, %v11845_v56  ;;  %v11849_v52 = vld [vmem:[#allocation12_spill] sm:$0xff]  ;;  %v8548_v18 = vld [vmem:[%s11532_s6 + $0x10] sm:$0xff] }
 0x3e7   : > { %v4600_v2 = vmul.f32 %v4597_v44, %v11840_v0 }
 0x3e8   : > { %4740 = vmatpush.msrb.mxu0 %v4636_v9  ;;  %4760 = vmatpush.msrb.mxu1 %v4637_v20  ;;  %v11850_v9 = vld [vmem:[#allocation18_spill] sm:$0xff] }
 0x3e9   : > { %8537 = vmatmul.msk.f32.vlgmr.msrb.gmra.mxu1 %vm2823_vm10, %v10506_v30  ;;  %8536 = vmatmul.msk.f32.vlgmr.msrb.gmra.mxu0 %vm2823_vm10, %v10506_v30 }
 0x3ea   : > { %4843 = vmatpush.msra.mxu1 %v4600_v2  ;;  %6178 = vrot.lane.b32.xlu0 %v10404_v43, %s8730_s12  ;;  %v11852_v2 = vld [vmem:[#allocation22_spill] sm:$0xff] }
 0x3eb   : > { %6170 = vrot.lane.b32.xlu1 %v10385_v16, %s8730_s12  ;;  %5975 = vrot.lane.b32.xlu2 %v10428_v50, %s8729_s27 }
 0x3ec   : > { %v4969_v8 = vpop.permute.xlu0 %4968  ;;  %v4584_v63 = vpop.permute.xlu2 %4583 }
 0x3ed   : > { %v4621_v19 = vpop.permute.xlu1 %4620  ;;  %v4593_v27 = vsel %vm409_vm2, %v4584_v63, %v10478_v6  ;;  %v4990_v41 = vsel %vm937_vm4, %v4969_v8, %v10512_v58  ;;  %v11847_v6 = vld [vmem:[#allocation16_spill] sm:$0xff]  ;;  %v11853_v58 = vld [vmem:[#allocation23_spill] sm:$0xff] }
 0x3ee   : > { %v4624_v34 = vsel %vm484_vm0, %v4621_v19, %v4623_v59  ;;  %v4625_v4 = vsel %vm484_vm0, %v4619_v48, %v4621_v19  ;;  %v4604_v11 = vmul.f32 %v4593_v27, %v11843_v25  ;;  %v4993_v46 = vmul.f32 %v4990_v41, %v11844_v60 }
 0x3ef   : > { %v4638_v17 = vmul.f32 %v4625_v4, %v11841_v13  ;;  %v4639_v3 = vmul.f32 %v4624_v34, %v11842_v62  ;;  %v4605_v29 = vmul.f32 %v4592_v57, %v11847_v6  ;;  %v11854_v34 = vld [vmem:[#allocation24_spill] sm:$0xff] }
 0x3f0   : > { %4923 = vmatpush.msrb.mxu1 %v4604_v11 }
 0x3f1   : > { %4780 = vmatpush.msrb.mxu2 %v4638_v17  ;;  %4800 = vmatpush.msrb.mxu3 %v4639_v3  ;;  %v11855_v17 = vld [vmem:[#allocation25_spill] sm:$0xff] }
 0x3f2   : > { %8538 = vmatmul.msk.f32.vlgmr.msrb.gmra.mxu2 %vm2823_vm10, %v10506_v30  ;;  %8539 = vmatmul.msk.f32.vlgmr.msrb.gmra.mxu3 %vm2823_vm10, %v10506_v30  ;;  %v4594_v30 = vsel %vm409_vm2, %v10492_v45, %v4584_v63 }
 0x3f3   : > { %8541 = vmatmul.msk.f32.vlgmr.msra.gmra.mxu1 %vm2823_vm10, %v4607_v36  ;;  %4863 = vmatpush.msra.mxu2 %v4601_v5  ;;  %v4603_v20 = vmul.f32 %v4594_v30, %v11850_v9 }
 0x3f4   : > { %4883 = vmatpush.msra.mxu3 %v4602_v1  ;;  %v4983_v12 = vpop.permute.xlu0 %4982  ;;  %v10608_v37 = vpop.permute.xlu2 %5175  ;;  %5040 = vmatpush.msra.mxu1 %v4993_v46  ;;  %v11856_v1 = vld [vmem:[#allocation27_spill] sm:$0xff] }
 0x3f5   : > { %6374 = vperm.xlu0 %8713, %v6371_v23   ;;  %v4590_v48 = vpop.permute.xlu1 %4589  ;;  %6166 = vrot.lane.b32.xlu1 %v10417_v61, %s8730_s12  ;;  %v4991_v45 = vsel %vm937_vm4, %v4983_v12, %v4969_v8  ;;  %v4984_v41 = vsel %vm937_vm4, %v10549_v38, %v4983_v12 }
 0x3f6   : > { %4943 = vmatpush.msrb.mxu2 %v4605_v29  ;;  %v4591_v59 = vsel %vm409_vm2, %v4588_v24, %v4590_v48  ;;  %6172 = vrot.lane.b32.xlu2 %v10364_v54, %s8730_s12  ;;  %v4598_v55 = vsel %vm409_vm2, %v4590_v48, %v4576_v33  ;;  %v4988_v24 = vsel %vm937_vm4, %v4973_v35, %v10541_v51  ;;  %v11851_v33 = vld [vmem:[#allocation17_spill] sm:$0xff] }
 0x3f7   : > { %v4606_v47 = vmul.f32 %v4591_v59, %v11848_v22  ;;  %v4599_v39 = vmul.f32 %v4598_v55, %v11849_v52  ;;  %v4994_v44 = vmul.f32 %v4989_v26, %v11851_v33  ;;  %v4995_v63 = vmul.f32 %v4988_v24, %v11852_v2  ;;  %v11859_v24 = vld [vmem:[#allocation34_spill] sm:$0xff] }
 0x3f8   : > { %v4992_v35 = vmul.f32 %v4991_v45, %v11853_v58  ;;  %v4999_v3 = vmul.f32 %v4984_v41, %v11855_v17  ;;  %v11860_v41 = vld [vmem:[#allocation26_spill] sm:$0xff] }
 0x3f9   : > { %4963 = vmatpush.msrb.mxu3 %v4606_v47  ;;  %4823 = vmatpush.msra.mxu0 %v4599_v39  ;;  %v11858_v47 = vld [vmem:[#allocation29_spill] sm:$0xff] }
 0x3fa   : > { %8542 = vmatmul.msk.f32.vlgmr.msra.gmra.mxu2 %vm2823_vm10, %v4607_v36  ;;  %8540 = vmatmul.msk.f32.vlgmr.msra.gmra.mxu0 %vm2823_vm10, %v4607_v36 }
 0x3fb   : > { %8543 = vmatmul.msk.f32.vlgmr.msra.gmra.mxu3 %vm2823_vm10, %v4607_v36  ;;  %4903 = vmatpush.msrb.mxu0 %v4603_v20 }
 0x3fc   : > { %8545 = vmatmul.msk.f32.vlgmr.msrb.gmra.mxu1 %vm2823_vm10, %v4607_v36  ;;  %v5178_v8 = vpop.permute.xlu0 %5177  ;;  %v5174_v19 = vpop.permute.xlu2 %5173  ;;  %5060 = vmatpush.msra.mxu2 %v4994_v44 }
 0x3fd   : > { %5080 = vmatpush.msra.mxu3 %v4995_v63  ;;  %v4979_v27 = vpop.permute.xlu1 %4978  ;;  %6180 = vrot.lane.b32.xlu1 %v10428_v50, %s8730_s12  ;;  %v5194_v5 = vsel %vm1209_vm5, %v10608_v37, %v5178_v8  ;;  %v5195_v44 = vsel %vm1209_vm5, %v5174_v19, %v10608_v37 }
 0x3fe   : > { %5020 = vmatpush.msra.mxu0 %v4992_v35  ;;  %v4985_v10 = vsel %vm937_vm4, %v4979_v27, %v10549_v38  ;;  %6168 = vrot.lane.b32.xlu2 %v10349_v31, %s8730_s12 }
 0x3ff   : > { %v4998_v4 = vmul.f32 %v4985_v10, %v11854_v34 }
 0x402   : > { %8546 = vmatmul.msk.f32.vlgmr.msrb.gmra.mxu2 %vm2823_vm10, %v4607_v36  ;;  %8544 = vmatmul.msk.f32.vlgmr.msrb.gmra.mxu0 %vm2823_vm10, %v4607_v36 }
 0x403   : > { %8547 = vmatmul.msk.f32.vlgmr.msrb.gmra.mxu3 %vm2823_vm10, %v4607_v36  ;;  %5140 = vmatpush.msrb.mxu2 %v4998_v4  ;;  %v11857_v36 = vld [vmem:[#allocation28_spill] sm:$0xff] }
 0x404   : > { %8550 = vmatmul.msk.f32.vlgmr.msra.gmra.mxu1 %vm2823_vm10, %v8548_v18  ;;  %v5184_v11 = vpop.permute.xlu0 %5183  ;;  %v5188_v57 = vpop.permute.xlu2 %5187  ;;  %5160 = vmatpush.msrb.mxu3 %v4999_v3  ;;  %v5199_v29 = vmul.f32 %v5194_v5, %v11857_v36  ;;  %v11861_v3 = vld [vmem:[#allocation20_spill] sm:$0xff]  ;;  %v11862_v5 = vld [vmem:[#allocation30_spill] sm:$0xff] }
 0x405   : > { %v5180_v38 = vpop.permute.xlu1 %5179  ;;  %v5196_v35 = vsel %vm1209_vm5, %v5188_v57, %v5174_v19 }
 0x406   : > { %v5193_v46 = vsel %vm1209_vm5, %v5178_v8, %v5180_v38  ;;  %6176 = vrot.lane.b32.xlu2 %v10362_v40, %s8730_s12 }
 0x407   : > { %v5200_v23 = vmul.f32 %v5193_v46, %v11856_v1 }
 0x40a   : > { %8551 = vmatmul.msk.f32.vlgmr.msra.gmra.mxu2 %vm2823_vm10, %v8548_v18  ;;  %8549 = vmatmul.msk.f32.vlgmr.msra.gmra.mxu0 %vm2823_vm10, %v8548_v18 }
 0x40b   : > { %8552 = vmatmul.msk.f32.vlgmr.msra.gmra.mxu3 %vm2823_vm10, %v8548_v18  ;;  %5265 = vmatpush.msra.mxu2 %v5199_v29  ;;  %v11863_v29 = vld [vmem:[#allocation33_spill] sm:$0xff] }
 0x40c   : > { %5285 = vmatpush.msra.mxu3 %v5200_v23  ;;  %v10670_v12 = vpop.permute.xlu0 %5563  ;;  %v5558_v48 = vpop.permute.xlu2 %5557  ;;  %v5198_v23 = vmul.f32 %v5195_v44, %v11862_v5  ;;  %v8566_v44 = vld [vmem:[%s11532_s6 + $0x20] sm:$0xff] }
 0x40d   : > { %v5186_v59 = vpop.permute.xlu1 %5185 }
 0x40e   : > { %v5189_v30 = vsel %vm1209_vm5, %v5186_v59, %v5188_v57  ;;  %v5190_v55 = vsel %vm1209_vm5, %v5184_v11, %v5186_v59  ;;  %v5197_v59 = vmul.f32 %v5196_v35, %v11863_v29 }
 0x40f   : > { %v5203_v26 = vmul.f32 %v5190_v55, %v11858_v47  ;;  %v5204_v39 = vmul.f32 %v5189_v30, %v11859_v24  ;;  %v11865_v30 = vld [vmem:[#allocation31_spill] sm:$0xff] }
 0x412   : > { %8555 = vmatmul.msk.f32.vlgmr.msrb.gmra.mxu2 %vm2823_vm10, %v8548_v18 }
 0x413   : > { %8556 = vmatmul.msk.f32.vlgmr.msrb.gmra.mxu3 %vm2823_vm10, %v8548_v18  ;;  %5345 = vmatpush.msrb.mxu2 %v5203_v26 }
 0x414   : > { %5365 = vmatpush.msrb.mxu3 %v5204_v39  ;;  %v5182_v45 = vpop.permute.xlu0 %5181  ;;  %v5554_v20 = vpop.permute.xlu2 %5553 }
 0x415   : > { %v4977_v63 = vpop.permute.xlu1 %4976  ;;  %v5191_v37 = vsel %vm1209_vm5, %v5182_v45, %v5184_v11  ;;  %v5192_v19 = vsel %vm1209_vm5, %v5180_v38, %v5182_v45  ;;  %v11866_v45 = vld [vmem:[#allocation36_spill] sm:$0xff] }
 0x416   : > { %v4986_v8 = vsel %vm937_vm4, %v4977_v63, %v4979_v27  ;;  %v4987_v10 = vsel %vm937_vm4, %v10541_v51, %v4977_v63  ;;  %v8557_v51 = vld [vmem:[%s11532_s6 + $0x18] sm:$0xff]  ;;  %v5202_v55 = vmul.f32 %v5191_v37, %v11865_v30  ;;  %v11870_v37 = vld [vmem:[#allocation38_spill] sm:$0xff] }
 0x417   : > { %v4996_v4 = vmul.f32 %v4987_v10, %v11860_v41  ;;  %v4997_v46 = vmul.f32 %v4986_v8, %v11861_v3  ;;  %v11864_v27 = vld [vmem:[#allocation32_spill] sm:$0xff] }
 0x418   : > { %v5201_v57 = vmul.f32 %v5192_v19, %v11864_v27 }
 0x419   : > { %5100 = vmatpush.msrb.mxu0 %v4996_v4  ;;  %5120 = vmatpush.msrb.mxu1 %v4997_v46  ;;  %v11868_v4 = vld [vmem:[#allocation37_spill] sm:$0xff] }
 0x41a   : > { %8553 = vmatmul.msk.f32.vlgmr.msrb.gmra.mxu0 %vm2823_vm10, %v8548_v18  ;;  %8554 = vmatmul.msk.f32.vlgmr.msrb.gmra.mxu1 %vm2823_vm10, %v8548_v18 }
 0x41b   : > { %5225 = vmatpush.msra.mxu0 %v5197_v59  ;;  %5245 = vmatpush.msra.mxu1 %v5198_v23  ;;  %v11869_v23 = vld [vmem:[#allocation39_spill] sm:$0xff] }
 0x41c   : > { %8560 = vmatmul.msk.f32.vlgmr.msra.gmra.mxu2 %vm2823_vm10, %v8557_v51  ;;  %8561 = vmatmul.msk.f32.vlgmr.msra.gmra.mxu3 %vm2823_vm10, %v8557_v51  ;;  %v10707_v11 = vpop.permute.xlu0 %5760  ;;  %v5562_v38 = vpop.permute.xlu2 %5561 }
 0x41d   : > { %5438 = vmatpush.msra.mxu2 %v10385_v16  ;;  %5458 = vmatpush.msra.mxu3 %v10364_v54  ;;  %v5556_v26 = vpop.permute.xlu1 %5555 }
 0x41e   : > { %5305 = vmatpush.msrb.mxu0 %v5201_v57  ;;  %5325 = vmatpush.msrb.mxu1 %v5202_v55  ;;  %v5572_v8 = vsel %vm1685_vm6, %v5554_v20, %v5556_v26 }
 0x41f   : > { %v5576_v46 = vmul.f32 %v5572_v8, %v11868_v4  ;;  %v11873_v8 = vld [vmem:[#allocation42_spill] sm:$0xff] }
 0x422   : > { %8558 = vmatmul.msk.f32.vlgmr.msra.gmra.mxu0 %vm2823_vm10, %v8557_v51  ;;  %8559 = vmatmul.msk.f32.vlgmr.msra.gmra.mxu1 %vm2823_vm10, %v8557_v51 }
 0x423   : > { %5398 = vmatpush.msra.mxu0 %v10417_v61  ;;  %5418 = vmatpush.msra.mxu1 %v10349_v31  ;;  %v5571_v61 = vsel %vm1685_vm6, %v5556_v26, %v5558_v48 }
 0x424   : > { %8564 = vmatmul.msk.f32.vlgmr.msrb.gmra.mxu2 %vm2823_vm10, %v8557_v51  ;;  %8565 = vmatmul.msk.f32.vlgmr.msrb.gmra.mxu3 %vm2823_vm10, %v8557_v51  ;;  %v5560_v18 = vpop.permute.xlu0 %5559  ;;  %v10717_v39 = vpop.permute.xlu2 %5768 }
 0x425   : > { %5518 = vmatpush.msrb.mxu2 %v10404_v43  ;;  %5538 = vmatpush.msrb.mxu3 %v10428_v50  ;;  %v5552_v54 = vpop.permute.xlu1 %5551  ;;  %v5570_v16 = vsel %vm1685_vm6, %v5558_v48, %v5560_v18  ;;  %v11867_v43 = vld [vmem:[#allocation35_spill] sm:$0xff] }
 0x426   : > { %v5578_v31 = vmul.f32 %v5570_v16, %v11866_v45  ;;  %v5577_v63 = vmul.f32 %v5571_v61, %v11867_v43  ;;  %v5573_v10 = vsel %vm1685_vm6, %v5552_v54, %v5554_v20  ;;  %v5569_v16 = vsel %vm1685_vm6, %v5560_v18, %v5562_v38 }
 0x427   : > { %v5575_v59 = vmul.f32 %v5573_v10, %v11869_v23  ;;  %v5579_v10 = vmul.f32 %v5569_v16, %v11873_v8  ;;  %v11877_v16 = vld [vmem:[#allocation44_spill] sm:$0xff] }
 0x42a   : > { %8562 = vmatmul.msk.f32.vlgmr.msrb.gmra.mxu0 %vm2823_vm10, %v8557_v51  ;;  %8563 = vmatmul.msk.f32.vlgmr.msrb.gmra.mxu1 %vm2823_vm10, %v8557_v51  ;;  %v11871_v51 = vld [vmem:[#allocation40_spill] sm:$0xff] }
 0x42b   : > { %5478 = vmatpush.msrb.mxu0 %v10419_v15  ;;  %5498 = vmatpush.msrb.mxu1 %v10362_v40 }
 0x42c   : > { %8569 = vmatmul.msk.f32.vlgmr.msra.gmra.mxu2 %vm2823_vm10, %v8566_v44  ;;  %8570 = vmatmul.msk.f32.vlgmr.msra.gmra.mxu3 %vm2823_vm10, %v8566_v44  ;;  %v5757_v50 = vpop.permute.xlu0 %5756  ;;  %v10736_v48 = vpop.permute.xlu2 %5764 }
 0x42d   : > { %5643 = vmatpush.msra.mxu2 %v5577_v63  ;;  %5663 = vmatpush.msra.mxu3 %v5578_v31  ;;  %v5566_v35 = vpop.permute.xlu1 %5565  ;;  %v11872_v63 = vld [vmem:[#allocation43_spill] sm:$0xff] }
 0x42e   : > { %v5567_v40 = vsel %vm1685_vm6, %v10670_v12, %v5566_v35  ;;  %v5574_v15 = vsel %vm1685_vm6, %v5566_v35, %v5552_v54  ;;  %v5568_v54 = vsel %vm1685_vm6, %v5562_v38, %v10670_v12  ;;  %v8575_v12 = vld [vmem:[%s11532_s6 + $0x28] sm:$0xff] }
 0x42f   : > { %v5581_v19 = vmul.f32 %v5567_v40, %v11870_v37  ;;  %v5582_v57 = vmul.f32 %v5574_v15, %v11871_v51  ;;  %v5580_v35 = vmul.f32 %v5568_v54, %v11872_v63  ;;  %v11874_v40 = vld [vmem:[#allocation41_spill] sm:$0xff]  ;;  %v11876_v54 = vld [vmem:[#allocation46_spill] sm:$0xff] }
 0x432   : > { %8567 = vmatmul.msk.f32.vlgmr.msra.gmra.mxu0 %vm2823_vm10, %v8566_v44  ;;  %8568 = vmatmul.msk.f32.vlgmr.msra.gmra.mxu1 %vm2823_vm10, %v8566_v44 }
 0x433   : > { %5603 = vmatpush.msra.mxu0 %v5575_v59  ;;  %5623 = vmatpush.msra.mxu1 %v5576_v46  ;;  %v11875_v46 = vld [vmem:[#allocation45_spill] sm:$0xff] }
 0x434   : > { %8573 = vmatmul.msk.f32.vlgmr.msrb.gmra.mxu2 %vm2823_vm10, %v8566_v44  ;;  %8574 = vmatmul.msk.f32.vlgmr.msrb.gmra.mxu3 %vm2823_vm10, %v8566_v44  ;;  %v5771_v20 = vpop.permute.xlu0 %5770  ;;  %v5966_v55 = vpop.permute.xlu2 %5965 }
 0x435   : > { %5723 = vmatpush.msrb.mxu2 %v5581_v19  ;;  %5743 = vmatpush.msrb.mxu3 %v5582_v57  ;;  %v5763_v26 = vpop.permute.xlu1 %5762 }
 0x436   : > { %v5775_v61 = vsel %vm1957_vm7, %v5763_v26, %v10736_v48  ;;  %v5776_v31 = vsel %vm1957_vm7, %v10707_v11, %v5763_v26 }
 0x437   : > { %v5782_v15 = vmul.f32 %v5776_v31, %v11874_v40  ;;  %v5783_v59 = vmul.f32 %v5775_v61, %v11875_v46  ;;  %v5772_v31 = vsel %vm1957_vm7, %v10717_v39, %v5771_v20 }
 0x43a   : > { %8571 = vmatmul.msk.f32.vlgmr.msrb.gmra.mxu0 %vm2823_vm10, %v8566_v44  ;;  %8572 = vmatmul.msk.f32.vlgmr.msrb.gmra.mxu1 %vm2823_vm10, %v8566_v44 }
 0x43b   : > { %5683 = vmatpush.msrb.mxu0 %v5579_v10  ;;  %5703 = vmatpush.msrb.mxu1 %v5580_v35  ;;  %v5779_v35 = vsel %vm1957_vm7, %v5771_v20, %v5757_v50  ;;  %v11878_v10 = vld [vmem:[#allocation49_spill] sm:$0xff] }
 0x43c   : > { %8578 = vmatmul.msk.f32.vlgmr.msra.gmra.mxu2 %vm2823_vm10, %v8575_v12  ;;  %8579 = vmatmul.msk.f32.vlgmr.msra.gmra.mxu3 %vm2823_vm10, %v8575_v12  ;;  %v5968_v38 = vpop.permute.xlu0 %5967  ;;  %v5962_v19 = vpop.permute.xlu2 %5961 }
 0x43d   : > { %5848 = vmatpush.msra.mxu2 %v5782_v15  ;;  %5868 = vmatpush.msra.mxu3 %v5783_v59  ;;  %v5759_v18 = vpop.permute.xlu1 %5758  ;;  %v11879_v15 = vld [vmem:[#allocation47_spill] sm:$0xff] }
 0x43e   : > { %v5777_v57 = vsel %vm1957_vm7, %v5759_v18, %v10707_v11  ;;  %v5778_v26 = vsel %vm1957_vm7, %v5757_v50, %v5759_v18  ;;  %v5786_v11 = vmul.f32 %v5772_v31, %v11878_v10  ;;  %v5787_v59 = vmul.f32 %v5779_v35, %v11879_v15 }
 0x43f   : > { %v5780_v44 = vmul.f32 %v5778_v26, %v11876_v54  ;;  %v5781_v61 = vmul.f32 %v5777_v57, %v11877_v16  ;;  %v11880_v26 = vld [vmem:[#allocation50_spill] sm:$0xff]  ;;  %v5981_v15 = vsel %vm2229_vm8, %v5966_v55, %v5968_v38 }
 0x442   : > { %8576 = vmatmul.msk.f32.vlgmr.msra.gmra.mxu0 %vm2823_vm10, %v8575_v12  ;;  %8577 = vmatmul.msk.f32.vlgmr.msra.gmra.mxu1 %vm2823_vm10, %v8575_v12 }
 0x443   : > { %5808 = vmatpush.msra.mxu0 %v5780_v44  ;;  %5828 = vmatpush.msra.mxu1 %v5781_v61  ;;  %v11881_v44 = vld [vmem:[#allocation48_spill] sm:$0xff] }
 0x444   : > { %8582 = vmatmul.msk.f32.vlgmr.msrb.gmra.mxu2 %vm2823_vm10, %v8575_v12  ;;  %8583 = vmatmul.msk.f32.vlgmr.msrb.gmra.mxu3 %vm2823_vm10, %v8575_v12  ;;  %v5964_v18 = vpop.permute.xlu0 %5963 }
 0x445   : > { %5928 = vmatpush.msrb.mxu2 %v5786_v11  ;;  %5948 = vmatpush.msrb.mxu3 %v5787_v59  ;;  %v5767_v57 = vpop.permute.xlu1 %5766  ;;  %v5976_v35 = vpop.permute.xlu2 %5975  ;;  %v8584_v11 = vld [vmem:[%s11532_s6 + $0x30] sm:$0xff] }
 0x446   : > { %v5773_v50 = vsel %vm1957_vm7, %v5767_v57, %v10717_v39  ;;  %v5774_v20 = vsel %vm1957_vm7, %v10736_v48, %v5767_v57  ;;  %v11882_v39 = vld [vmem:[#allocation52_spill] sm:$0xff] }
 0x447   : > { %v5784_v31 = vmul.f32 %v5774_v20, %v11880_v26  ;;  %v5785_v61 = vmul.f32 %v5773_v50, %v11881_v44  ;;  %v5987_v59 = vmul.f32 %v5981_v15, %v11882_v39  ;;  %v5982_v50 = vsel %vm2229_vm8, %v5964_v18, %v5966_v55  ;;  %v11883_v44 = vld [vmem:[#allocation54_spill] sm:$0xff]  ;;  %v11885_v39 = vld [vmem:[#allocation55_spill] sm:$0xff] }
 0x448   : > { %v5983_v20 = vsel %vm2229_vm8, %v5962_v19, %v5964_v18 }
 0x449   : > { %v5985_v15 = vmul.f32 %v5983_v20, %v11883_v44  ;;  %v11888_v44 = vld [vmem:[#allocation58_spill] sm:$0xff] }
 0x44a   : > { %8580 = vmatmul.msk.f32.vlgmr.msrb.gmra.mxu0 %vm2823_vm10, %v8575_v12  ;;  %8581 = vmatmul.msk.f32.vlgmr.msrb.gmra.mxu1 %vm2823_vm10, %v8575_v12 }
 0x44b   : > { %5888 = vmatpush.msrb.mxu0 %v5784_v31  ;;  %5908 = vmatpush.msrb.mxu1 %v5785_v61  ;;  %v11884_v31 = vld [vmem:[#allocation53_spill] sm:$0xff] }
 0x44c   : > { %8587 = vmatmul.msk.f32.vlgmr.msra.gmra.mxu2 %vm2823_vm10, %v8584_v11  ;;  %8588 = vmatmul.msk.f32.vlgmr.msra.gmra.mxu3 %vm2823_vm10, %v8584_v11  ;;  %v5972_v48 = vpop.permute.xlu0 %5971  ;;  %v5986_v61 = vmul.f32 %v5982_v50, %v11884_v31  ;;  %v5984_v31 = vsel %vm2229_vm8, %v5976_v35, %v5962_v19  ;;  %v11890_v19 = vld [vmem:[#allocation61_spill] sm:$0xff] }
 0x44d   : > { %6053 = vmatpush.msra.mxu2 %v5987_v59  ;;  %v5974_v57 = vpop.permute.xlu1 %5973 }
 0x44e   : > { %v5977_v12 = vsel %vm2229_vm8, %v5974_v57, %v5976_v35  ;;  %v5978_v18 = vsel %vm2229_vm8, %v5972_v48, %v5974_v57 }
 0x44f   : > { %v5991_v26 = vmul.f32 %v5977_v12, %v11885_v39  ;;  %v11886_v12 = vld [vmem:[#allocation51_spill] sm:$0xff] }
 0x450   : > { %v6173_v10 = vpop.permute.xlu2 %6172 }
 0x452   : > { %8585 = vmatmul.msk.f32.vlgmr.msra.gmra.mxu0 %vm2823_vm10, %v8584_v11  ;;  %8586 = vmatmul.msk.f32.vlgmr.msra.gmra.mxu1 %vm2823_vm10, %v8584_v11 }
 0x453   : > { %6013 = vmatpush.msra.mxu0 %v5985_v15  ;;  %6033 = vmatpush.msra.mxu1 %v5986_v61  ;;  %v11887_v15 = vld [vmem:[#allocation57_spill] sm:$0xff] }
 0x454   : > { %8591 = vmatmul.msk.f32.vlgmr.msrb.gmra.mxu2 %vm2823_vm10, %v8584_v11  ;;  %8592 = vmatmul.msk.f32.vlgmr.msrb.gmra.mxu3 %vm2823_vm10, %v8584_v11  ;;  %v6175_v59 = vpop.permute.xlu0 %6174 }
 0x455   : > { %6133 = vmatpush.msrb.mxu2 %v5991_v26  ;;  %v5970_v55 = vpop.permute.xlu1 %5969  ;;  %v5990_v26 = vmul.f32 %v5978_v18, %v11888_v44  ;;  %v6185_v54 = vsel %vm2501_vm9, %v6173_v10, %v6175_v59  ;;  %v11895_v44 = vld [vmem:[#allocation65_spill] sm:$0xff] }
 0x456   : > { %v5979_v50 = vsel %vm2229_vm8, %v5970_v55, %v5972_v48  ;;  %v5980_v20 = vsel %vm2229_vm8, %v5968_v38, %v5970_v55  ;;  %v8593_v48 = vld [vmem:[%s11532_s6 + $0x38] sm:$0xff]  ;;  %v6193_v35 = vmul.f32 %v6185_v54, %v11890_v19  ;;  %v11894_v19 = vld [vmem:[#allocation62_spill] sm:$0xff] }
 0x457   : > { %v5988_v39 = vmul.f32 %v5980_v20, %v11886_v12  ;;  %v5989_v61 = vmul.f32 %v5979_v50, %v11887_v15  ;;  %v11889_v38 = vld [vmem:[#allocation56_spill] sm:$0xff] }
 0x458   : > { %v6169_v57 = vpop.permute.xlu2 %6168  ;;  %v5992_v55 = vmul.f32 %v5984_v31, %v11889_v38  ;;  %v11892_v31 = vld [vmem:[#allocation60_spill] sm:$0xff] }
 0x459   : > { %6073 = vmatpush.msra.mxu3 %v5988_v39 }
 0x45a   : > { %8589 = vmatmul.msk.f32.vlgmr.msrb.gmra.mxu0 %vm2823_vm10, %v8584_v11  ;;  %8590 = vmatmul.msk.f32.vlgmr.msrb.gmra.mxu1 %vm2823_vm10, %v8584_v11  ;;  %v11891_v11 = vld [vmem:[#allocation59_spill] sm:$0xff] }
 0x45b   : > { %6093 = vmatpush.msrb.mxu0 %v5989_v61  ;;  %6113 = vmatpush.msrb.mxu1 %v5990_v26 }
 0x45c   : > { %8596 = vmatmul.msk.f32.vlgmr.msra.gmra.mxu2 %vm2823_vm10, %v8593_v48  ;;  %8597 = vmatmul.msk.f32.vlgmr.msra.gmra.mxu3 %vm2823_vm10, %v8593_v48  ;;  %v6179_v54 = vpop.permute.xlu0 %6178 }
 0x45d   : > { %6153 = vmatpush.msrb.mxu3 %v5992_v55  ;;  %v6171_v39 = vpop.permute.xlu1 %6170  ;;  %v10860_v55 = vpop.f32.mrf.mxu1 }
 0x45e   : > { %v6186_v18 = vsel %vm2501_vm9, %v6171_v39, %v6173_v10  ;;  %v6187_v50 = vsel %vm2501_vm9, %v6169_v57, %v6171_v39 }
 0x45f   : > { %6278 = vmatpush.msra.mxu3 %v6193_v35  ;;  %v6191_v20 = vmul.f32 %v6187_v50, %v11891_v11  ;;  %v6192_v61 = vmul.f32 %v6186_v18, %v11892_v31  ;;  %v10862_v35 = vpop.f32.mrf.mxu0  ;;  %v11893_v50 = vld [vmem:[#allocation66_spill] sm:$0xff]  ;;  %v8602_v11 = vld [vmem:[%s11532_s6 + $0x40] sm:$0xff] }
 0x460   : > { %v6177_v26 = vpop.permute.xlu2 %6176 }
 0x461   : > { %6258 = vmatpush.msra.mxu2 %v6192_v61  ;;  %v6183_v10 = vsel %vm2501_vm9, %v6177_v26, %v6179_v54  ;;  %v6184_v39 = vsel %vm2501_vm9, %v6175_v59, %v6177_v26  ;;  %v10876_v59 = vpop.f32.mrf.mxu2  ;;  %v10879_v26 = vpop.f32.mrf.mxu3 }
 0x462   : > { %8594 = vmatmul.msk.f32.vlgmr.msra.gmra.mxu0 %vm2823_vm10, %v8593_v48  ;;  %8595 = vmatmul.msk.f32.vlgmr.msra.gmra.mxu1 %vm2823_vm10, %v8593_v48  ;;  %v6195_v61 = vmul.f32 %v6183_v10, %v11893_v50  ;;  %v6194_v15 = vmul.f32 %v6184_v39, %v11895_v44  ;;  %v11898_v50 = vld [vmem:[#allocation63_spill] sm:$0xff] }
 0x463   : > { %6238 = vmatpush.msra.mxu1 %v6191_v20 }
 0x464   : > { %8600 = vmatmul.msk.f32.vlgmr.msrb.gmra.mxu2 %vm2823_vm10, %v8593_v48  ;;  %8601 = vmatmul.msk.f32.vlgmr.msrb.gmra.mxu3 %vm2823_vm10, %v8593_v48 }
 0x467   : > { %v6167_v18 = vpop.permute.xlu1 %6166  ;;  %v10888_v39 = vpop.f32.mrf.mxu0 }
 0x468   : > { %v6188_v20 = vsel %vm2501_vm9, %v6167_v18, %v6169_v57  ;;  %v10882_v57 = vpop.f32.mrf.mxu1  ;;  %11896 = vst [vmem:[#allocation68_spill] sm:$0xff] %v10888_v39 }
 0x469   : > { %v6190_v31 = vmul.f32 %v6188_v20, %v11894_v19 }
 0x46a   : > { %8598 = vmatmul.msk.f32.vlgmr.msrb.gmra.mxu0 %vm2823_vm10, %v8593_v48  ;;  %8599 = vmatmul.msk.f32.vlgmr.msrb.gmra.mxu1 %vm2823_vm10, %v8593_v48 }
 0x46b   : > { %6318 = vmatpush.msrb.mxu1 %v6195_v61  ;;  %6218 = vmatpush.msra.mxu0 %v6190_v31  ;;  %v11897_v61 = vld [vmem:[#allocation64_spill] sm:$0xff] }
 0x46c   : > { %8605 = vmatmul.msk.f32.vlgmr.msra.gmra.mxu2 %vm2823_vm10, %v8602_v11  ;;  %8606 = vmatmul.msk.f32.vlgmr.msra.gmra.mxu3 %vm2823_vm10, %v8602_v11 }
 0x46d   : > { %6298 = vmatpush.msrb.mxu0 %v6194_v15 }
 0x46f   : > { %v6181_v10 = vpop.permute.xlu1 %6180 }
 0x470   : > { %v6182_v20 = vsel %vm2501_vm9, %v6179_v54, %v6181_v10  ;;  %v6189_v48 = vsel %vm2501_vm9, %v6181_v10, %v6167_v18  ;;  %v4845_v18 = vpop.f32.mrf.mxu1 }
 0x471   : > { %v6196_v31 = vmul.f32 %v6182_v20, %v11897_v61  ;;  %v6197_v44 = vmul.f32 %v6189_v48, %v11898_v50  ;;  %v4846_v14 = vadd.f32 %v4845_v18, %v10860_v55 }
 0x472   : > { %8603 = vmatmul.msk.f32.vlgmr.msra.gmra.mxu0 %vm2823_vm10, %v8602_v11  ;;  %8604 = vmatmul.msk.f32.vlgmr.msra.gmra.mxu1 %vm2823_vm10, %v8602_v11 }
 0x473   : > { %6338 = vmatpush.msrb.mxu2 %v6196_v31  ;;  %6358 = vmatpush.msrb.mxu3 %v6197_v44 }
 0x474   : > { %8609 = vmatmul.msk.f32.vlgmr.msrb.gmra.mxu2 %vm2823_vm10, %v8602_v11  ;;  %8610 = vmatmul.msk.f32.vlgmr.msrb.gmra.mxu3 %vm2823_vm10, %v8602_v11 }
 0x475   : > { %v10896_v15 = vpop.f32.mrf.mxu2  ;;  %v10898_v54 = vpop.f32.mrf.mxu3 }
 0x477   : > { %v10902_v10 = vpop.f32.mrf.mxu0 }
 0x479   : > { %v10904_v61 = vpop.f32.mrf.mxu1 }
 0x47a   : > { %8607 = vmatmul.msk.f32.vlgmr.msrb.gmra.mxu0 %vm2823_vm10, %v8602_v11  ;;  %8608 = vmatmul.msk.f32.vlgmr.msrb.gmra.mxu1 %vm2823_vm10, %v8602_v11 }
 0x47d   : > { %v4865_v20 = vpop.f32.mrf.mxu2 }
 0x47e   : > { %v4885_v48 = vpop.f32.mrf.mxu3  ;;  %v4866_v28 = vadd.f32 %v4865_v20, %v10876_v59 }
 0x47f   : > { %v10906_v44 = vpop.f32.mrf.mxu0  ;;  %v4886_v7 = vadd.f32 %v4885_v48, %v10879_v26 }
 0x480   : > { %11899 = vst [vmem:[#allocation70_spill] sm:$0xff] %v10906_v44 }
 0x481   : > { %v5042_v12 = vpop.f32.mrf.mxu1 }
 0x485   : > { %v10908_v31 = vpop.f32.mrf.mxu2 }
 0x486   : > { %v10910_v50 = vpop.f32.mrf.mxu3 }
 0x487   : > { %v10912_v46 = vpop.f32.mrf.mxu0 }
 0x48d   : > { %v5062_v19 = vpop.f32.mrf.mxu2 }
 0x48e   : > { %v5082_v38 = vpop.f32.mrf.mxu3  ;;  %v5167_v21 = vadd.f32 %v5062_v19, %v4866_v28  ;;  %v4826_v28 = vadd.f32 %v10902_v10, %v10862_v35 }
 0x495   : > { %v10914_v16 = vpop.f32.mrf.mxu2 }
 0x496   : > { %v10916_v11 = vpop.f32.mrf.mxu3 }
 0x497   : > { %v10918_v40 = vpop.f32.mrf.mxu0  ;;  %v10920_v51 = vpop.f32.mrf.mxu1 }
 0x498   : > { %11900 = vst [vmem:[#allocation74_spill] sm:$0xff] %v10918_v40 }
 0x49f   : > { %v5267_v63 = vpop.f32.mrf.mxu2  ;;  %v5287_v8 = vpop.f32.mrf.mxu3 }
 0x4a0   : > { %v10922_v45 = vpop.f32.mrf.mxu0  ;;  %v5247_v4 = vpop.f32.mrf.mxu1 }
 0x4a7   : > { %v10924_v37 = vpop.f32.mrf.mxu2  ;;  %v10926_v23 = vpop.f32.mrf.mxu3 }
 0x4a8   : > { %v10928_v43 = vpop.f32.mrf.mxu0  ;;  %v10930_v47 = vpop.f32.mrf.mxu1 }
 0x4a9   : > { %11901 = vst [vmem:[#allocation73_spill] sm:$0xff] %v10928_v43 }
 0x4af   : > { %v5440_v30 = vpop.f32.mrf.mxu2  ;;  %v5460_v27 = vpop.f32.mrf.mxu3 }
 0x4b0   : > { %v10932_v24 = vpop.f32.mrf.mxu0  ;;  %v5420_v29 = vpop.f32.mrf.mxu1 }
 0x4b7   : > { %v10934_v5 = vpop.f32.mrf.mxu2  ;;  %v10936_v3 = vpop.f32.mrf.mxu3 }
 0x4b8   : > { %v10938_v41 = vpop.f32.mrf.mxu0  ;;  %v10940_v1 = vpop.f32.mrf.mxu1 }
 0x4b9   : > { %11902 = vst [vmem:[#allocation75_spill] sm:$0xff] %v10938_v41  ;;  %v5372_v41 = vadd.f32 %v5267_v63, %v5167_v21  ;;  %v4946_v63 = vadd.f32 %v10908_v31, %v10896_v15 }
 0x4bf   : > { %v5645_v36 = vpop.f32.mrf.mxu2  ;;  %v5665_v58 = vpop.f32.mrf.mxu3 }
 0x4c0   : > { %v5605_v60 = vpop.f32.mrf.mxu0  ;;  %v5625_v25 = vpop.f32.mrf.mxu1 }
 0x4c7   : > { %v10942_v9 = vpop.f32.mrf.mxu2  ;;  %v10944_v17 = vpop.f32.mrf.mxu3 }
 0x4c8   : > { %11903 = vst [vmem:[#allocation67_spill] sm:$0xff] %v10944_v17  ;;  %v10946_v34 = vpop.f32.mrf.mxu0  ;;  %v10948_v2 = vpop.f32.mrf.mxu1  ;;  %v5545_v17 = vadd.f32 %v5440_v30, %v5372_v41 }
 0x4c9   : > { %11904 = vst [vmem:[#allocation69_spill] sm:$0xff] %v10946_v34  ;;  %v5166_v34 = vadd.f32 %v5042_v12, %v4846_v14  ;;  %v10971_v41 = vpop.permute.xlu0 %6374 }
 0x4ca   : > { %11905 = vst [vmem:[#allocation71_spill] sm:$0xff] %v10948_v2  ;;  %v5750_v2 = vadd.f32 %v5645_v36, %v5545_v17 }
 0x4cf   : > { %v5850_v33 = vpop.f32.mrf.mxu2  ;;  %v5870_v6 = vpop.f32.mrf.mxu3  ;;  %v11912_v48 = vld [vmem:[#allocation67_spill] sm:$0xff] }
 0x4d0   : > { %v5830_v22 = vpop.f32.mrf.mxu1  ;;  %v5810_v52 = vpop.f32.mrf.mxu0  ;;  %v5955_v55 = vadd.f32 %v5850_v33, %v5750_v2  ;;  %v5171_v33 = vadd.f32 %v10914_v16, %v4946_v63 }
 0x4d7   : > { %v10950_v32 = vpop.f32.mrf.mxu2  ;;  %v10952_v49 = vpop.f32.mrf.mxu3 }
 0x4d8   : > { %11906 = vst [vmem:[#allocation72_spill] sm:$0xff] %v10952_v49  ;;  %v10954_v62 = vpop.f32.mrf.mxu1  ;;  %v10956_v42 = vpop.f32.mrf.mxu0  ;;  %v5168_v49 = vadd.f32 %v5082_v38, %v4886_v7 }
 0x4d9   : > { %11907 = vst [vmem:[#allocation76_spill] sm:$0xff] %v10954_v62  ;;  %v5371_v62 = vadd.f32 %v5247_v4, %v5166_v34 }
 0x4da   : > { %11908 = vst [vmem:[#allocation77_spill] sm:$0xff] %v10956_v42  ;;  %v5373_v44 = vadd.f32 %v5287_v8, %v5168_v49 }
 0x4db   : > { %v5544_v39 = vadd.f32 %v5420_v29, %v5371_v62  ;;  %v5165_v62 = vadd.f32 %v10912_v46, %v4826_v28 }
 0x4dc   : > { %v5546_v59 = vadd.f32 %v5460_v27, %v5373_v44  ;;  %v5376_v27 = vadd.f32 %v10924_v37, %v5171_v33 }
 0x4dd   : > { %v5749_v20 = vadd.f32 %v5625_v25, %v5544_v39 }
 0x4de   : > { %v5751_v19 = vadd.f32 %v5665_v58, %v5546_v59  ;;  %v5549_v46 = vadd.f32 %v10934_v5, %v5376_v27 }
 0x4df   : > { %v6055_v56 = vpop.f32.mrf.mxu2  ;;  %v6075_v0 = vpop.f32.mrf.mxu3  ;;  %v5954_v14 = vadd.f32 %v5830_v22, %v5749_v20  ;;  %v5370_v22 = vadd.f32 %v10922_v45, %v5165_v62  ;;  %v11915_v59 = vld [vmem:[#allocation72_spill] sm:$0xff] }
 0x4e0   : > { %v6035_v13 = vpop.f32.mrf.mxu1  ;;  %v6015_v53 = vpop.f32.mrf.mxu0  ;;  %v6160_v21 = vadd.f32 %v6055_v56, %v5955_v55  ;;  %v5956_v49 = vadd.f32 %v5870_v6, %v5751_v19  ;;  %v4926_v6 = vadd.f32 %v10904_v61, %v10882_v57  ;;  %v5754_v37 = vadd.f32 %v10942_v9, %v5549_v46  ;;  %v11913_v44 = vld [vmem:[#allocation76_spill] sm:$0xff] }
 0x4e1   : > { %v6159_v17 = vadd.f32 %v6035_v13, %v5954_v14  ;;  %v5543_v30 = vadd.f32 %v10932_v24, %v5370_v22  ;;  %v11916_v14 = vld [vmem:[#allocation73_spill] sm:$0xff] }
 0x4e2   : > { %v6161_v56 = vadd.f32 %v6075_v0, %v5956_v49  ;;  %v4966_v0 = vadd.f32 %v10910_v50, %v10898_v54  ;;  %v5170_v24 = vadd.f32 %v10920_v51, %v4926_v6  ;;  %v5959_v50 = vadd.f32 %v10950_v32, %v5754_v37  ;;  %v11909_v54 = vld [vmem:[#allocation71_spill] sm:$0xff]  ;;  %v11911_v32 = vld [vmem:[#allocation70_spill] sm:$0xff]  ;;  %v11921_v37 = vld [vmem:[#allocation5_spill] sm:$0xff] }
 0x4e3   : > { %v5748_v16 = vadd.f32 %v5605_v60, %v5543_v30  ;;  %v11917_v49 = vld [vmem:[#allocation75_spill] sm:$0xff] }
 0x4e4   : > { %v5172_v60 = vadd.f32 %v10916_v11, %v4966_v0  ;;  %v5375_v35 = vadd.f32 %v10930_v47, %v5170_v24  ;;  %v11910_v47 = vld [vmem:[#allocation68_spill] sm:$0xff] }
 0x4e5   : > { %v5953_v12 = vadd.f32 %v5810_v52, %v5748_v16 }
 0x4e6   : > { %v5377_v51 = vadd.f32 %v10926_v23, %v5172_v60  ;;  %v5548_v52 = vadd.f32 %v10940_v1, %v5375_v35  ;;  %v11922_v35 = vld [vmem:[#allocation4_spill] sm:$0xff] }
 0x4e7   : > { %v6135_v43 = vpop.f32.mrf.mxu2  ;;  %v10961_v40 = vpop.f32.mrf.mxu3  ;;  %v6158_v26 = vadd.f32 %v6015_v53, %v5953_v12  ;;  %v4906_v53 = vadd.f32 %v11911_v32, %v11910_v47 }
 0x4e8   : > { %v10963_v42 = vpop.f32.mrf.mxu1  ;;  %v10969_v7 = vpop.f32.mrf.mxu0  ;;  %v6164_v57 = vadd.f32 %v6135_v43, %v5959_v50  ;;  %v5550_v15 = vadd.f32 %v10936_v3, %v5377_v51  ;;  %v5753_v18 = vadd.f32 %v11909_v54, %v5548_v52  ;;  %v11914_v43 = vld [vmem:[#allocation74_spill] sm:$0xff] }
 0x4e9   : > { %v5169_v11 = vadd.f32 %v11914_v43, %v4906_v53 }
 0x4ea   : > { %v5755_v23 = vadd.f32 %v11912_v48, %v5550_v15  ;;  %v5958_v31 = vadd.f32 %v11913_v44, %v5753_v18  ;;  %v11923_v15 = vld [vmem:[#allocation3_spill] sm:$0xff] }
 0x4ec   : > { %v5960_v20 = vadd.f32 %v11915_v59, %v5755_v23  ;;  %v6163_v55 = vadd.f32 %v10963_v42, %v5958_v31  ;;  %v11924_v31 = vld [vmem:[#allocation8_spill] sm:$0xff] }
 0x4ee   : > { %v6165_v63 = vadd.f32 %v10961_v40, %v5960_v20  ;;  %v11919_v40 = vld [vmem:[#allocation77_spill] sm:$0xff] }
 0x4ef   : > { %v6260_v34 = vpop.f32.mrf.mxu2  ;;  %v6280_v2 = vpop.f32.mrf.mxu3 }
 0x4f0   : > { %v6365_v25 = vadd.f32 %v6260_v34, %v6160_v21  ;;  %v6240_v36 = vpop.f32.mrf.mxu1  ;;  %v6366_v8 = vadd.f32 %v6280_v2, %v6161_v56  ;;  %v6220_v5 = vpop.f32.mrf.mxu0  ;;  %v5374_v21 = vadd.f32 %v11916_v14, %v5169_v11  ;;  %v11918_v2 = vld [vmem:[#allocation69_spill] sm:$0xff] }
 0x4f1   : > { %v6364_v29 = vadd.f32 %v6240_v36, %v6159_v17  ;;  %v6363_v61 = vadd.f32 %v6220_v5, %v6158_v26  ;;  %v11128_v26 = vld [vmem:[%s11534_s8 + $0x4] sm:$0x7] }
 0x4f2   : > { %v6379_v58 = vadd.f32 %v10971_v41, %v6365_v25  ;;  %v6380_v38 = vadd.f32 %v10971_v41, %v6366_v8  ;;  %v5547_v17 = vadd.f32 %v11917_v49, %v5374_v21  ;;  %v11927_v21 = vld [vmem:[#allocation13_spill] sm:$0xff] }
 0x4f3   : > { %v6378_v13 = vadd.f32 %v10971_v41, %v6364_v29  ;;  %v6377_v1 = vadd.f32 %v10971_v41, %v6363_v61 }
 0x4f4   : > { %v10979_v4 = vmax.f32 %v6379_v58, 0.0  ;;  %v11003_v39 = vmax.f32 %v6380_v38, 0.0  ;;  %v5752_v42 = vadd.f32 %v11918_v2, %v5547_v17  ;;  %v11929_v17 = vld [vmem:[#allocation11_spill] sm:$0xff] }
 0x4f5   : > { %v10985_v45 = vmax.f32 %v6378_v13, 0.0  ;;  %v11024_v34 = vmax.f32 %v6377_v1, 0.0 }
 0x4f6   : > { %6430 = vrot.lane.b32.xlu1 %v10979_v4, %s8724_s20  ;;  %v5957_v22 = vadd.f32 %v11919_v40, %v5752_v42  ;;  %v11930_v42 = vld [vmem:[#allocation14_spill] sm:$0xff]  ;;  %v11931_v40 = vld [vmem:[#allocation9_spill] sm:$0xff] }
 0x4f7   : > { %6395 = vrot.lane.b32.xlu2 %v10985_v45, %s8723_s19  ;;  %6428 = vrot.lane.b32.xlu0 %v10985_v45, %s8724_s20  ;;  %v6340_v9 = vpop.f32.mrf.mxu2  ;;  %v6360_v19 = vpop.f32.mrf.mxu3 }
 0x4f8   : > { %v6369_v10 = vadd.f32 %v6340_v9, %v6164_v57  ;;  %v6320_v3 = vpop.f32.mrf.mxu1  ;;  %v6370_v33 = vadd.f32 %v6360_v19, %v6165_v63  ;;  %v6300_v58 = vpop.f32.mrf.mxu0  ;;  %v6162_v29 = vadd.f32 %v10969_v7, %v5957_v22 }
 0x4f9   : > { %v6368_v62 = vadd.f32 %v6320_v3, %v6163_v55  ;;  %v11925_v3 = vld [vmem:[#allocation6_spill] sm:$0xff]  ;;  %v11926_v55 = vld [vmem:[#allocation7_spill] sm:$0xff] }
 0x4fa   : > { %v6383_v28 = vadd.f32 %v10971_v41, %v6369_v10  ;;  %v6384_v56 = vadd.f32 %v10971_v41, %v6370_v33  ;;  %v6367_v8 = vadd.f32 %v6300_v58, %v6162_v29  ;;  %v11932_v58 = vld [vmem:[#allocation12_spill] sm:$0xff] }
 0x4fb   : > { %v6382_v36 = vadd.f32 %v10971_v41, %v6368_v62  ;;  %v11928_v62 = vld [vmem:[#allocation10_spill] sm:$0xff] }
 0x4fc   : > { %v11027_v25 = vmax.f32 %v6383_v28, 0.0  ;;  %v11042_v30 = vmax.f32 %v6384_v56, 0.0  ;;  %v6381_v13 = vadd.f32 %v10971_v41, %v6367_v8 }
 0x4fd   : > { %v11040_v27 = vmax.f32 %v6382_v36, 0.0 }
 0x4fe   : > { %6399 = vrot.lane.b32.xlu1 %v11003_v39, %s8723_s19  ;;  %v11051_v6 = vmax.f32 %v6381_v13, 0.0  ;;  %v11933_v13 = vld [vmem:[#allocation15_spill] sm:$0xff] }
 0x4ff   : > { %6432 = vrot.lane.b32.xlu2 %v11003_v39, %s8724_s20  ;;  %6397 = vrot.lane.b32.xlu0 %v10979_v4, %s8723_s19 }
 0x506   : > { %6426 = vrot.lane.b32.xlu1 %v11024_v34, %s8724_s20 }
 0x507   : > { %6438 = vrot.lane.b32.xlu2 %v11027_v25, %s8724_s20  ;;  %6393 = vrot.lane.b32.xlu0 %v11024_v34, %s8723_s19 }
 0x50e   : > { %6436 = vrot.lane.b32.xlu1 %v11040_v27, %s8724_s20 }
 0x50f   : > { %6407 = vrot.lane.b32.xlu2 %v11042_v30, %s8723_s19  ;;  %6440 = vrot.lane.b32.xlu0 %v11042_v30, %s8724_s20 }
 0x516   : > { %6405 = vrot.lane.b32.xlu1 %v11027_v25, %s8723_s19 }
 0x517   : > { %6434 = vrot.lane.b32.xlu2 %v11051_v6, %s8724_s20  ;;  %6403 = vrot.lane.b32.xlu0 %v11040_v27, %s8723_s19 }
 0x51e   : > { %6788 = vrot.lane.b32.xlu1 %v10985_v45, %s8725_s21 }
 0x51f   : > { %6790 = vrot.lane.b32.xlu2 %v10979_v4, %s8725_s21  ;;  %6792 = vrot.lane.b32.xlu0 %v11003_v39, %s8725_s21 }
 0x526   : > { %6800 = vrot.lane.b32.xlu1 %v11042_v30, %s8725_s21 }
 0x527   : > { %6786 = vrot.lane.b32.xlu2 %v11024_v34, %s8725_s21  ;;  %6798 = vrot.lane.b32.xlu0 %v11027_v25, %s8725_s21 }
 0x52e   : > { %6401 = vrot.lane.b32.xlu1 %v11051_v6, %s8723_s19 }
 0x52f   : > { %6796 = vrot.lane.b32.xlu2 %v11040_v27, %s8725_s21  ;;  %6993 = vrot.lane.b32.xlu0 %v10985_v45, %s8726_s22 }
 0x536   : > { %6995 = vrot.lane.b32.xlu1 %v10979_v4, %s8726_s22 }
 0x537   : > { %6997 = vrot.lane.b32.xlu2 %v11003_v39, %s8726_s22  ;;  %6794 = vrot.lane.b32.xlu0 %v11051_v6, %s8725_s21 }
 0x53e   : > { %6991 = vrot.lane.b32.xlu1 %v11024_v34, %s8726_s22 }
 0x53f   : > { %7003 = vrot.lane.b32.xlu2 %v11027_v25, %s8726_s22  ;;  %7005 = vrot.lane.b32.xlu0 %v11042_v30, %s8726_s22 }
 0x546   : > { %7001 = vrot.lane.b32.xlu1 %v11040_v27, %s8726_s22 }
 0x547   : > { %6999 = vrot.lane.b32.xlu2 %v11051_v6, %s8726_s22  ;;  %7375 = vrot.lane.b32.xlu0 %v11003_v39, %s8727_s23 }
 0x54e   : > { %7369 = vrot.lane.b32.xlu1 %v11024_v34, %s8727_s23 }
 0x54f   : > { %7373 = vrot.lane.b32.xlu2 %v10979_v4, %s8727_s23  ;;  %7371 = vrot.lane.b32.xlu0 %v10985_v45, %s8727_s23 }
 0x551   : > { %v6396_v7 = vpop.permute.xlu2 %6395 }
 0x556   : > { %7379 = vrot.lane.b32.xlu1 %v11040_v27, %s8727_s23 }
 0x557   : > { %7383 = vrot.lane.b32.xlu2 %v11042_v30, %s8727_s23  ;;  %7381 = vrot.lane.b32.xlu0 %v11027_v25, %s8727_s23 }
 0x559   : > { %v6433_v41 = vpop.permute.xlu2 %6432 }
 0x55e   : > { %7377 = vrot.lane.b32.xlu1 %v11051_v6, %s8727_s23 }
 0x55f   : > { %7580 = vrot.lane.b32.xlu2 %v11003_v39, %s8728_s24  ;;  %7574 = vrot.lane.b32.xlu0 %v11024_v34, %s8728_s24 }
 0x561   : > { %v6439_v46 = vpop.permute.xlu2 %6438 }
 0x566   : > { %7578 = vrot.lane.b32.xlu1 %v10979_v4, %s8728_s24 }
 0x567   : > { %7576 = vrot.lane.b32.xlu2 %v10985_v45, %s8728_s24  ;;  %7582 = vrot.lane.b32.xlu0 %v11051_v6, %s8728_s24 }
 0x568   : > { %v6431_v16 = vpop.permute.xlu1 %6430 }
 0x569   : > { %v6446_v24 = vsel %vm484_vm0, %v6431_v16, %v6433_v41  ;;  %v6429_v38 = vpop.permute.xlu0 %6428  ;;  %v6408_v60 = vpop.permute.xlu2 %6407 }
 0x56a   : > { %v6453_v12 = vmul.f32 %v6446_v24, %v11921_v37  ;;  %v6447_v5 = vsel %vm484_vm0, %v6429_v38, %v6431_v16  ;;  %v6425_v16 = vld [vmem:[%s11534_s8] sm:$0x7]  ;;  %v11934_v37 = vld [vmem:[#allocation16_spill] sm:$0xff] }
 0x56b   : > { %v6452_v50 = vmul.f32 %v6447_v5, %v11922_v35  ;;  %v11935_v5 = vld [vmem:[#allocation17_spill] sm:$0xff] }
 0x56c   : > { %6538 = vmatpush.msra.mxu3 %v6453_v12 }
 0x56d   : > { %8615 = vmatmul.msk.f32.vlgmr.msra.gmra.mxu3 %vm2823_vm10, %v11128_v26  ;;  %6518 = vmatpush.msra.mxu2 %v6452_v50 }
 0x56e   : > { %7588 = vrot.lane.b32.xlu1 %v11042_v30, %s8728_s24  ;;  %8614 = vmatmul.msk.f32.vlgmr.msra.gmra.mxu2 %vm2823_vm10, %v11128_v26 }
 0x56f   : > { %7586 = vrot.lane.b32.xlu2 %v11027_v25, %s8728_s24  ;;  %7584 = vrot.lane.b32.xlu0 %v11040_v27, %s8728_s24  ;;  %s11513_s24 = scalar_lea.vmem %s11536_s10, %s8693_s15 }
 0x570   : > { %v11136_v51 = vpop.permute.xlu1 %6399 }
 0x571   : > { %v6398_v9 = vpop.permute.xlu0 %6397  ;;  %v6435_v52 = vpop.permute.xlu2 %6434 }
 0x572   : > { %v6414_v53 = vsel %vm409_vm2, %v6396_v7, %v6398_v9  ;;  %v6413_v44 = vsel %vm409_vm2, %v6398_v9, %v11136_v51  ;;  %v6445_v20 = vsel %vm484_vm0, %v6433_v41, %v6435_v52 }
 0x573   : > { %v6419_v63 = vmul.f32 %v6414_v53, %v11927_v21  ;;  %v6420_v36 = vmul.f32 %v6413_v44, %v11930_v42  ;;  %v6454_v22 = vmul.f32 %v6445_v20, %v11931_v40  ;;  %v11941_v21 = vld [vmem:[#allocation21_spill] sm:$0xff]  ;;  %v11944_v42 = vld [vmem:[#allocation27_spill] sm:$0xff] }
 0x576   : > { %7785 = vrot.lane.b32.xlu1 %v11003_v39, %s8729_s27 }
 0x577   : > { %7779 = vrot.lane.b32.xlu2 %v11024_v34, %s8729_s27  ;;  %7783 = vrot.lane.b32.xlu0 %v10979_v4, %s8729_s27 }
 0x578   : > { %v6427_v57 = vpop.permute.xlu1 %6426 }
 0x579   : > { %v6448_v61 = vsel %vm484_vm0, %v6427_v57, %v6429_v38  ;;  %v6394_v18 = vpop.permute.xlu0 %6393  ;;  %v11151_v10 = vpop.permute.xlu2 %6790 }
 0x57a   : > { %v6451_v54 = vmul.f32 %v6448_v61, %v11923_v15  ;;  %v6415_v47 = vsel %vm409_vm2, %v6394_v18, %v6396_v7  ;;  %v6416_v2 = vsel %vm409_vm2, %v6408_v60, %v6394_v18  ;;  %v8628_v18 = vld [vmem:[%s11534_s8 + $0x8] sm:$0x7] }
 0x57b   : > { %v6418_v28 = vmul.f32 %v6415_v47, %v11926_v55  ;;  %v6417_v29 = vmul.f32 %v6416_v2, %v11932_v58  ;;  %v11940_v55 = vld [vmem:[#allocation19_spill] sm:$0xff] }
 0x57c   : > { %6498 = vmatpush.msra.mxu1 %v6451_v54 }
 0x57d   : > { %8613 = vmatmul.msk.f32.vlgmr.msra.gmra.mxu1 %vm2823_vm10, %v11128_v26 }
 0x57e   : > { %7781 = vrot.lane.b32.xlu1 %v10985_v45, %s8729_s27 }
 0x57f   : > { %7787 = vrot.lane.b32.xlu2 %v11051_v6, %s8729_s27  ;;  %7793 = vrot.lane.b32.xlu0 %v11042_v30, %s8729_s27 }
 0x580   : > { %v6437_v32 = vpop.permute.xlu1 %6436 }
 0x581   : > { %v6443_v48 = vsel %vm484_vm0, %v6437_v32, %v6439_v46  ;;  %v6444_v23 = vsel %vm484_vm0, %v6435_v52, %v6437_v32  ;;  %v6441_v11 = vpop.permute.xlu0 %6440  ;;  %v11174_v59 = vpop.permute.xlu2 %6786  ;;  %v11936_v52 = vld [vmem:[#allocation22_spill] sm:$0xff]  ;;  %v11937_v32 = vld [vmem:[#allocation24_spill] sm:$0xff] }
 0x582   : > { %v6455_v1 = vmul.f32 %v6444_v23, %v11924_v31  ;;  %v6456_v43 = vmul.f32 %v6443_v48, %v11925_v3  ;;  %v6442_v19 = vsel %vm484_vm0, %v6439_v46, %v6441_v11  ;;  %v6449_v14 = vsel %vm484_vm0, %v6441_v11, %v6427_v57  ;;  %v11938_v48 = vld [vmem:[#allocation25_spill] sm:$0xff]  ;;  %v11939_v11 = vld [vmem:[#allocation18_spill] sm:$0xff] }
 0x583   : > { %v6450_v49 = vmul.f32 %v6449_v14, %v11928_v62  ;;  %v6457_v33 = vmul.f32 %v6442_v19, %v11929_v17  ;;  %v11942_v62 = vld [vmem:[#allocation23_spill] sm:$0xff] }
 0x584   : > { %6578 = vmatpush.msrb.mxu1 %v6455_v1  ;;  %6598 = vmatpush.msrb.mxu2 %v6456_v43 }
 0x585   : > { %8618 = vmatmul.msk.f32.vlgmr.msrb.gmra.mxu2 %vm2823_vm10, %v11128_v26  ;;  %6478 = vmatpush.msra.mxu0 %v6450_v49 }
 0x586   : > { %6661 = vmatpush.msra.mxu1 %v6418_v28  ;;  %6681 = vmatpush.msra.mxu2 %v6419_v63 }
 0x587   : > { %7791 = vrot.lane.b32.xlu1 %v11027_v25, %s8729_s27  ;;  %6618 = vmatpush.msrb.mxu3 %v6457_v33  ;;  %v11943_v33 = vld [vmem:[#allocation28_spill] sm:$0xff] }
 0x588   : > { %8612 = vmatmul.msk.f32.vlgmr.msra.gmra.mxu0 %vm2823_vm10, %v11128_v26  ;;  %8619 = vmatmul.msk.f32.vlgmr.msrb.gmra.mxu3 %vm2823_vm10, %v11128_v26  ;;  %v6406_v56 = vpop.permute.xlu1 %6405 }
 0x589   : > { %6558 = vmatpush.msrb.mxu0 %v6454_v22  ;;  %6701 = vmatpush.msra.mxu3 %v6420_v36  ;;  %v6409_v8 = vsel %vm409_vm2, %v6406_v56, %v6408_v60  ;;  %v6404_v41 = vpop.permute.xlu0 %6403  ;;  %v11206_v46 = vpop.permute.xlu2 %6796 }
 0x58a   : > { %7789 = vrot.lane.b32.xlu2 %v11040_v27, %s8729_s27  ;;  %7990 = vrot.lane.b32.xlu0 %v11003_v39, %s8730_s12  ;;  %v6424_v7 = vmul.f32 %v6409_v8, %v11933_v13  ;;  %v6410_v24 = vsel %vm409_vm2, %v6404_v41, %v6406_v56  ;;  %v11946_v13 = vld [vmem:[#allocation20_spill] sm:$0xff] }
 0x58b   : > { %6641 = vmatpush.msra.mxu0 %v6417_v29  ;;  %8617 = vmatmul.msk.f32.vlgmr.msrb.gmra.mxu1 %vm2823_vm10, %v11128_v26  ;;  %v6423_v12 = vmul.f32 %v6410_v24, %v11934_v37  ;;  %v11945_v29 = vld [vmem:[#allocation26_spill] sm:$0xff] }
 0x58c   : > { %6781 = vmatpush.msrb.mxu3 %v6424_v7  ;;  %v11947_v37 = vld [vmem:[#allocation30_spill] sm:$0xff] }
 0x58d   : > { %8622 = vmatmul.msk.f32.vlgmr.msra.gmra.mxu2 %vm2823_vm10, %v6425_v16 }
 0x58e   : > { %6761 = vmatpush.msrb.mxu2 %v6423_v12 }
 0x58f   : > { %7992 = vrot.lane.b32.xlu1 %v11051_v6, %s8730_s12 }
 0x590   : > { %8616 = vmatmul.msk.f32.vlgmr.msrb.gmra.mxu0 %vm2823_vm10, %v11128_v26  ;;  %8623 = vmatmul.msk.f32.vlgmr.msra.gmra.mxu3 %vm2823_vm10, %v6425_v16  ;;  %v6789_v38 = vpop.permute.xlu1 %6788 }
 0x591   : > { %v6807_v60 = vsel %vm937_vm4, %v6789_v38, %v11151_v10  ;;  %v6793_v50 = vpop.permute.xlu0 %6792  ;;  %v11230_v9 = vpop.permute.xlu2 %6997  ;;  %v6808_v31 = vsel %vm937_vm4, %v11174_v59, %v6789_v38 }
 0x592   : > { %7988 = vrot.lane.b32.xlu2 %v10979_v4, %s8730_s12  ;;  %7986 = vrot.lane.b32.xlu0 %v10985_v45, %s8730_s12  ;;  %v6812_v35 = vmul.f32 %v6807_v60, %v11935_v5  ;;  %v6806_v26 = vsel %vm937_vm4, %v11151_v10, %v6793_v50  ;;  %v6811_v63 = vmul.f32 %v6808_v31, %v11941_v21 }
 0x593   : > { %8621 = vmatmul.msk.f32.vlgmr.msra.gmra.mxu1 %vm2823_vm10, %v6425_v16  ;;  %v6813_v57 = vmul.f32 %v6806_v26, %v11936_v52  ;;  %v11949_v52 = vld [vmem:[#allocation34_spill] sm:$0xff] }
 0x594   : > { %6878 = vmatpush.msra.mxu2 %v6812_v35 }
 0x595   : > { %8626 = vmatmul.msk.f32.vlgmr.msrb.gmra.mxu2 %vm2823_vm10, %v6425_v16  ;;  %6898 = vmatpush.msra.mxu3 %v6813_v57 }
 0x597   : > { %7984 = vrot.lane.b32.xlu1 %v11024_v34, %s8730_s12 }
 0x598   : > { %8620 = vmatmul.msk.f32.vlgmr.msra.gmra.mxu0 %vm2823_vm10, %v6425_v16  ;;  %8627 = vmatmul.msk.f32.vlgmr.msrb.gmra.mxu3 %vm2823_vm10, %v6425_v16  ;;  %v6801_v61 = vpop.permute.xlu1 %6800 }
 0x599   : > { %v6799_v15 = vpop.permute.xlu0 %6798  ;;  %v11246_v54 = vpop.permute.xlu2 %7003  ;;  %v6809_v1 = vsel %vm937_vm4, %v6801_v61, %v11174_v59 }
 0x59a   : > { %7998 = vrot.lane.b32.xlu2 %v11042_v30, %s8730_s12  ;;  %7996 = vrot.lane.b32.xlu0 %v11027_v25, %s8730_s12  ;;  %v6802_v10 = vsel %vm937_vm4, %v6799_v15, %v6801_v61  ;;  %v6803_v47 = vsel %vm937_vm4, %v11206_v46, %v6799_v15  ;;  %v6810_v49 = vmul.f32 %v6809_v1, %v11942_v62  ;;  %v11950_v61 = vld [vmem:[#allocation32_spill] sm:$0xff]  ;;  %v11953_v1 = vld [vmem:[#allocation35_spill] sm:$0xff] }
 0x59b   : > { %v6816_v53 = vmul.f32 %v6803_v47, %v11937_v32  ;;  %v6817_v23 = vmul.f32 %v6802_v10, %v11938_v48  ;;  %v11951_v32 = vld [vmem:[#allocation31_spill] sm:$0xff] }
 0x59d   : > { %8631 = vmatmul.msk.f32.vlgmr.msra.gmra.mxu2 %vm2823_vm10, %v8628_v18  ;;  %6978 = vmatpush.msrb.mxu3 %v6817_v23 }
 0x59e   : > { %6958 = vmatpush.msrb.mxu2 %v6816_v53 }
 0x59f   : > { %7994 = vrot.lane.b32.xlu1 %v11040_v27, %s8730_s12 }
 0x5a0   : > { %8632 = vmatmul.msk.f32.vlgmr.msra.gmra.mxu3 %vm2823_vm10, %v8628_v18  ;;  %v6402_v44 = vpop.permute.xlu1 %6401 }
 0x5a1   : > { %v6411_v3 = vsel %vm409_vm2, %v6402_v44, %v6404_v41  ;;  %v6412_v43 = vsel %vm409_vm2, %v11136_v51, %v6402_v44  ;;  %v6994_v19 = vpop.permute.xlu0 %6993  ;;  %v7000_v14 = vpop.permute.xlu2 %6999  ;;  %v8637_v41 = vld [vmem:[%s11534_s8 + $0xc] sm:$0x7] }
 0x5a2   : > { %v6421_v20 = vmul.f32 %v6412_v43, %v11939_v11  ;;  %v6422_v28 = vmul.f32 %v6411_v3, %v11940_v55  ;;  %v7010_v24 = vsel %vm1209_vm5, %v11230_v9, %v7000_v14  ;;  %v11955_v55 = vld [vmem:[#allocation38_spill] sm:$0xff] }
 0x5a3   : > { %v7019_v15 = vmul.f32 %v7010_v24, %v11950_v61  ;;  %v11965_v61 = vld [vmem:[#allocation49_spill] sm:$0xff] }
 0x5a4   : > { %6721 = vmatpush.msrb.mxu0 %v6421_v20  ;;  %6741 = vmatpush.msrb.mxu1 %v6422_v28  ;;  %v11956_v28 = vld [vmem:[#allocation37_spill] sm:$0xff] }
 0x5a5   : > { %8624 = vmatmul.msk.f32.vlgmr.msrb.gmra.mxu0 %vm2823_vm10, %v6425_v16  ;;  %8625 = vmatmul.msk.f32.vlgmr.msrb.gmra.mxu1 %vm2823_vm10, %v6425_v16 }
 0x5a6   : > { %6838 = vmatpush.msra.mxu0 %v6810_v49  ;;  %6858 = vmatpush.msra.mxu1 %v6811_v63 }
 0x5a7   : > { %8635 = vmatmul.msk.f32.vlgmr.msrb.gmra.mxu2 %vm2823_vm10, %v8628_v18 }
 0x5a8   : > { %8636 = vmatmul.msk.f32.vlgmr.msrb.gmra.mxu3 %vm2823_vm10, %v8628_v18  ;;  %v6996_v51 = vpop.permute.xlu1 %6995 }
 0x5a9   : > { %v7011_v59 = vsel %vm1209_vm5, %v6996_v51, %v11230_v9  ;;  %v7012_v17 = vsel %vm1209_vm5, %v6994_v19, %v6996_v51  ;;  %v6795_v40 = vpop.permute.xlu0 %6794  ;;  %v11288_v22 = vpop.permute.xlu2 %7373  ;;  %v11957_v51 = vld [vmem:[#allocation36_spill] sm:$0xff] }
 0x5aa   : > { %v7017_v2 = vmul.f32 %v7012_v17, %v11943_v33  ;;  %v7018_v36 = vmul.f32 %v7011_v59, %v11944_v42  ;;  %v6804_v56 = vsel %vm937_vm4, %v6795_v40, %v11206_v46  ;;  %v6805_v58 = vsel %vm937_vm4, %v6793_v50, %v6795_v40  ;;  %v11948_v50 = vld [vmem:[#allocation33_spill] sm:$0xff]  ;;  %v11959_v40 = vld [vmem:[#allocation43_spill] sm:$0xff] }
 0x5ab   : > { %v6814_v8 = vmul.f32 %v6805_v58, %v11945_v29  ;;  %v6815_v7 = vmul.f32 %v6804_v56, %v11946_v13  ;;  %v11960_v56 = vld [vmem:[#allocation40_spill] sm:$0xff] }
 0x5ac   : > { %7083 = vmatpush.msra.mxu2 %v7017_v2  ;;  %7103 = vmatpush.msra.mxu3 %v7018_v36  ;;  %v11958_v2 = vld [vmem:[#allocation42_spill] sm:$0xff]  ;;  %v8655_v36 = vld [vmem:[%s11534_s8 + $0x14] sm:$0x7] }
 0x5ad   : > { %8629 = vmatmul.msk.f32.vlgmr.msra.gmra.mxu0 %vm2823_vm10, %v8628_v18  ;;  %8630 = vmatmul.msk.f32.vlgmr.msra.gmra.mxu1 %vm2823_vm10, %v8628_v18 }
 0x5ae   : > { %6918 = vmatpush.msrb.mxu0 %v6814_v8  ;;  %6938 = vmatpush.msrb.mxu1 %v6815_v7 }
 0x5af   : > { %8640 = vmatmul.msk.f32.vlgmr.msra.gmra.mxu2 %vm2823_vm10, %v8637_v41 }
 0x5b0   : > { %8641 = vmatmul.msk.f32.vlgmr.msra.gmra.mxu3 %vm2823_vm10, %v8637_v41  ;;  %v6992_v46 = vpop.permute.xlu1 %6991 }
 0x5b1   : > { %v7013_v16 = vsel %vm1209_vm5, %v6992_v46, %v6994_v19  ;;  %v7006_v38 = vpop.permute.xlu0 %7005  ;;  %v11315_v35 = vpop.permute.xlu2 %7383 }
 0x5b2   : > { %v7016_v12 = vmul.f32 %v7013_v16, %v11947_v37  ;;  %v7007_v60 = vsel %vm1209_vm5, %v11246_v54, %v7006_v38  ;;  %v7014_v5 = vsel %vm1209_vm5, %v7006_v38, %v6992_v46  ;;  %v11962_v37 = vld [vmem:[#allocation44_spill] sm:$0xff] }
 0x5b3   : > { %v7015_v26 = vmul.f32 %v7014_v5, %v11948_v50  ;;  %v7022_v57 = vmul.f32 %v7007_v60, %v11949_v52  ;;  %v11963_v60 = vld [vmem:[#allocation45_spill] sm:$0xff] }
 0x5b4   : > { %7063 = vmatpush.msra.mxu1 %v7016_v12 }
 0x5b5   : > { %8633 = vmatmul.msk.f32.vlgmr.msrb.gmra.mxu0 %vm2823_vm10, %v8628_v18  ;;  %8634 = vmatmul.msk.f32.vlgmr.msrb.gmra.mxu1 %vm2823_vm10, %v8628_v18  ;;  %v11952_v18 = vld [vmem:[#allocation29_spill] sm:$0xff] }
 0x5b6   : > { %7043 = vmatpush.msra.mxu0 %v7015_v26  ;;  %7183 = vmatpush.msrb.mxu3 %v7022_v57 }
 0x5b8   : > { %7123 = vmatpush.msrb.mxu0 %v7019_v15  ;;  %7276 = vmatpush.msra.mxu3 %v11003_v39  ;;  %v7002_v9 = vpop.permute.xlu1 %7001 }
 0x5b9   : > { %8645 = vmatmul.msk.f32.vlgmr.msrb.gmra.mxu3 %vm2823_vm10, %v8637_v41  ;;  %v7008_v10 = vsel %vm1209_vm5, %v7002_v9, %v11246_v54  ;;  %v7009_v47 = vsel %vm1209_vm5, %v7000_v14, %v7002_v9  ;;  %v7376_v23 = vpop.permute.xlu0 %7375  ;;  %v11332_v39 = vpop.permute.xlu2 %7580  ;;  %v8646_v54 = vld [vmem:[%s11534_s8 + $0x10] sm:$0x7] }
 0x5ba   : > { %7356 = vmatpush.msrb.mxu3 %v11042_v30  ;;  %v7020_v53 = vmul.f32 %v7009_v47, %v11951_v32  ;;  %v7021_v48 = vmul.f32 %v7008_v10, %v11952_v18  ;;  %v7389_v44 = vsel %vm1685_vm6, %v11288_v22, %v7376_v23  ;;  %v11966_v9 = vld [vmem:[#allocation47_spill] sm:$0xff]  ;;  %v8664_v18 = vld [vmem:[%s11534_s8 + $0x18] sm:$0x7] }
 0x5bb   : > { %v7395_v3 = vmul.f32 %v7389_v44, %v11953_v1  ;;  %v11969_v1 = vld [vmem:[#allocation51_spill] sm:$0xff] }
 0x5bc   : > { %7143 = vmatpush.msrb.mxu1 %v7020_v53  ;;  %7163 = vmatpush.msrb.mxu2 %v7021_v48  ;;  %v11967_v48 = vld [vmem:[#allocation50_spill] sm:$0xff] }
 0x5bd   : > { %8638 = vmatmul.msk.f32.vlgmr.msra.gmra.mxu0 %vm2823_vm10, %v8637_v41  ;;  %8639 = vmatmul.msk.f32.vlgmr.msra.gmra.mxu1 %vm2823_vm10, %v8637_v41 }
 0x5be   : > { %8644 = vmatmul.msk.f32.vlgmr.msrb.gmra.mxu2 %vm2823_vm10, %v8637_v41  ;;  %7216 = vmatpush.msra.mxu0 %v11024_v34 }
 0x5bf   : > { %7236 = vmatpush.msra.mxu1 %v10985_v45  ;;  %7256 = vmatpush.msra.mxu2 %v10979_v4 }
 0x5c0   : > { %v7370_v30 = vpop.permute.xlu1 %7369 }
 0x5c1   : > { %7336 = vmatpush.msrb.mxu2 %v11027_v25  ;;  %8650 = vmatmul.msk.f32.vlgmr.msra.gmra.mxu3 %vm2823_vm10, %v8646_v54  ;;  %v7372_v31 = vpop.permute.xlu0 %7371  ;;  %v7577_v4 = vpop.permute.xlu2 %7576  ;;  %v7392_v33 = vsel %vm1685_vm6, %v11315_v35, %v7370_v30 }
 0x5c2   : > { %v7391_v34 = vsel %vm1685_vm6, %v7370_v30, %v7372_v31  ;;  %v7390_v25 = vsel %vm1685_vm6, %v7372_v31, %v11288_v22  ;;  %v7400_v58 = vmul.f32 %v7392_v33, %v11960_v56 }
 0x5c3   : > { %v7394_v19 = vmul.f32 %v7390_v25, %v11956_v28 }
 0x5c5   : > { %8642 = vmatmul.msk.f32.vlgmr.msrb.gmra.mxu0 %vm2823_vm10, %v8637_v41  ;;  %8643 = vmatmul.msk.f32.vlgmr.msrb.gmra.mxu1 %vm2823_vm10, %v8637_v41  ;;  %v11961_v41 = vld [vmem:[#allocation41_spill] sm:$0xff] }
 0x5c6   : > { %8649 = vmatmul.msk.f32.vlgmr.msra.gmra.mxu2 %vm2823_vm10, %v8646_v54  ;;  %7296 = vmatpush.msrb.mxu0 %v11051_v6  ;;  %v11954_v6 = vld [vmem:[#allocation39_spill] sm:$0xff] }
 0x5c7   : > { %7316 = vmatpush.msrb.mxu1 %v11040_v27  ;;  %7461 = vmatpush.msra.mxu2 %v7395_v3  ;;  %v7393_v20 = vmul.f32 %v7391_v34, %v11954_v6  ;;  %v11970_v34 = vld [vmem:[#allocation52_spill] sm:$0xff] }
 0x5c8   : > { %v7380_v45 = vpop.permute.xlu1 %7379 }
 0x5c9   : > { %8654 = vmatmul.msk.f32.vlgmr.msrb.gmra.mxu3 %vm2823_vm10, %v8646_v54  ;;  %v7382_v43 = vpop.permute.xlu0 %7381  ;;  %v7587_v21 = vpop.permute.xlu2 %7586 }
 0x5ca   : > { %v7385_v11 = vsel %vm1685_vm6, %v7382_v43, %v11315_v35  ;;  %v7386_v49 = vsel %vm1685_vm6, %v7380_v45, %v7382_v43  ;;  %v11964_v35 = vld [vmem:[#allocation46_spill] sm:$0xff] }
 0x5cb   : > { %v7399_v27 = vmul.f32 %v7385_v11, %v11955_v55  ;;  %v7398_v22 = vmul.f32 %v7386_v49, %v11959_v40  ;;  %v11973_v49 = vld [vmem:[#allocation56_spill] sm:$0xff] }
 0x5cd   : > { %8647 = vmatmul.msk.f32.vlgmr.msra.gmra.mxu0 %vm2823_vm10, %v8646_v54  ;;  %8648 = vmatmul.msk.f32.vlgmr.msra.gmra.mxu1 %vm2823_vm10, %v8646_v54 }
 0x5ce   : > { %8653 = vmatmul.msk.f32.vlgmr.msrb.gmra.mxu2 %vm2823_vm10, %v8646_v54  ;;  %7421 = vmatpush.msra.mxu0 %v7393_v20 }
 0x5cf   : > { %7441 = vmatpush.msra.mxu1 %v7394_v19  ;;  %7541 = vmatpush.msrb.mxu2 %v7399_v27  ;;  %v11971_v27 = vld [vmem:[#allocation54_spill] sm:$0xff]  ;;  %v11972_v19 = vld [vmem:[#allocation53_spill] sm:$0xff] }
 0x5d0   : > { %v7378_v14 = vpop.permute.xlu1 %7377 }
 0x5d1   : > { %v7387_v63 = vsel %vm1685_vm6, %v7378_v14, %v7380_v45  ;;  %v7388_v62 = vsel %vm1685_vm6, %v7376_v23, %v7378_v14  ;;  %v7575_v17 = vpop.permute.xlu0 %7574  ;;  %v7780_v24 = vpop.permute.xlu2 %7779 }
 0x5d2   : > { %v7396_v59 = vmul.f32 %v7388_v62, %v11957_v51  ;;  %v7397_v42 = vmul.f32 %v7387_v63, %v11958_v2  ;;  %v7596_v7 = vsel %vm1957_vm7, %v7575_v17, %v7577_v4  ;;  %v8673_v62 = vld [vmem:[%s11534_s8 + $0x1c] sm:$0x7] }
 0x5d3   : > { %v7598_v50 = vmul.f32 %v7596_v7, %v11964_v35 }
 0x5d4   : > { %7481 = vmatpush.msra.mxu3 %v7396_v59  ;;  %v11974_v59 = vld [vmem:[#allocation57_spill] sm:$0xff] }
 0x5d5   : > { %8651 = vmatmul.msk.f32.vlgmr.msrb.gmra.mxu0 %vm2823_vm10, %v8646_v54  ;;  %8652 = vmatmul.msk.f32.vlgmr.msrb.gmra.mxu1 %vm2823_vm10, %v8646_v54 }
 0x5d6   : > { %8658 = vmatmul.msk.f32.vlgmr.msra.gmra.mxu2 %vm2823_vm10, %v8655_v36  ;;  %8659 = vmatmul.msk.f32.vlgmr.msra.gmra.mxu3 %vm2823_vm10, %v8655_v36 }
 0x5d7   : > { %7501 = vmatpush.msrb.mxu0 %v7397_v42  ;;  %7521 = vmatpush.msrb.mxu1 %v7398_v22  ;;  %v11976_v22 = vld [vmem:[#allocation55_spill] sm:$0xff] }
 0x5d8   : > { %7561 = vmatpush.msrb.mxu3 %v7400_v58  ;;  %v7579_v29 = vpop.permute.xlu1 %7578 }
 0x5d9   : > { %v7594_v8 = vsel %vm1957_vm7, %v7579_v29, %v11332_v39  ;;  %v7595_v13 = vsel %vm1957_vm7, %v7577_v4, %v7579_v29  ;;  %v7583_v16 = vpop.permute.xlu0 %7582  ;;  %v7788_v30 = vpop.permute.xlu2 %7787 }
 0x5da   : > { %v7600_v46 = vmul.f32 %v7594_v8, %v11961_v41  ;;  %v7599_v12 = vmul.f32 %v7595_v13, %v11962_v37  ;;  %v7593_v38 = vsel %vm1957_vm7, %v11332_v39, %v7583_v16  ;;  %v11968_v39 = vld [vmem:[#allocation48_spill] sm:$0xff] }
 0x5db   : > { %v7601_v5 = vmul.f32 %v7593_v38, %v11963_v60  ;;  %v11977_v13 = vld [vmem:[#allocation60_spill] sm:$0xff] }
 0x5dc   : > { %7666 = vmatpush.msra.mxu2 %v7600_v46 }
 0x5dd   : > { %8656 = vmatmul.msk.f32.vlgmr.msra.gmra.mxu0 %vm2823_vm10, %v8655_v36  ;;  %8657 = vmatmul.msk.f32.vlgmr.msra.gmra.mxu1 %vm2823_vm10, %v8655_v36 }
 0x5de   : > { %8662 = vmatmul.msk.f32.vlgmr.msrb.gmra.mxu2 %vm2823_vm10, %v8655_v36  ;;  %8663 = vmatmul.msk.f32.vlgmr.msrb.gmra.mxu3 %vm2823_vm10, %v8655_v36 }
 0x5df   : > { %7626 = vmatpush.msra.mxu0 %v7598_v50  ;;  %7646 = vmatpush.msra.mxu1 %v7599_v12  ;;  %v11978_v12 = vld [vmem:[#allocation61_spill] sm:$0xff] }
 0x5e0   : > { %7686 = vmatpush.msra.mxu3 %v7601_v5  ;;  %v7589_v26 = vpop.permute.xlu1 %7588  ;;  %v8682_v5 = vld [vmem:[%s11534_s8 + $0x20] sm:$0x7] }
 0x5e1   : > { %v7590_v52 = vsel %vm1957_vm7, %v7587_v21, %v7589_v26  ;;  %v7597_v57 = vsel %vm1957_vm7, %v7589_v26, %v7575_v17  ;;  %v7585_v47 = vpop.permute.xlu0 %7584  ;;  %v11979_v26 = vld [vmem:[#allocation59_spill] sm:$0xff] }
 0x5e2   : > { %v7604_v15 = vmul.f32 %v7590_v52, %v11965_v61  ;;  %v7605_v10 = vmul.f32 %v7597_v57, %v11966_v9  ;;  %v7591_v32 = vsel %vm1957_vm7, %v7585_v47, %v7587_v21  ;;  %v7592_v53 = vsel %vm1957_vm7, %v7583_v16, %v7585_v47 }
 0x5e3   : > { %v7602_v23 = vmul.f32 %v7592_v53, %v11967_v48  ;;  %v7603_v54 = vmul.f32 %v7591_v32, %v11968_v39  ;;  %v11980_v32 = vld [vmem:[#allocation62_spill] sm:$0xff] }
 0x5e4   : > { %7746 = vmatpush.msrb.mxu2 %v7604_v15  ;;  %7766 = vmatpush.msrb.mxu3 %v7605_v10  ;;  %v7790_v43 = vpop.permute.xlu2 %7789 }
 0x5e5   : > { %8660 = vmatmul.msk.f32.vlgmr.msrb.gmra.mxu0 %vm2823_vm10, %v8655_v36  ;;  %8661 = vmatmul.msk.f32.vlgmr.msrb.gmra.mxu1 %vm2823_vm10, %v8655_v36  ;;  %v7797_v55 = vsel %vm2229_vm8, %v7788_v30, %v7790_v43  ;;  %v11975_v36 = vld [vmem:[#allocation58_spill] sm:$0xff] }
 0x5e6   : > { %8667 = vmatmul.msk.f32.vlgmr.msra.gmra.mxu2 %vm2823_vm10, %v8664_v18  ;;  %8668 = vmatmul.msk.f32.vlgmr.msra.gmra.mxu3 %vm2823_vm10, %v8664_v18  ;;  %v7807_v17 = vmul.f32 %v7797_v55, %v11974_v59  ;;  %v11984_v55 = vld [vmem:[#allocation66_spill] sm:$0xff] }
 0x5e7   : > { %7706 = vmatpush.msrb.mxu0 %v7602_v23  ;;  %7726 = vmatpush.msrb.mxu1 %v7603_v54  ;;  %v8189_v54 = vld [vmem:[%s11535_s9] sm:$0x7] }
 0x5e8   : > { %v7786_v44 = vpop.permute.xlu1 %7785  ;;  %8192 = vperm.xlu2 %8714, %v8189_v54  }
 0x5e9   : > { %v7798_v31 = vsel %vm2229_vm8, %v7786_v44, %v7788_v30  ;;  %v7784_v4 = vpop.permute.xlu0 %7783 }
 0x5ea   : > { %v7806_v3 = vmul.f32 %v7798_v31, %v11969_v1  ;;  %v7799_v45 = vsel %vm2229_vm8, %v7784_v4, %v7786_v44  ;;  %v11982_v31 = vld [vmem:[#allocation64_spill] sm:$0xff] }
 0x5eb   : > { %v7805_v25 = vmul.f32 %v7799_v45, %v11970_v34 }
 0x5ec   : > { %7891 = vmatpush.msra.mxu3 %v7806_v3  ;;  %v7989_v58 = vpop.permute.xlu2 %7988 }
 0x5ed   : > { %8665 = vmatmul.msk.f32.vlgmr.msra.gmra.mxu0 %vm2823_vm10, %v8664_v18  ;;  %8666 = vmatmul.msk.f32.vlgmr.msra.gmra.mxu1 %vm2823_vm10, %v8664_v18 }
 0x5ee   : > { %8671 = vmatmul.msk.f32.vlgmr.msrb.gmra.mxu2 %vm2823_vm10, %v8664_v18  ;;  %8672 = vmatmul.msk.f32.vlgmr.msrb.gmra.mxu3 %vm2823_vm10, %v8664_v18 }
 0x5ef   : > { %7871 = vmatpush.msra.mxu2 %v7805_v25 }
 0x5f0   : > { %v7782_v11 = vpop.permute.xlu1 %7781 }
 0x5f1   : > { %v7800_v6 = vsel %vm2229_vm8, %v7782_v11, %v7784_v4  ;;  %v7801_v20 = vsel %vm2229_vm8, %v7780_v24, %v7782_v11  ;;  %v7794_v21 = vpop.permute.xlu0 %7793  ;;  %v6520_v41 = vpop.f32.mrf.mxu2 }
 0x5f2   : > { %v7803_v28 = vmul.f32 %v7801_v20, %v11971_v27  ;;  %v7804_v14 = vmul.f32 %v7800_v6, %v11972_v19  ;;  %v7802_v63 = vsel %vm2229_vm8, %v7794_v21, %v7780_v24  ;;  %v6540_v24 = vpop.f32.mrf.mxu3  ;;  %v11983_v6 = vld [vmem:[#allocation65_spill] sm:$0xff] }
 0x5f3   : > { %v7810_v51 = vmul.f32 %v7802_v63, %v11973_v49 }
 0x5f4   : > { %7831 = vmatpush.msra.mxu0 %v7803_v28  ;;  %7851 = vmatpush.msra.mxu1 %v7804_v14  ;;  %v7999_v15 = vpop.permute.xlu2 %7998 }
 0x5f5   : > { %8669 = vmatmul.msk.f32.vlgmr.msrb.gmra.mxu0 %vm2823_vm10, %v8664_v18  ;;  %8670 = vmatmul.msk.f32.vlgmr.msrb.gmra.mxu1 %vm2823_vm10, %v8664_v18  ;;  %v11981_v18 = vld [vmem:[#allocation63_spill] sm:$0xff] }
 0x5f6   : > { %8676 = vmatmul.msk.f32.vlgmr.msra.gmra.mxu2 %vm2823_vm10, %v8673_v62  ;;  %8677 = vmatmul.msk.f32.vlgmr.msra.gmra.mxu3 %vm2823_vm10, %v8673_v62 }
 0x5f7   : > { %7911 = vmatpush.msrb.mxu0 %v7807_v17  ;;  %7971 = vmatpush.msrb.mxu3 %v7810_v51 }
 0x5f9   : > { %v7792_v33 = vpop.permute.xlu1 %7791 }
 0x5fa   : > { %v7795_v2 = vsel %vm2229_vm8, %v7792_v33, %v7794_v21  ;;  %v7796_v42 = vsel %vm2229_vm8, %v7790_v43, %v7792_v33  ;;  %v6500_v46 = vpop.f32.mrf.mxu1 }
 0x5fb   : > { %v7808_v40 = vmul.f32 %v7796_v42, %v11975_v36  ;;  %v7809_v56 = vmul.f32 %v7795_v2, %v11976_v22 }
 0x5fc   : > { %v7991_v29 = vpop.permute.xlu0 %7990 }
 0x5fd   : > { %v8004_v8 = vsel %vm2501_vm9, %v7989_v58, %v7991_v29  ;;  %7931 = vmatpush.msrb.mxu1 %v7808_v40  ;;  %7951 = vmatpush.msrb.mxu2 %v7809_v56 }
 0x5fe   : > { %v8010_v7 = vmul.f32 %v8004_v8, %v11977_v13  ;;  %8674 = vmatmul.msk.f32.vlgmr.msra.gmra.mxu0 %vm2823_vm10, %v8673_v62  ;;  %8675 = vmatmul.msk.f32.vlgmr.msra.gmra.mxu1 %vm2823_vm10, %v8673_v62 }
 0x5ff   : > { %8680 = vmatmul.msk.f32.vlgmr.msrb.gmra.mxu2 %vm2823_vm10, %v8673_v62  ;;  %8681 = vmatmul.msk.f32.vlgmr.msrb.gmra.mxu3 %vm2823_vm10, %v8673_v62 }
 0x600   : > { %8076 = vmatpush.msra.mxu2 %v8010_v7 }
 0x601   : > { %v7993_v16 = vpop.permute.xlu1 %7992 }
 0x602   : > { %v8003_v37 = vsel %vm2501_vm9, %v7991_v29, %v7993_v16 }
 0x603   : > { %v8011_v38 = vmul.f32 %v8003_v37, %v11978_v12 }
 0x604   : > { %v7987_v60 = vpop.permute.xlu0 %7986 }
 0x605   : > { %v8005_v35 = vsel %vm2501_vm9, %v7987_v60, %v7989_v58  ;;  %v6480_v50 = vpop.f32.mrf.mxu0  ;;  %8096 = vmatpush.msra.mxu3 %v8011_v38 }
 0x606   : > { %v8009_v52 = vmul.f32 %v8005_v35, %v11979_v26  ;;  %8678 = vmatmul.msk.f32.vlgmr.msrb.gmra.mxu0 %vm2823_vm10, %v8673_v62  ;;  %8679 = vmatmul.msk.f32.vlgmr.msrb.gmra.mxu1 %vm2823_vm10, %v8673_v62 }
 0x607   : > { %8685 = vmatmul.msk.f32.vlgmr.msra.gmra.mxu2 %vm2823_vm10, %v8682_v5  ;;  %8686 = vmatmul.msk.f32.vlgmr.msra.gmra.mxu3 %vm2823_vm10, %v8682_v5 }
 0x608   : > { %8056 = vmatpush.msra.mxu1 %v8009_v52  ;;  %v6600_v57 = vpop.f32.mrf.mxu2  ;;  %v6580_v61 = vpop.f32.mrf.mxu1 }
 0x609   : > { %v7985_v9 = vpop.permute.xlu1 %7984 }
 0x60a   : > { %v8006_v10 = vsel %vm2501_vm9, %v7985_v9, %v7987_v60  ;;  %v8007_v47 = vsel %vm2501_vm9, %v7999_v15, %v7985_v9 }
 0x60b   : > { %v8008_v53 = vmul.f32 %v8006_v10, %v11980_v32  ;;  %v8015_v48 = vmul.f32 %v8007_v47, %v11981_v18  ;;  %v6620_v23 = vpop.f32.mrf.mxu3 }
 0x60c   : > { %v7997_v39 = vpop.permute.xlu0 %7996 }
 0x60d   : > { %v8000_v30 = vsel %vm2501_vm9, %v7997_v39, %v7999_v15  ;;  %v6560_v44 = vpop.f32.mrf.mxu0  ;;  %8036 = vmatpush.msra.mxu0 %v8008_v53  ;;  %8176 = vmatpush.msrb.mxu3 %v8015_v48 }
 0x60e   : > { %v8014_v1 = vmul.f32 %v8000_v30, %v11982_v31  ;;  %8683 = vmatmul.msk.f32.vlgmr.msra.gmra.mxu0 %vm2823_vm10, %v8682_v5  ;;  %8684 = vmatmul.msk.f32.vlgmr.msra.gmra.mxu1 %vm2823_vm10, %v8682_v5 }
 0x60f   : > { %8690 = vmatmul.msk.f32.vlgmr.msrb.gmra.mxu3 %vm2823_vm10, %v8682_v5 }
 0x610   : > { %8156 = vmatpush.msrb.mxu2 %v8014_v1  ;;  %v6683_v3 = vpop.f32.mrf.mxu2  ;;  %v6663_v4 = vpop.f32.mrf.mxu1 }
 0x611   : > { %8689 = vmatmul.msk.f32.vlgmr.msrb.gmra.mxu2 %vm2823_vm10, %v8682_v5  ;;  %v7995_v45 = vpop.permute.xlu1 %7994  ;;  %v6684_v34 = vadd.f32 %v6683_v3, %v6520_v41  ;;  %v6664_v25 = vadd.f32 %v6663_v4, %v6500_v46 }
 0x612   : > { %v8001_v43 = vsel %vm2501_vm9, %v7995_v45, %v7997_v39  ;;  %v8002_v11 = vsel %vm2501_vm9, %v7993_v16, %v7995_v45 }
 0x613   : > { %v8012_v20 = vmul.f32 %v8002_v11, %v11983_v6  ;;  %v8013_v27 = vmul.f32 %v8001_v43, %v11984_v55  ;;  %v6703_v28 = vpop.f32.mrf.mxu3 }
 0x614   : > { %v6704_v19 = vadd.f32 %v6703_v28, %v6540_v24 }
 0x615   : > { %v6643_v14 = vpop.f32.mrf.mxu0  ;;  %8116 = vmatpush.msrb.mxu0 %v8012_v20  ;;  %8136 = vmatpush.msrb.mxu1 %v8013_v27 }
 0x616   : > { %v6644_v21 = vadd.f32 %v6643_v14, %v6480_v50  ;;  %8687 = vmatmul.msk.f32.vlgmr.msrb.gmra.mxu0 %vm2823_vm10, %v8682_v5  ;;  %8688 = vmatmul.msk.f32.vlgmr.msrb.gmra.mxu1 %vm2823_vm10, %v8682_v5 }
 0x618   : > { %v6763_v63 = vpop.f32.mrf.mxu2 }
 0x619   : > { %v6764_v62 = vadd.f32 %v6763_v63, %v6600_v57 }
 0x61b   : > { %v6783_v49 = vpop.f32.mrf.mxu3 }
 0x61c   : > { %v6784_v51 = vadd.f32 %v6783_v49, %v6620_v23 }
 0x620   : > { %v6880_v0 = vpop.f32.mrf.mxu2 }
 0x621   : > { %v6985_v59 = vadd.f32 %v6880_v0, %v6684_v34 }
 0x622   : > { %v6723_v17 = vpop.f32.mrf.mxu0  ;;  %v6743_v33 = vpop.f32.mrf.mxu1 }
 0x623   : > { %v6724_v2 = vadd.f32 %v6723_v17, %v6560_v44  ;;  %v6744_v42 = vadd.f32 %v6743_v33, %v6580_v61  ;;  %v6900_v36 = vpop.f32.mrf.mxu3 }
 0x624   : > { %v6986_v40 = vadd.f32 %v6900_v36, %v6704_v19 }
 0x62a   : > { %v6960_v22 = vpop.f32.mrf.mxu2  ;;  %v6840_v56 = vpop.f32.mrf.mxu0 }
 0x62b   : > { %v6989_v58 = vadd.f32 %v6960_v22, %v6764_v62  ;;  %v6983_v29 = vadd.f32 %v6840_v56, %v6644_v21  ;;  %v6860_v8 = vpop.f32.mrf.mxu1  ;;  %v6980_v13 = vpop.f32.mrf.mxu3 }
 0x62c   : > { %v6984_v7 = vadd.f32 %v6860_v8, %v6664_v25  ;;  %v6990_v41 = vadd.f32 %v6980_v13, %v6784_v51 }
 0x632   : > { %v7085_v46 = vpop.f32.mrf.mxu2  ;;  %v6920_v16 = vpop.f32.mrf.mxu0 }
 0x633   : > { %v7190_v24 = vadd.f32 %v7085_v46, %v6985_v59  ;;  %v6987_v37 = vadd.f32 %v6920_v16, %v6724_v2  ;;  %v6940_v12 = vpop.f32.mrf.mxu1  ;;  %v7105_v38 = vpop.f32.mrf.mxu3 }
 0x634   : > { %v6988_v60 = vadd.f32 %v6940_v12, %v6744_v42  ;;  %v7191_v5 = vadd.f32 %v7105_v38, %v6986_v40 }
 0x63a   : > { %v7045_v35 = vpop.f32.mrf.mxu0 }
 0x63b   : > { %v7188_v50 = vadd.f32 %v7045_v35, %v6983_v29  ;;  %v7065_v26 = vpop.f32.mrf.mxu1 }
 0x63c   : > { %v7185_v52 = vpop.f32.mrf.mxu3  ;;  %v7189_v57 = vadd.f32 %v7065_v26, %v6984_v7 }
 0x63d   : > { %v7195_v61 = vadd.f32 %v7185_v52, %v6990_v41 }
 0x641   : > { %v7165_v15 = vpop.f32.mrf.mxu2 }
 0x642   : > { %v11505_v9 = vadd.f32 %v7165_v15, %v6989_v58  ;;  %v7125_v10 = vpop.f32.mrf.mxu0 }
 0x643   : > { %v7192_v47 = vadd.f32 %v7125_v10, %v6987_v37  ;;  %v7145_v32 = vpop.f32.mrf.mxu1  ;;  %v8193_v37 = vpop.permute.xlu2 %8192 }
 0x644   : > { %v7193_v53 = vadd.f32 %v7145_v32, %v6988_v60  ;;  %v7278_v18 = vpop.f32.mrf.mxu3 }
 0x645   : > { %v7364_v17 = vadd.f32 %v7278_v18, %v7191_v5 }
 0x649   : > { %v7258_v48 = vpop.f32.mrf.mxu2 }
 0x64a   : > { %v7218_v23 = vpop.f32.mrf.mxu0  ;;  %v7363_v33 = vadd.f32 %v7258_v48, %v7190_v24 }
 0x64b   : > { %v7238_v39 = vpop.f32.mrf.mxu1  ;;  %v7361_v36 = vadd.f32 %v7218_v23, %v7188_v50 }
 0x64c   : > { %v7358_v54 = vpop.f32.mrf.mxu3  ;;  %v7362_v40 = vadd.f32 %v7238_v39, %v7189_v57 }
 0x64d   : > { %v7368_v24 = vadd.f32 %v7358_v54, %v7195_v61 }
 0x651   : > { %v7338_v30 = vpop.f32.mrf.mxu2 }
 0x652   : > { %v7298_v44 = vpop.f32.mrf.mxu0  ;;  %v7367_v18 = vadd.f32 %v7338_v30, %v11505_v9 }
 0x653   : > { %v7318_v31 = vpop.f32.mrf.mxu1  ;;  %v7365_v57 = vadd.f32 %v7298_v44, %v7192_v47 }
 0x654   : > { %v7366_v15 = vadd.f32 %v7318_v31, %v7193_v53 }
 0x659   : > { %v7463_v1 = vpop.f32.mrf.mxu2  ;;  %v7483_v3 = vpop.f32.mrf.mxu3 }
 0x65a   : > { %v7423_v4 = vpop.f32.mrf.mxu0  ;;  %v7568_v22 = vadd.f32 %v7463_v1, %v7363_v33  ;;  %v7569_v56 = vadd.f32 %v7483_v3, %v7364_v17 }
 0x65b   : > { %v7443_v45 = vpop.f32.mrf.mxu1  ;;  %v7566_v58 = vadd.f32 %v7423_v4, %v7361_v36 }
 0x65c   : > { %v7567_v29 = vadd.f32 %v7443_v45, %v7362_v40 }
 0x661   : > { %v7543_v34 = vpop.f32.mrf.mxu2  ;;  %v7563_v25 = vpop.f32.mrf.mxu3 }
 0x662   : > { %v7503_v43 = vpop.f32.mrf.mxu0  ;;  %v7573_v48 = vadd.f32 %v7563_v25, %v7368_v24  ;;  %v7572_v4 = vadd.f32 %v7543_v34, %v7367_v18 }
 0x663   : > { %v7523_v11 = vpop.f32.mrf.mxu1  ;;  %v7570_v39 = vadd.f32 %v7503_v43, %v7365_v57 }
 0x664   : > { %v7571_v1 = vadd.f32 %v7523_v11, %v7366_v15 }
 0x669   : > { %v7668_v6 = vpop.f32.mrf.mxu2  ;;  %v7688_v20 = vpop.f32.mrf.mxu3 }
 0x66a   : > { %v7628_v55 = vpop.f32.mrf.mxu0  ;;  %v7773_v8 = vadd.f32 %v7668_v6, %v7568_v22  ;;  %v7774_v13 = vadd.f32 %v7688_v20, %v7569_v56 }
 0x66b   : > { %v7648_v27 = vpop.f32.mrf.mxu1  ;;  %v7771_v7 = vadd.f32 %v7628_v55, %v7566_v58 }
 0x66c   : > { %v7772_v41 = vadd.f32 %v7648_v27, %v7567_v29 }
 0x671   : > { %v7748_v28 = vpop.f32.mrf.mxu2  ;;  %v7768_v19 = vpop.f32.mrf.mxu3 }
 0x672   : > { %v7708_v14 = vpop.f32.mrf.mxu0  ;;  %v7778_v45 = vadd.f32 %v7768_v19, %v7573_v48  ;;  %v7777_v44 = vadd.f32 %v7748_v28, %v7572_v4 }
 0x673   : > { %v7728_v21 = vpop.f32.mrf.mxu1  ;;  %v7775_v47 = vadd.f32 %v7708_v14, %v7570_v39 }
 0x674   : > { %v7776_v9 = vadd.f32 %v7728_v21, %v7571_v1 }
 0x679   : > { %v7873_v63 = vpop.f32.mrf.mxu2  ;;  %v7893_v62 = vpop.f32.mrf.mxu3 }
 0x67a   : > { %v7978_v46 = vadd.f32 %v7873_v63, %v7773_v8  ;;  %v7979_v16 = vadd.f32 %v7893_v62, %v7774_v13 }
 0x67b   : > { %v7833_v49 = vpop.f32.mrf.mxu0  ;;  %v7853_v51 = vpop.f32.mrf.mxu1 }
 0x67c   : > { %v7976_v12 = vadd.f32 %v7833_v49, %v7771_v7  ;;  %v7977_v38 = vadd.f32 %v7853_v51, %v7772_v41 }
 0x682   : > { %v7953_v0 = vpop.f32.mrf.mxu2  ;;  %v7973_v59 = vpop.f32.mrf.mxu3 }
 0x683   : > { %v7913_v2 = vpop.f32.mrf.mxu0  ;;  %v7933_v42 = vpop.f32.mrf.mxu1  ;;  %v7983_v31 = vadd.f32 %v7973_v59, %v7778_v45  ;;  %v7982_v20 = vadd.f32 %v7953_v0, %v7777_v44 }
 0x684   : > { %v7980_v34 = vadd.f32 %v7913_v2, %v7775_v47  ;;  %v7981_v43 = vadd.f32 %v7933_v42, %v7776_v9 }
 0x68a   : > { %v8078_v60 = vpop.f32.mrf.mxu2  ;;  %v8098_v5 = vpop.f32.mrf.mxu3 }
 0x68b   : > { %v8183_v35 = vadd.f32 %v8078_v60, %v7978_v46  ;;  %v8184_v26 = vadd.f32 %v8098_v5, %v7979_v16  ;;  %v8038_v50 = vpop.f32.mrf.mxu0  ;;  %v8058_v52 = vpop.f32.mrf.mxu1 }
 0x68c   : > { %v8181_v10 = vadd.f32 %v8038_v50, %v7976_v12  ;;  %v8182_v32 = vadd.f32 %v8058_v52, %v7977_v38 }
 0x68d   : > { %v8198_v23 = vadd.f32 %v8193_v37, %v8184_v26  ;;  %v8197_v61 = vadd.f32 %v8193_v37, %v8183_v35 }
 0x68e   : > { %v8196_v3 = vadd.f32 %v8193_v37, %v8182_v32  ;;  %v8195_v53 = vadd.f32 %v8193_v37, %v8181_v10 }
 0x68f   : > { %v8212_v54 = vrot.slane %v8198_v23, 4 }
 0x690   : > { %v8211_v30 = vrot.slane %v8196_v3, 4 }
 0x691   : > { %v8217_v25 = vsel %vm8215_vm11, %v8197_v61, %v8212_v54 }
 0x692   : > { %v8178_v11 = vpop.f32.mrf.mxu3  ;;  %v8216_v6 = vsel %vm8215_vm11, %v8195_v53, %v8211_v30  ;;  %8225 = vst [vmem:[%s11513_s24 + $0x8] sm:$0x77] %v8217_v25 }
 0x693   : > { %v8188_v55 = vadd.f32 %v8178_v11, %v7983_v31  ;;  %v8118_v27 = vpop.f32.mrf.mxu0  ;;  %v8138_v19 = vpop.f32.mrf.mxu1  ;;  %8224 = vst [vmem:[%s11513_s24] sm:$0x77] %v8216_v6 }
 0x694   : > { %v8185_v14 = vadd.f32 %v8118_v27, %v7980_v34  ;;  %v8186_v21 = vadd.f32 %v8138_v19, %v7981_v43  ;;  %v8158_v63 = vpop.f32.mrf.mxu2 }
 0x695   : > { %v8202_v28 = vadd.f32 %v8193_v37, %v8188_v55  ;;  %v8187_v62 = vadd.f32 %v8158_v63, %v7982_v20 }
 0x696   : > { %v8200_v49 = vadd.f32 %v8193_v37, %v8186_v21  ;;  %v8199_v17 = vadd.f32 %v8193_v37, %v8185_v14 }
 0x697   : > { %v8214_v51 = vrot.slane %v8202_v28, 4  ;;  %v8201_v59 = vadd.f32 %v8193_v37, %v8187_v62 }
 0x698   : > { %v8213_v33 = vrot.slane %v8200_v49, 4 }
 0x699   : > { %v8219_v2 = vsel %vm8215_vm11, %v8201_v59, %v8214_v51 }
 0x69a   : > { %v8218_v0 = vsel %vm8215_vm11, %v8199_v17, %v8213_v33  ;;  %8227 = vst [vmem:[%s11513_s24 + $0x18] sm:$0x77] %v8219_v2 }
 0x69b   : > { %8226 = vst [vmem:[%s11513_s24 + $0x10] sm:$0x77] %v8218_v0 }
 0x69c PF: > { %s20_s13 = sadd.s32 1, %s8721_s13  }
 0x69d   : > { %p17_p4 = scmp.ge.s32.totalorder %s20_s13, 4  }
 0x69f   :  { %19 = sbr.rel (!%p17_p4) target bundleno = 1 (0x1), region = 156 }

</bundles_post_ra>
